<compile_context>
chip_gen: v6e
topology: v6e:2x2x1
jax: 0.10.0
libtpu: 0.0.40
codegen_flags: <defaults>
</compile_context>

<pallas_src>
import jax
import jax.numpy as jnp
import numpy as np
from jax.experimental import pallas as pl
from jax.experimental.pallas import tpu as pltpu


# ---------------------------------------------------------------------------
# Fused Pallas kernel: combined-batch LSTM stack + MLP head, one call.
# ---------------------------------------------------------------------------
def _make_fused_kernel(num_layers, seq_len):
    n_fixed_in = 3                # x (flattened), h0, c0
    n_layer_w = 3 * num_layers    # (wx, wh, b) per layer
    n_head_w = 7                  # w1a, w1b, b1, w2, b2, w3, b3
    n_in = n_fixed_in + n_layer_w + n_head_w

    def kernel(*refs):
        x_ref, h0_ref, c0_ref = refs[0], refs[1], refs[2]
        layer_refs = refs[n_fixed_in:n_fixed_in + n_layer_w]
        (w1a_ref, w1b_ref, b1_ref, w2_ref, b2_ref,
         w3_ref, b3_ref) = refs[n_fixed_in + n_layer_w:n_in]
        (out_ref, h1N_ref, c1N_ref, h2N_ref, c2N_ref) = refs[n_in:n_in + 5]
        seq_ref, a1_ref, a2_ref = refs[n_in + 5:]

        H = h0_ref.shape[-1]
        B2 = h0_ref.shape[1]          # combined batch (= 2 * B)
        B = B2 // 2

        def sigmoid(z):
            # tanh runs on the EUP -> keeps the divide off the VALU; stable.
            return 0.5 * jnp.tanh(0.5 * z) + 0.5

        x_all = x_ref[...]            # (T*2B, D_in) for layer 0

        for l in range(num_layers):
            wx = layer_refs[3 * l][...]          # (Din, 4H)
            wh = layer_refs[3 * l + 1][...]      # (H,   4H)
            b = layer_refs[3 * l + 2][...]       # (1,   4H)
            last = (l == num_layers - 1)

            # All timestep input projections in ONE matmul, off the h-chain.
            xp_all = jnp.dot(x_all, wx,
                             preferred_element_type=jnp.float32) + b

            h = h0_ref[l]
            c = c0_ref[l]
            for t in range(seq_len):             # unrolled (T small, static)
                gates = xp_all[t * B2:(t + 1) * B2] + jnp.dot(
                    h, wh, preferred_element_type=jnp.float32)
                i = sigmoid(gates[:, 0 * H:1 * H])
                f = sigmoid(gates[:, 1 * H:2 * H])
                g = jnp.tanh(gates[:, 2 * H:3 * H])
                o = sigmoid(gates[:, 3 * H:4 * H])
                c = f * c + i * g
                h = o * jnp.tanh(c)
                if not last:
                    # Stage layer output sequence for the next layer's
                    # batched input projection (tile-aligned static store).
                    seq_ref[t * B2:(t + 1) * B2, :] = h

            # Final states written exactly once; combined batch split back
            # into the two weight-shared passes.
            h1N_ref[l] = h[:B]
            c1N_ref[l] = c[:B]
            h2N_ref[l] = h[B:]
            c2N_ref[l] = c[B:]

            # Stage head inputs (per-layer final h of each pass).
            a1_ref[l * B:(l + 1) * B, :] = h[:B]
            a2_ref[l * B:(l + 1) * B, :] = h[B:]

            if not last:
                x_all = seq_ref[...]

        # Head on cat(h1, h2, dim=-1): concat folded into split-W1 dots,
        # run once over all num_layers*B rows.
        z1 = (jnp.dot(a1_ref[...], w1a_ref[...],
                      preferred_element_type=jnp.float32)
              + jnp.dot(a2_ref[...], w1b_ref[...],
                        preferred_element_type=jnp.float32)
              + b1_ref[...])
        z2 = jnp.dot(z1, w2_ref[...],
                     preferred_element_type=jnp.float32) + b2_ref[...]
        z3 = jnp.dot(z2, w3_ref[...],
                     preferred_element_type=jnp.float32) + b3_ref[...]
        for l in range(num_layers):
            out_ref[l] = z3[l * B:(l + 1) * B]

    return kernel


# ---------------------------------------------------------------------------
# ModelLSTM forward (single pallas_call)
# ---------------------------------------------------------------------------
@jax.jit
def model_lstm_forward(params, x1, x2, x1_lens, x2_lens, hidden_state1,
                       hidden_state2):
    # x1_lens / x2_lens are unused in the PyTorch forward as well.
    del x1_lens, x2_lens
    lstm_params = params["lstm"]
    w1, b1, w2, b2, w3, b3 = params["cls"]
    h01, c01 = hidden_state1
    h02, c02 = hidden_state2

    num_layers, B, H = h01.shape
    T, _, D = x1.shape
    O = w3.shape[1]
    assert len(lstm_params) == num_layers

    # Fuse both weight-shared passes into one combined batch of 2B rows, and
    # flatten time into rows so layer-0 input projections are one matmul.
    x = jnp.concatenate([x1, x2], axis=1).reshape(T * 2 * B, D)
    h0 = jnp.concatenate([h01, h02], axis=1)     # (L, 2B, H)
    c0 = jnp.concatenate([c01, c02], axis=1)

    # Split W1 (2H, 512) into the h1-half and h2-half (folds the feature cat).
    w1a, w1b = w1[:H], w1[H:]

    flat_lstm = []
    for (wx, wh, b) in lstm_params:
        flat_lstm += [wx, wh, b]

    kernel = _make_fused_kernel(num_layers, T)
    out_shapes = (
        jax.ShapeDtypeStruct((num_layers, B, O), jnp.float32),  # head output
        jax.ShapeDtypeStruct((num_layers, B, H), jnp.float32),  # h1 final
        jax.ShapeDtypeStruct((num_layers, B, H), jnp.float32),  # c1 final
        jax.ShapeDtypeStruct((num_layers, B, H), jnp.float32),  # h2 final
        jax.ShapeDtypeStruct((num_layers, B, H), jnp.float32),  # c2 final
    )
    out, h1, c1, h2, c2 = pl.pallas_call(
        kernel,
        out_shape=out_shapes,
        scratch_shapes=[
            pltpu.VMEM((T * 2 * B, H), jnp.float32),          # layer output seq
            pltpu.VMEM((num_layers * B, H), jnp.float32),     # head input (pass 1)
            pltpu.VMEM((num_layers * B, H), jnp.float32),     # head input (pass 2)
        ],
    )(x, h0, c0, *flat_lstm,
      w1a, w1b, b1.reshape(1, -1), w2, b2.reshape(1, -1), w3, b3.reshape(1, -1))

    return out, (h1, c1), (h2, c2)


# ---------------------------------------------------------------------------
# Pure-JAX reference (for correctness check)
# ---------------------------------------------------------------------------
def lstm_forward_ref(x, layer_params, h0, c0):
    T = x.shape[0]
    h_finals, c_finals = [], []
    layer_in = x
    for l, (wx, wh, b) in enumerate(layer_params):
        h = h0[l]
        c = c0[l]
        H = h.shape[-1]
        outs = []
        for t in range(T):
            gates = layer_in[t] @ wx + h @ wh + b[0]
            i = jax.nn.sigmoid(gates[:, 0 * H:1 * H])
            f = jax.nn.sigmoid(gates[:, 1 * H:2 * H])
            g = jnp.tanh(gates[:, 2 * H:3 * H])
            o = jax.nn.sigmoid(gates[:, 3 * H:4 * H])
            c = f * c + i * g
            h = o * jnp.tanh(c)
            outs.append(h)
        layer_in = jnp.stack(outs)
        h_finals.append(h)
        c_finals.append(c)
    return layer_in, jnp.stack(h_finals), jnp.stack(c_finals)


def model_lstm_forward_ref(params, x1, x2, h1s, h2s):
    _, h1, c1 = lstm_forward_ref(x1, params["lstm"], h1s[0], h1s[1])
    _, h2, c2 = lstm_forward_ref(x2, params["lstm"], h2s[0], h2s[1])
    out_tmp = jnp.concatenate([h1, h2], axis=2)
    L, B, twoH = out_tmp.shape
    flat = out_tmp.reshape(L * B, twoH)
    w1, b1, w2, b2, w3, b3 = params["cls"]
    out = ((flat @ w1 + b1) @ w2 + b2) @ w3 + b3
    return out.reshape(L, B, -1), (h1, c1), (h2, c2)


# ---------------------------------------------------------------------------
# Deterministic parameter init (PyTorch shapes, uniform(-1/sqrt(H), 1/sqrt(H)))
# ---------------------------------------------------------------------------
def init_params(key, input_dim, hidden, num_layers, output_dim):
    k = 1.0 / np.sqrt(hidden)
    keys = iter(jax.random.split(key, 4 * num_layers + 6))

    lstm_params = []
    for l in range(num_layers):
        in_dim = input_dim if l == 0 else hidden
        w_ih = jax.random.uniform(next(keys), (4 * hidden, in_dim),
                                  minval=-k, maxval=k, dtype=jnp.float32)
        w_hh = jax.random.uniform(next(keys), (4 * hidden, hidden),
                                  minval=-k, maxval=k, dtype=jnp.float32)
        b_ih = jax.random.uniform(next(keys), (4 * hidden,),
                                  minval=-k, maxval=k, dtype=jnp.float32)
        b_hh = jax.random.uniform(next(keys), (4 * hidden,),
                                  minval=-k, maxval=k, dtype=jnp.float32)
        lstm_params.append((w_ih.T, w_hh.T, (b_ih + b_hh).reshape(1, -1)))

    def linear(key, fan_in, fan_out):
        kk = 1.0 / np.sqrt(fan_in)
        k1, k2 = jax.random.split(key)
        w = jax.random.uniform(k1, (fan_out, fan_in), minval=-kk, maxval=kk,
                               dtype=jnp.float32)
        b = jax.random.uniform(k2, (fan_out,), minval=-kk, maxval=kk,
                               dtype=jnp.float32)
        return w.T, b

    w1, b1 = linear(next(keys), 2 * hidden, 512)
    w2, b2 = linear(next(keys), 512, 512)
    w3, b3 = linear(next(keys), 512, output_dim)

    return {"lstm": lstm_params, "cls": (w1, b1, w2, b2, w3, b3)}


if __name__ == "__main__":
    input_dim = 16
    hidden = 32
    num_layers = 2
    output_dim = 10
    T, B = 8, 4

    key = jax.random.PRNGKey(0)
    kp, kx1, kx2, kh1, kc1, kh2, kc2 = jax.random.split(key, 7)

    params = init_params(kp, input_dim, hidden, num_layers, output_dim)

    x1 = jax.random.normal(kx1, (T, B, input_dim), dtype=jnp.float32)
    x2 = jax.random.normal(kx2, (T, B, input_dim), dtype=jnp.float32)
    x1_lens = jnp.full((B,), T, dtype=jnp.int32)   # unused (as in PyTorch forward)
    x2_lens = jnp.full((B,), T, dtype=jnp.int32)
    hidden_state1 = (jax.random.normal(kh1, (num_layers, B, hidden), jnp.float32),
                     jax.random.normal(kc1, (num_layers, B, hidden), jnp.float32))
    hidden_state2 = (jax.random.normal(kh2, (num_layers, B, hidden), jnp.float32),
                     jax.random.normal(kc2, (num_layers, B, hidden), jnp.float32))

    out, (h1, c1), (h2, c2) = model_lstm_forward(
        params, x1, x2, x1_lens, x2_lens, hidden_state1, hidden_state2)
    jax.block_until_ready((out, h1, c1, h2, c2))

    # Correctness check against a pure-JAX reference of the same math.
    out_r, (h1_r, c1_r), (h2_r, c2_r) = model_lstm_forward_ref(
        params, x1, x2, hidden_state1, hidden_state2)
    np.testing.assert_allclose(np.asarray(out), np.asarray(out_r),
                               rtol=1e-3, atol=1e-3)
    np.testing.assert_allclose(np.asarray(h1), np.asarray(h1_r),
                               rtol=1e-3, atol=1e-3)
    np.testing.assert_allclose(np.asarray(c1), np.asarray(c1_r),
                               rtol=1e-3, atol=1e-3)
    np.testing.assert_allclose(np.asarray(h2), np.asarray(h2_r),
                               rtol=1e-3, atol=1e-3)
    np.testing.assert_allclose(np.asarray(c2), np.asarray(c2_r),
                               rtol=1e-3, atol=1e-3)

    assert out.shape == (num_layers, B, output_dim)
    print("KERNEL_OK")
</pallas_src>

<mosaic_0001>
module attributes {stable_mosaic.version = 11 : i64} {
  func.func @kernel(%arg0: memref<64x16xf32, #tpu.memory_space<vmem>>, %arg1: memref<2x8x32xf32, #tpu.memory_space<vmem>>, %arg2: memref<2x8x32xf32, #tpu.memory_space<vmem>>, %arg3: memref<16x128xf32, #tpu.memory_space<vmem>>, %arg4: memref<32x128xf32, #tpu.memory_space<vmem>>, %arg5: memref<1x128xf32, #tpu.memory_space<vmem>>, %arg6: memref<32x128xf32, #tpu.memory_space<vmem>>, %arg7: memref<32x128xf32, #tpu.memory_space<vmem>>, %arg8: memref<1x128xf32, #tpu.memory_space<vmem>>, %arg9: memref<32x512xf32, #tpu.memory_space<vmem>>, %arg10: memref<32x512xf32, #tpu.memory_space<vmem>>, %arg11: memref<1x512xf32, #tpu.memory_space<vmem>>, %arg12: memref<512x512xf32, #tpu.memory_space<vmem>>, %arg13: memref<1x512xf32, #tpu.memory_space<vmem>>, %arg14: memref<512x10xf32, #tpu.memory_space<vmem>>, %arg15: memref<1x10xf32, #tpu.memory_space<vmem>>, %arg16: memref<2x4x10xf32, #tpu.memory_space<vmem>>, %arg17: memref<2x4x32xf32, #tpu.memory_space<vmem>>, %arg18: memref<2x4x32xf32, #tpu.memory_space<vmem>>, %arg19: memref<2x4x32xf32, #tpu.memory_space<vmem>>, %arg20: memref<2x4x32xf32, #tpu.memory_space<vmem>>, %arg21: memref<64x32xf32, #tpu.memory_space<vmem>>, %arg22: memref<8x32xf32, #tpu.memory_space<vmem>>, %arg23: memref<8x32xf32, #tpu.memory_space<vmem>>) attributes {dimension_semantics = [], scalar_prefetch = 0 : i64, scratch_operands = 3 : i64, tpu.core_type = #tpu.core_type<tc>} {
    %c0 = arith.constant 0 : index
    %c0_0 = arith.constant 0 : index
    %0 = vector.load %arg0[%c0, %c0_0] : memref<64x16xf32, #tpu.memory_space<vmem>>, vector<64x16xf32>
    %c0_1 = arith.constant 0 : index
    %c0_2 = arith.constant 0 : index
    %1 = vector.load %arg3[%c0_1, %c0_2] : memref<16x128xf32, #tpu.memory_space<vmem>>, vector<16x128xf32>
    %c0_3 = arith.constant 0 : index
    %c0_4 = arith.constant 0 : index
    %2 = vector.load %arg4[%c0_3, %c0_4] : memref<32x128xf32, #tpu.memory_space<vmem>>, vector<32x128xf32>
    %c0_5 = arith.constant 0 : index
    %c0_6 = arith.constant 0 : index
    %3 = vector.load %arg5[%c0_5, %c0_6] : memref<1x128xf32, #tpu.memory_space<vmem>>, vector<1x128xf32>
    %cst = arith.constant dense<0.000000e+00> : vector<64x128xf32>
    %4 = tpu.matmul %0, %1, %cst {dimension_numbers = #tpu.dot_dimension_numbers<[1], [0], [0], [1], [0, 0, 1, 1], [], []>} : vector<64x16xf32>, vector<16x128xf32>, vector<64x128xf32> -> vector<64x128xf32>
    %5 = vector.broadcast %3 : vector<1x128xf32> to vector<64x128xf32>
    %6 = arith.addf %4, %5 : vector<64x128xf32>
    %c0_7 = arith.constant 0 : index
    %c0_8 = arith.constant 0 : index
    %c0_9 = arith.constant 0 : index
    %7 = vector.load %arg1[%c0_7, %c0_8, %c0_9] : memref<2x8x32xf32, #tpu.memory_space<vmem>>, vector<1x8x32xf32>
    %8 = vector.shape_cast %7 : vector<1x8x32xf32> to vector<8x32xf32>
    %c0_10 = arith.constant 0 : index
    %c0_11 = arith.constant 0 : index
    %c0_12 = arith.constant 0 : index
    %9 = vector.load %arg2[%c0_10, %c0_11, %c0_12] : memref<2x8x32xf32, #tpu.memory_space<vmem>>, vector<1x8x32xf32>
    %10 = vector.shape_cast %9 : vector<1x8x32xf32> to vector<8x32xf32>
    %11 = vector.extract_strided_slice %6 {offsets = [0, 0], sizes = [8, 128], strides = [1, 1]} : vector<64x128xf32> to vector<8x128xf32>
    %cst_13 = arith.constant dense<0.000000e+00> : vector<8x128xf32>
    %12 = tpu.matmul %8, %2, %cst_13 {dimension_numbers = #tpu.dot_dimension_numbers<[1], [0], [0], [1], [0, 0, 1, 1], [], []>} : vector<8x32xf32>, vector<32x128xf32>, vector<8x128xf32> -> vector<8x128xf32>
    %13 = arith.addf %11, %12 : vector<8x128xf32>
    %14 = vector.extract_strided_slice %13 {offsets = [0, 0], sizes = [8, 32], strides = [1, 1]} : vector<8x128xf32> to vector<8x32xf32>
    %cst_14 = arith.constant 5.000000e-01 : f32
    %15 = vector.broadcast %cst_14 : f32 to vector<8x32xf32>
    %16 = arith.mulf %15, %14 : vector<8x32xf32>
    %17 = math.tanh %16 : vector<8x32xf32>
    %cst_15 = arith.constant 5.000000e-01 : f32
    %18 = vector.broadcast %cst_15 : f32 to vector<8x32xf32>
    %19 = arith.mulf %18, %17 : vector<8x32xf32>
    %cst_16 = arith.constant 5.000000e-01 : f32
    %20 = vector.broadcast %cst_16 : f32 to vector<8x32xf32>
    %21 = arith.addf %19, %20 : vector<8x32xf32>
    %22 = vector.extract_strided_slice %13 {offsets = [0, 32], sizes = [8, 32], strides = [1, 1]} : vector<8x128xf32> to vector<8x32xf32>
    %cst_17 = arith.constant 5.000000e-01 : f32
    %23 = vector.broadcast %cst_17 : f32 to vector<8x32xf32>
    %24 = arith.mulf %23, %22 : vector<8x32xf32>
    %25 = math.tanh %24 : vector<8x32xf32>
    %cst_18 = arith.constant 5.000000e-01 : f32
    %26 = vector.broadcast %cst_18 : f32 to vector<8x32xf32>
    %27 = arith.mulf %26, %25 : vector<8x32xf32>
    %cst_19 = arith.constant 5.000000e-01 : f32
    %28 = vector.broadcast %cst_19 : f32 to vector<8x32xf32>
    %29 = arith.addf %27, %28 : vector<8x32xf32>
    %30 = vector.extract_strided_slice %13 {offsets = [0, 64], sizes = [8, 32], strides = [1, 1]} : vector<8x128xf32> to vector<8x32xf32>
    %31 = math.tanh %30 : vector<8x32xf32>
    %32 = vector.extract_strided_slice %13 {offsets = [0, 96], sizes = [8, 32], strides = [1, 1]} : vector<8x128xf32> to vector<8x32xf32>
    %cst_20 = arith.constant 5.000000e-01 : f32
    %33 = vector.broadcast %cst_20 : f32 to vector<8x32xf32>
    %34 = arith.mulf %33, %32 : vector<8x32xf32>
    %35 = math.tanh %34 : vector<8x32xf32>
    %cst_21 = arith.constant 5.000000e-01 : f32
    %36 = vector.broadcast %cst_21 : f32 to vector<8x32xf32>
    %37 = arith.mulf %36, %35 : vector<8x32xf32>
    %cst_22 = arith.constant 5.000000e-01 : f32
    %38 = vector.broadcast %cst_22 : f32 to vector<8x32xf32>
    %39 = arith.addf %37, %38 : vector<8x32xf32>
    %40 = arith.mulf %29, %10 : vector<8x32xf32>
    %41 = arith.mulf %21, %31 : vector<8x32xf32>
    %42 = arith.addf %40, %41 : vector<8x32xf32>
    %43 = math.tanh %42 : vector<8x32xf32>
    %44 = arith.mulf %39, %43 : vector<8x32xf32>
    %c0_23 = arith.constant 0 : index
    %c0_24 = arith.constant 0 : index
    %45 = vector.load %arg21[%c0_23, %c0_24] : memref<64x32xf32, #tpu.memory_space<vmem>>, vector<8x32xf32>
    tpu.vector_store %arg21[%c0_23, %c0_24], %44 {strides = array<i32>} : memref<64x32xf32, #tpu.memory_space<vmem>>, vector<8x32xf32>,
    %46 = vector.extract_strided_slice %6 {offsets = [8, 0], sizes = [8, 128], strides = [1, 1]} : vector<64x128xf32> to vector<8x128xf32>
    %cst_25 = arith.constant dense<0.000000e+00> : vector<8x128xf32>
    %47 = tpu.matmul %44, %2, %cst_25 {dimension_numbers = #tpu.dot_dimension_numbers<[1], [0], [0], [1], [0, 0, 1, 1], [], []>} : vector<8x32xf32>, vector<32x128xf32>, vector<8x128xf32> -> vector<8x128xf32>
    %48 = arith.addf %46, %47 : vector<8x128xf32>
    %49 = vector.extract_strided_slice %48 {offsets = [0, 0], sizes = [8, 32], strides = [1, 1]} : vector<8x128xf32> to vector<8x32xf32>
    %cst_26 = arith.constant 5.000000e-01 : f32
    %50 = vector.broadcast %cst_26 : f32 to vector<8x32xf32>
    %51 = arith.mulf %50, %49 : vector<8x32xf32>
    %52 = math.tanh %51 : vector<8x32xf32>
    %cst_27 = arith.constant 5.000000e-01 : f32
    %53 = vector.broadcast %cst_27 : f32 to vector<8x32xf32>
    %54 = arith.mulf %53, %52 : vector<8x32xf32>
    %cst_28 = arith.constant 5.000000e-01 : f32
    %55 = vector.broadcast %cst_28 : f32 to vector<8x32xf32>
    %56 = arith.addf %54, %55 : vector<8x32xf32>
    %57 = vector.extract_strided_slice %48 {offsets = [0, 32], sizes = [8, 32], strides = [1, 1]} : vector<8x128xf32> to vector<8x32xf32>
    %cst_29 = arith.constant 5.000000e-01 : f32
    %58 = vector.broadcast %cst_29 : f32 to vector<8x32xf32>
    %59 = arith.mulf %58, %57 : vector<8x32xf32>
    %60 = math.tanh %59 : vector<8x32xf32>
    %cst_30 = arith.constant 5.000000e-01 : f32
    %61 = vector.broadcast %cst_30 : f32 to vector<8x32xf32>
    %62 = arith.mulf %61, %60 : vector<8x32xf32>
    %cst_31 = arith.constant 5.000000e-01 : f32
    %63 = vector.broadcast %cst_31 : f32 to vector<8x32xf32>
    %64 = arith.addf %62, %63 : vector<8x32xf32>
    %65 = vector.extract_strided_slice %48 {offsets = [0, 64], sizes = [8, 32], strides = [1, 1]} : vector<8x128xf32> to vector<8x32xf32>
    %66 = math.tanh %65 : vector<8x32xf32>
    %67 = vector.extract_strided_slice %48 {offsets = [0, 96], sizes = [8, 32], strides = [1, 1]} : vector<8x128xf32> to vector<8x32xf32>
    %cst_32 = arith.constant 5.000000e-01 : f32
    %68 = vector.broadcast %cst_32 : f32 to vector<8x32xf32>
    %69 = arith.mulf %68, %67 : vector<8x32xf32>
    %70 = math.tanh %69 : vector<8x32xf32>
    %cst_33 = arith.constant 5.000000e-01 : f32
    %71 = vector.broadcast %cst_33 : f32 to vector<8x32xf32>
    %72 = arith.mulf %71, %70 : vector<8x32xf32>
    %cst_34 = arith.constant 5.000000e-01 : f32
    %73 = vector.broadcast %cst_34 : f32 to vector<8x32xf32>
    %74 = arith.addf %72, %73 : vector<8x32xf32>
    %75 = arith.mulf %64, %42 : vector<8x32xf32>
    %76 = arith.mulf %56, %66 : vector<8x32xf32>
    %77 = arith.addf %75, %76 : vector<8x32xf32>
    %78 = math.tanh %77 : vector<8x32xf32>
    %79 = arith.mulf %74, %78 : vector<8x32xf32>
    %c8 = arith.constant 8 : index
    %c0_35 = arith.constant 0 : index
    %80 = vector.load %arg21[%c8, %c0_35] : memref<64x32xf32, #tpu.memory_space<vmem>>, vector<8x32xf32>
    tpu.vector_store %arg21[%c8, %c0_35], %79 {strides = array<i32>} : memref<64x32xf32, #tpu.memory_space<vmem>>, vector<8x32xf32>,
    %81 = vector.extract_strided_slice %6 {offsets = [16, 0], sizes = [8, 128], strides = [1, 1]} : vector<64x128xf32> to vector<8x128xf32>
    %cst_36 = arith.constant dense<0.000000e+00> : vector<8x128xf32>
    %82 = tpu.matmul %79, %2, %cst_36 {dimension_numbers = #tpu.dot_dimension_numbers<[1], [0], [0], [1], [0, 0, 1, 1], [], []>} : vector<8x32xf32>, vector<32x128xf32>, vector<8x128xf32> -> vector<8x128xf32>
    %83 = arith.addf %81, %82 : vector<8x128xf32>
    %84 = vector.extract_strided_slice %83 {offsets = [0, 0], sizes = [8, 32], strides = [1, 1]} : vector<8x128xf32> to vector<8x32xf32>
    %cst_37 = arith.constant 5.000000e-01 : f32
    %85 = vector.broadcast %cst_37 : f32 to vector<8x32xf32>
    %86 = arith.mulf %85, %84 : vector<8x32xf32>
    %87 = math.tanh %86 : vector<8x32xf32>
    %cst_38 = arith.constant 5.000000e-01 : f32
    %88 = vector.broadcast %cst_38 : f32 to vector<8x32xf32>
    %89 = arith.mulf %88, %87 : vector<8x32xf32>
    %cst_39 = arith.constant 5.000000e-01 : f32
    %90 = vector.broadcast %cst_39 : f32 to vector<8x32xf32>
    %91 = arith.addf %89, %90 : vector<8x32xf32>
    %92 = vector.extract_strided_slice %83 {offsets = [0, 32], sizes = [8, 32], strides = [1, 1]} : vector<8x128xf32> to vector<8x32xf32>
    %cst_40 = arith.constant 5.000000e-01 : f32
    %93 = vector.broadcast %cst_40 : f32 to vector<8x32xf32>
    %94 = arith.mulf %93, %92 : vector<8x32xf32>
    %95 = math.tanh %94 : vector<8x32xf32>
    %cst_41 = arith.constant 5.000000e-01 : f32
    %96 = vector.broadcast %cst_41 : f32 to vector<8x32xf32>
    %97 = arith.mulf %96, %95 : vector<8x32xf32>
    %cst_42 = arith.constant 5.000000e-01 : f32
    %98 = vector.broadcast %cst_42 : f32 to vector<8x32xf32>
    %99 = arith.addf %97, %98 : vector<8x32xf32>
    %100 = vector.extract_strided_slice %83 {offsets = [0, 64], sizes = [8, 32], strides = [1, 1]} : vector<8x128xf32> to vector<8x32xf32>
    %101 = math.tanh %100 : vector<8x32xf32>
    %102 = vector.extract_strided_slice %83 {offsets = [0, 96], sizes = [8, 32], strides = [1, 1]} : vector<8x128xf32> to vector<8x32xf32>
    %cst_43 = arith.constant 5.000000e-01 : f32
    %103 = vector.broadcast %cst_43 : f32 to vector<8x32xf32>
    %104 = arith.mulf %103, %102 : vector<8x32xf32>
    %105 = math.tanh %104 : vector<8x32xf32>
    %cst_44 = arith.constant 5.000000e-01 : f32
    %106 = vector.broadcast %cst_44 : f32 to vector<8x32xf32>
    %107 = arith.mulf %106, %105 : vector<8x32xf32>
    %cst_45 = arith.constant 5.000000e-01 : f32
    %108 = vector.broadcast %cst_45 : f32 to vector<8x32xf32>
    %109 = arith.addf %107, %108 : vector<8x32xf32>
    %110 = arith.mulf %99, %77 : vector<8x32xf32>
    %111 = arith.mulf %91, %101 : vector<8x32xf32>
    %112 = arith.addf %110, %111 : vector<8x32xf32>
    %113 = math.tanh %112 : vector<8x32xf32>
    %114 = arith.mulf %109, %113 : vector<8x32xf32>
    %c16 = arith.constant 16 : index
    %c0_46 = arith.constant 0 : index
    %115 = vector.load %arg21[%c16, %c0_46] : memref<64x32xf32, #tpu.memory_space<vmem>>, vector<8x32xf32>
    tpu.vector_store %arg21[%c16, %c0_46], %114 {strides = array<i32>} : memref<64x32xf32, #tpu.memory_space<vmem>>, vector<8x32xf32>,
    %116 = vector.extract_strided_slice %6 {offsets = [24, 0], sizes = [8, 128], strides = [1, 1]} : vector<64x128xf32> to vector<8x128xf32>
    %cst_47 = arith.constant dense<0.000000e+00> : vector<8x128xf32>
    %117 = tpu.matmul %114, %2, %cst_47 {dimension_numbers = #tpu.dot_dimension_numbers<[1], [0], [0], [1], [0, 0, 1, 1], [], []>} : vector<8x32xf32>, vector<32x128xf32>, vector<8x128xf32> -> vector<8x128xf32>
    %118 = arith.addf %116, %117 : vector<8x128xf32>
    %119 = vector.extract_strided_slice %118 {offsets = [0, 0], sizes = [8, 32], strides = [1, 1]} : vector<8x128xf32> to vector<8x32xf32>
    %cst_48 = arith.constant 5.000000e-01 : f32
    %120 = vector.broadcast %cst_48 : f32 to vector<8x32xf32>
    %121 = arith.mulf %120, %119 : vector<8x32xf32>
    %122 = math.tanh %121 : vector<8x32xf32>
    %cst_49 = arith.constant 5.000000e-01 : f32
    %123 = vector.broadcast %cst_49 : f32 to vector<8x32xf32>
    %124 = arith.mulf %123, %122 : vector<8x32xf32>
    %cst_50 = arith.constant 5.000000e-01 : f32
    %125 = vector.broadcast %cst_50 : f32 to vector<8x32xf32>
    %126 = arith.addf %124, %125 : vector<8x32xf32>
    %127 = vector.extract_strided_slice %118 {offsets = [0, 32], sizes = [8, 32], strides = [1, 1]} : vector<8x128xf32> to vector<8x32xf32>
    %cst_51 = arith.constant 5.000000e-01 : f32
    %128 = vector.broadcast %cst_51 : f32 to vector<8x32xf32>
    %129 = arith.mulf %128, %127 : vector<8x32xf32>
    %130 = math.tanh %129 : vector<8x32xf32>
    %cst_52 = arith.constant 5.000000e-01 : f32
    %131 = vector.broadcast %cst_52 : f32 to vector<8x32xf32>
    %132 = arith.mulf %131, %130 : vector<8x32xf32>
    %cst_53 = arith.constant 5.000000e-01 : f32
    %133 = vector.broadcast %cst_53 : f32 to vector<8x32xf32>
    %134 = arith.addf %132, %133 : vector<8x32xf32>
    %135 = vector.extract_strided_slice %118 {offsets = [0, 64], sizes = [8, 32], strides = [1, 1]} : vector<8x128xf32> to vector<8x32xf32>
    %136 = math.tanh %135 : vector<8x32xf32>
    %137 = vector.extract_strided_slice %118 {offsets = [0, 96], sizes = [8, 32], strides = [1, 1]} : vector<8x128xf32> to vector<8x32xf32>
    %cst_54 = arith.constant 5.000000e-01 : f32
    %138 = vector.broadcast %cst_54 : f32 to vector<8x32xf32>
    %139 = arith.mulf %138, %137 : vector<8x32xf32>
    %140 = math.tanh %139 : vector<8x32xf32>
    %cst_55 = arith.constant 5.000000e-01 : f32
    %141 = vector.broadcast %cst_55 : f32 to vector<8x32xf32>
    %142 = arith.mulf %141, %140 : vector<8x32xf32>
    %cst_56 = arith.constant 5.000000e-01 : f32
    %143 = vector.broadcast %cst_56 : f32 to vector<8x32xf32>
    %144 = arith.addf %142, %143 : vector<8x32xf32>
    %145 = arith.mulf %134, %112 : vector<8x32xf32>
    %146 = arith.mulf %126, %136 : vector<8x32xf32>
    %147 = arith.addf %145, %146 : vector<8x32xf32>
    %148 = math.tanh %147 : vector<8x32xf32>
    %149 = arith.mulf %144, %148 : vector<8x32xf32>
    %c24 = arith.constant 24 : index
    %c0_57 = arith.constant 0 : index
    %150 = vector.load %arg21[%c24, %c0_57] : memref<64x32xf32, #tpu.memory_space<vmem>>, vector<8x32xf32>
    tpu.vector_store %arg21[%c24, %c0_57], %149 {strides = array<i32>} : memref<64x32xf32, #tpu.memory_space<vmem>>, vector<8x32xf32>,
    %151 = vector.extract_strided_slice %6 {offsets = [32, 0], sizes = [8, 128], strides = [1, 1]} : vector<64x128xf32> to vector<8x128xf32>
    %cst_58 = arith.constant dense<0.000000e+00> : vector<8x128xf32>
    %152 = tpu.matmul %149, %2, %cst_58 {dimension_numbers = #tpu.dot_dimension_numbers<[1], [0], [0], [1], [0, 0, 1, 1], [], []>} : vector<8x32xf32>, vector<32x128xf32>, vector<8x128xf32> -> vector<8x128xf32>
    %153 = arith.addf %151, %152 : vector<8x128xf32>
    %154 = vector.extract_strided_slice %153 {offsets = [0, 0], sizes = [8, 32], strides = [1, 1]} : vector<8x128xf32> to vector<8x32xf32>
    %cst_59 = arith.constant 5.000000e-01 : f32
    %155 = vector.broadcast %cst_59 : f32 to vector<8x32xf32>
    %156 = arith.mulf %155, %154 : vector<8x32xf32>
    %157 = math.tanh %156 : vector<8x32xf32>
    %cst_60 = arith.constant 5.000000e-01 : f32
    %158 = vector.broadcast %cst_60 : f32 to vector<8x32xf32>
    %159 = arith.mulf %158, %157 : vector<8x32xf32>
    %cst_61 = arith.constant 5.000000e-01 : f32
    %160 = vector.broadcast %cst_61 : f32 to vector<8x32xf32>
    %161 = arith.addf %159, %160 : vector<8x32xf32>
    %162 = vector.extract_strided_slice %153 {offsets = [0, 32], sizes = [8, 32], strides = [1, 1]} : vector<8x128xf32> to vector<8x32xf32>
    %cst_62 = arith.constant 5.000000e-01 : f32
    %163 = vector.broadcast %cst_62 : f32 to vector<8x32xf32>
    %164 = arith.mulf %163, %162 : vector<8x32xf32>
    %165 = math.tanh %164 : vector<8x32xf32>
    %cst_63 = arith.constant 5.000000e-01 : f32
    %166 = vector.broadcast %cst_63 : f32 to vector<8x32xf32>
    %167 = arith.mulf %166, %165 : vector<8x32xf32>
    %cst_64 = arith.constant 5.000000e-01 : f32
    %168 = vector.broadcast %cst_64 : f32 to vector<8x32xf32>
    %169 = arith.addf %167, %168 : vector<8x32xf32>
    %170 = vector.extract_strided_slice %153 {offsets = [0, 64], sizes = [8, 32], strides = [1, 1]} : vector<8x128xf32> to vector<8x32xf32>
    %171 = math.tanh %170 : vector<8x32xf32>
    %172 = vector.extract_strided_slice %153 {offsets = [0, 96], sizes = [8, 32], strides = [1, 1]} : vector<8x128xf32> to vector<8x32xf32>
    %cst_65 = arith.constant 5.000000e-01 : f32
    %173 = vector.broadcast %cst_65 : f32 to vector<8x32xf32>
    %174 = arith.mulf %173, %172 : vector<8x32xf32>
    %175 = math.tanh %174 : vector<8x32xf32>
    %cst_66 = arith.constant 5.000000e-01 : f32
    %176 = vector.broadcast %cst_66 : f32 to vector<8x32xf32>
    %177 = arith.mulf %176, %175 : vector<8x32xf32>
    %cst_67 = arith.constant 5.000000e-01 : f32
    %178 = vector.broadcast %cst_67 : f32 to vector<8x32xf32>
    %179 = arith.addf %177, %178 : vector<8x32xf32>
    %180 = arith.mulf %169, %147 : vector<8x32xf32>
    %181 = arith.mulf %161, %171 : vector<8x32xf32>
    %182 = arith.addf %180, %181 : vector<8x32xf32>
    %183 = math.tanh %182 : vector<8x32xf32>
    %184 = arith.mulf %179, %183 : vector<8x32xf32>
    %c32 = arith.constant 32 : index
    %c0_68 = arith.constant 0 : index
    %185 = vector.load %arg21[%c32, %c0_68] : memref<64x32xf32, #tpu.memory_space<vmem>>, vector<8x32xf32>
    tpu.vector_store %arg21[%c32, %c0_68], %184 {strides = array<i32>} : memref<64x32xf32, #tpu.memory_space<vmem>>, vector<8x32xf32>,
    %186 = vector.extract_strided_slice %6 {offsets = [40, 0], sizes = [8, 128], strides = [1, 1]} : vector<64x128xf32> to vector<8x128xf32>
    %cst_69 = arith.constant dense<0.000000e+00> : vector<8x128xf32>
    %187 = tpu.matmul %184, %2, %cst_69 {dimension_numbers = #tpu.dot_dimension_numbers<[1], [0], [0], [1], [0, 0, 1, 1], [], []>} : vector<8x32xf32>, vector<32x128xf32>, vector<8x128xf32> -> vector<8x128xf32>
    %188 = arith.addf %186, %187 : vector<8x128xf32>
    %189 = vector.extract_strided_slice %188 {offsets = [0, 0], sizes = [8, 32], strides = [1, 1]} : vector<8x128xf32> to vector<8x32xf32>
    %cst_70 = arith.constant 5.000000e-01 : f32
    %190 = vector.broadcast %cst_70 : f32 to vector<8x32xf32>
    %191 = arith.mulf %190, %189 : vector<8x32xf32>
    %192 = math.tanh %191 : vector<8x32xf32>
    %cst_71 = arith.constant 5.000000e-01 : f32
    %193 = vector.broadcast %cst_71 : f32 to vector<8x32xf32>
    %194 = arith.mulf %193, %192 : vector<8x32xf32>
    %cst_72 = arith.constant 5.000000e-01 : f32
    %195 = vector.broadcast %cst_72 : f32 to vector<8x32xf32>
    %196 = arith.addf %194, %195 : vector<8x32xf32>
    %197 = vector.extract_strided_slice %188 {offsets = [0, 32], sizes = [8, 32], strides = [1, 1]} : vector<8x128xf32> to vector<8x32xf32>
    %cst_73 = arith.constant 5.000000e-01 : f32
    %198 = vector.broadcast %cst_73 : f32 to vector<8x32xf32>
    %199 = arith.mulf %198, %197 : vector<8x32xf32>
    %200 = math.tanh %199 : vector<8x32xf32>
    %cst_74 = arith.constant 5.000000e-01 : f32
    %201 = vector.broadcast %cst_74 : f32 to vector<8x32xf32>
    %202 = arith.mulf %201, %200 : vector<8x32xf32>
    %cst_75 = arith.constant 5.000000e-01 : f32
    %203 = vector.broadcast %cst_75 : f32 to vector<8x32xf32>
    %204 = arith.addf %202, %203 : vector<8x32xf32>
    %205 = vector.extract_strided_slice %188 {offsets = [0, 64], sizes = [8, 32], strides = [1, 1]} : vector<8x128xf32> to vector<8x32xf32>
    %206 = math.tanh %205 : vector<8x32xf32>
    %207 = vector.extract_strided_slice %188 {offsets = [0, 96], sizes = [8, 32], strides = [1, 1]} : vector<8x128xf32> to vector<8x32xf32>
    %cst_76 = arith.constant 5.000000e-01 : f32
    %208 = vector.broadcast %cst_76 : f32 to vector<8x32xf32>
    %209 = arith.mulf %208, %207 : vector<8x32xf32>
    %210 = math.tanh %209 : vector<8x32xf32>
    %cst_77 = arith.constant 5.000000e-01 : f32
    %211 = vector.broadcast %cst_77 : f32 to vector<8x32xf32>
    %212 = arith.mulf %211, %210 : vector<8x32xf32>
    %cst_78 = arith.constant 5.000000e-01 : f32
    %213 = vector.broadcast %cst_78 : f32 to vector<8x32xf32>
    %214 = arith.addf %212, %213 : vector<8x32xf32>
    %215 = arith.mulf %204, %182 : vector<8x32xf32>
    %216 = arith.mulf %196, %206 : vector<8x32xf32>
    %217 = arith.addf %215, %216 : vector<8x32xf32>
    %218 = math.tanh %217 : vector<8x32xf32>
    %219 = arith.mulf %214, %218 : vector<8x32xf32>
    %c40 = arith.constant 40 : index
    %c0_79 = arith.constant 0 : index
    %220 = vector.load %arg21[%c40, %c0_79] : memref<64x32xf32, #tpu.memory_space<vmem>>, vector<8x32xf32>
    tpu.vector_store %arg21[%c40, %c0_79], %219 {strides = array<i32>} : memref<64x32xf32, #tpu.memory_space<vmem>>, vector<8x32xf32>,
    %221 = vector.extract_strided_slice %6 {offsets = [48, 0], sizes = [8, 128], strides = [1, 1]} : vector<64x128xf32> to vector<8x128xf32>
    %cst_80 = arith.constant dense<0.000000e+00> : vector<8x128xf32>
    %222 = tpu.matmul %219, %2, %cst_80 {dimension_numbers = #tpu.dot_dimension_numbers<[1], [0], [0], [1], [0, 0, 1, 1], [], []>} : vector<8x32xf32>, vector<32x128xf32>, vector<8x128xf32> -> vector<8x128xf32>
    %223 = arith.addf %221, %222 : vector<8x128xf32>
    %224 = vector.extract_strided_slice %223 {offsets = [0, 0], sizes = [8, 32], strides = [1, 1]} : vector<8x128xf32> to vector<8x32xf32>
    %cst_81 = arith.constant 5.000000e-01 : f32
    %225 = vector.broadcast %cst_81 : f32 to vector<8x32xf32>
    %226 = arith.mulf %225, %224 : vector<8x32xf32>
    %227 = math.tanh %226 : vector<8x32xf32>
    %cst_82 = arith.constant 5.000000e-01 : f32
    %228 = vector.broadcast %cst_82 : f32 to vector<8x32xf32>
    %229 = arith.mulf %228, %227 : vector<8x32xf32>
    %cst_83 = arith.constant 5.000000e-01 : f32
    %230 = vector.broadcast %cst_83 : f32 to vector<8x32xf32>
    %231 = arith.addf %229, %230 : vector<8x32xf32>
    %232 = vector.extract_strided_slice %223 {offsets = [0, 32], sizes = [8, 32], strides = [1, 1]} : vector<8x128xf32> to vector<8x32xf32>
    %cst_84 = arith.constant 5.000000e-01 : f32
    %233 = vector.broadcast %cst_84 : f32 to vector<8x32xf32>
    %234 = arith.mulf %233, %232 : vector<8x32xf32>
    %235 = math.tanh %234 : vector<8x32xf32>
    %cst_85 = arith.constant 5.000000e-01 : f32
    %236 = vector.broadcast %cst_85 : f32 to vector<8x32xf32>
    %237 = arith.mulf %236, %235 : vector<8x32xf32>
    %cst_86 = arith.constant 5.000000e-01 : f32
    %238 = vector.broadcast %cst_86 : f32 to vector<8x32xf32>
    %239 = arith.addf %237, %238 : vector<8x32xf32>
    %240 = vector.extract_strided_slice %223 {offsets = [0, 64], sizes = [8, 32], strides = [1, 1]} : vector<8x128xf32> to vector<8x32xf32>
    %241 = math.tanh %240 : vector<8x32xf32>
    %242 = vector.extract_strided_slice %223 {offsets = [0, 96], sizes = [8, 32], strides = [1, 1]} : vector<8x128xf32> to vector<8x32xf32>
    %cst_87 = arith.constant 5.000000e-01 : f32
    %243 = vector.broadcast %cst_87 : f32 to vector<8x32xf32>
    %244 = arith.mulf %243, %242 : vector<8x32xf32>
    %245 = math.tanh %244 : vector<8x32xf32>
    %cst_88 = arith.constant 5.000000e-01 : f32
    %246 = vector.broadcast %cst_88 : f32 to vector<8x32xf32>
    %247 = arith.mulf %246, %245 : vector<8x32xf32>
    %cst_89 = arith.constant 5.000000e-01 : f32
    %248 = vector.broadcast %cst_89 : f32 to vector<8x32xf32>
    %249 = arith.addf %247, %248 : vector<8x32xf32>
    %250 = arith.mulf %239, %217 : vector<8x32xf32>
    %251 = arith.mulf %231, %241 : vector<8x32xf32>
    %252 = arith.addf %250, %251 : vector<8x32xf32>
    %253 = math.tanh %252 : vector<8x32xf32>
    %254 = arith.mulf %249, %253 : vector<8x32xf32>
    %c48 = arith.constant 48 : index
    %c0_90 = arith.constant 0 : index
    %255 = vector.load %arg21[%c48, %c0_90] : memref<64x32xf32, #tpu.memory_space<vmem>>, vector<8x32xf32>
    tpu.vector_store %arg21[%c48, %c0_90], %254 {strides = array<i32>} : memref<64x32xf32, #tpu.memory_space<vmem>>, vector<8x32xf32>,
    %256 = vector.extract_strided_slice %6 {offsets = [56, 0], sizes = [8, 128], strides = [1, 1]} : vector<64x128xf32> to vector<8x128xf32>
    %cst_91 = arith.constant dense<0.000000e+00> : vector<8x128xf32>
    %257 = tpu.matmul %254, %2, %cst_91 {dimension_numbers = #tpu.dot_dimension_numbers<[1], [0], [0], [1], [0, 0, 1, 1], [], []>} : vector<8x32xf32>, vector<32x128xf32>, vector<8x128xf32> -> vector<8x128xf32>
    %258 = arith.addf %256, %257 : vector<8x128xf32>
    %259 = vector.extract_strided_slice %258 {offsets = [0, 0], sizes = [8, 32], strides = [1, 1]} : vector<8x128xf32> to vector<8x32xf32>
    %cst_92 = arith.constant 5.000000e-01 : f32
    %260 = vector.broadcast %cst_92 : f32 to vector<8x32xf32>
    %261 = arith.mulf %260, %259 : vector<8x32xf32>
    %262 = math.tanh %261 : vector<8x32xf32>
    %cst_93 = arith.constant 5.000000e-01 : f32
    %263 = vector.broadcast %cst_93 : f32 to vector<8x32xf32>
    %264 = arith.mulf %263, %262 : vector<8x32xf32>
    %cst_94 = arith.constant 5.000000e-01 : f32
    %265 = vector.broadcast %cst_94 : f32 to vector<8x32xf32>
    %266 = arith.addf %264, %265 : vector<8x32xf32>
    %267 = vector.extract_strided_slice %258 {offsets = [0, 32], sizes = [8, 32], strides = [1, 1]} : vector<8x128xf32> to vector<8x32xf32>
    %cst_95 = arith.constant 5.000000e-01 : f32
    %268 = vector.broadcast %cst_95 : f32 to vector<8x32xf32>
    %269 = arith.mulf %268, %267 : vector<8x32xf32>
    %270 = math.tanh %269 : vector<8x32xf32>
    %cst_96 = arith.constant 5.000000e-01 : f32
    %271 = vector.broadcast %cst_96 : f32 to vector<8x32xf32>
    %272 = arith.mulf %271, %270 : vector<8x32xf32>
    %cst_97 = arith.constant 5.000000e-01 : f32
    %273 = vector.broadcast %cst_97 : f32 to vector<8x32xf32>
    %274 = arith.addf %272, %273 : vector<8x32xf32>
    %275 = vector.extract_strided_slice %258 {offsets = [0, 64], sizes = [8, 32], strides = [1, 1]} : vector<8x128xf32> to vector<8x32xf32>
    %276 = math.tanh %275 : vector<8x32xf32>
    %277 = vector.extract_strided_slice %258 {offsets = [0, 96], sizes = [8, 32], strides = [1, 1]} : vector<8x128xf32> to vector<8x32xf32>
    %cst_98 = arith.constant 5.000000e-01 : f32
    %278 = vector.broadcast %cst_98 : f32 to vector<8x32xf32>
    %279 = arith.mulf %278, %277 : vector<8x32xf32>
    %280 = math.tanh %279 : vector<8x32xf32>
    %cst_99 = arith.constant 5.000000e-01 : f32
    %281 = vector.broadcast %cst_99 : f32 to vector<8x32xf32>
    %282 = arith.mulf %281, %280 : vector<8x32xf32>
    %cst_100 = arith.constant 5.000000e-01 : f32
    %283 = vector.broadcast %cst_100 : f32 to vector<8x32xf32>
    %284 = arith.addf %282, %283 : vector<8x32xf32>
    %285 = arith.mulf %274, %252 : vector<8x32xf32>
    %286 = arith.mulf %266, %276 : vector<8x32xf32>
    %287 = arith.addf %285, %286 : vector<8x32xf32>
    %288 = math.tanh %287 : vector<8x32xf32>
    %289 = arith.mulf %284, %288 : vector<8x32xf32>
    %c56 = arith.constant 56 : index
    %c0_101 = arith.constant 0 : index
    %290 = vector.load %arg21[%c56, %c0_101] : memref<64x32xf32, #tpu.memory_space<vmem>>, vector<8x32xf32>
    tpu.vector_store %arg21[%c56, %c0_101], %289 {strides = array<i32>} : memref<64x32xf32, #tpu.memory_space<vmem>>, vector<8x32xf32>,
    %291 = vector.extract_strided_slice %289 {offsets = [0, 0], sizes = [4, 32], strides = [1, 1]} : vector<8x32xf32> to vector<4x32xf32>
    %c0_102 = arith.constant 0 : index
    %c0_103 = arith.constant 0 : index
    %c0_104 = arith.constant 0 : index
    %292 = vector.load %arg17[%c0_102, %c0_103, %c0_104] : memref<2x4x32xf32, #tpu.memory_space<vmem>>, vector<1x4x32xf32>
    %293 = vector.shape_cast %292 : vector<1x4x32xf32> to vector<4x32xf32>
    %294 = vector.shape_cast %291 : vector<4x32xf32> to vector<1x4x32xf32>
    tpu.vector_store %arg17[%c0_102, %c0_103, %c0_104], %294 {strides = array<i32>} : memref<2x4x32xf32, #tpu.memory_space<vmem>>, vector<1x4x32xf32>,
    %295 = vector.extract_strided_slice %287 {offsets = [0, 0], sizes = [4, 32], strides = [1, 1]} : vector<8x32xf32> to vector<4x32xf32>
    %c0_105 = arith.constant 0 : index
    %c0_106 = arith.constant 0 : index
    %c0_107 = arith.constant 0 : index
    %296 = vector.load %arg18[%c0_105, %c0_106, %c0_107] : memref<2x4x32xf32, #tpu.memory_space<vmem>>, vector<1x4x32xf32>
    %297 = vector.shape_cast %296 : vector<1x4x32xf32> to vector<4x32xf32>
    %298 = vector.shape_cast %295 : vector<4x32xf32> to vector<1x4x32xf32>
    tpu.vector_store %arg18[%c0_105, %c0_106, %c0_107], %298 {strides = array<i32>} : memref<2x4x32xf32, #tpu.memory_space<vmem>>, vector<1x4x32xf32>,
    %299 = vector.extract_strided_slice %289 {offsets = [4, 0], sizes = [4, 32], strides = [1, 1]} : vector<8x32xf32> to vector<4x32xf32>
    %c0_108 = arith.constant 0 : index
    %c0_109 = arith.constant 0 : index
    %c0_110 = arith.constant 0 : index
    %300 = vector.load %arg19[%c0_108, %c0_109, %c0_110] : memref<2x4x32xf32, #tpu.memory_space<vmem>>, vector<1x4x32xf32>
    %301 = vector.shape_cast %300 : vector<1x4x32xf32> to vector<4x32xf32>
    %302 = vector.shape_cast %299 : vector<4x32xf32> to vector<1x4x32xf32>
    tpu.vector_store %arg19[%c0_108, %c0_109, %c0_110], %302 {strides = array<i32>} : memref<2x4x32xf32, #tpu.memory_space<vmem>>, vector<1x4x32xf32>,
    %303 = vector.extract_strided_slice %287 {offsets = [4, 0], sizes = [4, 32], strides = [1, 1]} : vector<8x32xf32> to vector<4x32xf32>
    %c0_111 = arith.constant 0 : index
    %c0_112 = arith.constant 0 : index
    %c0_113 = arith.constant 0 : index
    %304 = vector.load %arg20[%c0_111, %c0_112, %c0_113] : memref<2x4x32xf32, #tpu.memory_space<vmem>>, vector<1x4x32xf32>
    %305 = vector.shape_cast %304 : vector<1x4x32xf32> to vector<4x32xf32>
    %306 = vector.shape_cast %303 : vector<4x32xf32> to vector<1x4x32xf32>
    tpu.vector_store %arg20[%c0_111, %c0_112, %c0_113], %306 {strides = array<i32>} : memref<2x4x32xf32, #tpu.memory_space<vmem>>, vector<1x4x32xf32>,
    %307 = vector.extract_strided_slice %289 {offsets = [0, 0], sizes = [4, 32], strides = [1, 1]} : vector<8x32xf32> to vector<4x32xf32>
    %c0_114 = arith.constant 0 : index
    %c0_115 = arith.constant 0 : index
    %308 = vector.load %arg22[%c0_114, %c0_115] : memref<8x32xf32, #tpu.memory_space<vmem>>, vector<4x32xf32>
    tpu.vector_store %arg22[%c0_114, %c0_115], %307 {strides = array<i32>} : memref<8x32xf32, #tpu.memory_space<vmem>>, vector<4x32xf32>,
    %309 = vector.extract_strided_slice %289 {offsets = [4, 0], sizes = [4, 32], strides = [1, 1]} : vector<8x32xf32> to vector<4x32xf32>
    %c0_116 = arith.constant 0 : index
    %c0_117 = arith.constant 0 : index
    %310 = vector.load %arg23[%c0_116, %c0_117] : memref<8x32xf32, #tpu.memory_space<vmem>>, vector<4x32xf32>
    tpu.vector_store %arg23[%c0_116, %c0_117], %309 {strides = array<i32>} : memref<8x32xf32, #tpu.memory_space<vmem>>, vector<4x32xf32>,
    %c0_118 = arith.constant 0 : index
    %c0_119 = arith.constant 0 : index
    %311 = vector.load %arg21[%c0_118, %c0_119] : memref<64x32xf32, #tpu.memory_space<vmem>>, vector<64x32xf32>
    %c0_120 = arith.constant 0 : index
    %c0_121 = arith.constant 0 : index
    %312 = vector.load %arg6[%c0_120, %c0_121] : memref<32x128xf32, #tpu.memory_space<vmem>>, vector<32x128xf32>
    %c0_122 = arith.constant 0 : index
    %c0_123 = arith.constant 0 : index
    %313 = vector.load %arg7[%c0_122, %c0_123] : memref<32x128xf32, #tpu.memory_space<vmem>>, vector<32x128xf32>
    %c0_124 = arith.constant 0 : index
    %c0_125 = arith.constant 0 : index
    %314 = vector.load %arg8[%c0_124, %c0_125] : memref<1x128xf32, #tpu.memory_space<vmem>>, vector<1x128xf32>
    %cst_126 = arith.constant dense<0.000000e+00> : vector<64x128xf32>
    %315 = tpu.matmul %311, %312, %cst_126 {dimension_numbers = #tpu.dot_dimension_numbers<[1], [0], [0], [1], [0, 0, 1, 1], [], []>} : vector<64x32xf32>, vector<32x128xf32>, vector<64x128xf32> -> vector<64x128xf32>
    %316 = vector.broadcast %314 : vector<1x128xf32> to vector<64x128xf32>
    %317 = arith.addf %315, %316 : vector<64x128xf32>
    %c1 = arith.constant 1 : index
    %c0_127 = arith.constant 0 : index
    %c0_128 = arith.constant 0 : index
    %318 = vector.load %arg1[%c1, %c0_127, %c0_128] : memref<2x8x32xf32, #tpu.memory_space<vmem>>, vector<1x8x32xf32>
    %319 = vector.shape_cast %318 : vector<1x8x32xf32> to vector<8x32xf32>
    %c1_129 = arith.constant 1 : index
    %c0_130 = arith.constant 0 : index
    %c0_131 = arith.constant 0 : index
    %320 = vector.load %arg2[%c1_129, %c0_130, %c0_131] : memref<2x8x32xf32, #tpu.memory_space<vmem>>, vector<1x8x32xf32>
    %321 = vector.shape_cast %320 : vector<1x8x32xf32> to vector<8x32xf32>
    %322 = vector.extract_strided_slice %317 {offsets = [0, 0], sizes = [8, 128], strides = [1, 1]} : vector<64x128xf32> to vector<8x128xf32>
    %cst_132 = arith.constant dense<0.000000e+00> : vector<8x128xf32>
    %323 = tpu.matmul %319, %313, %cst_132 {dimension_numbers = #tpu.dot_dimension_numbers<[1], [0], [0], [1], [0, 0, 1, 1], [], []>} : vector<8x32xf32>, vector<32x128xf32>, vector<8x128xf32> -> vector<8x128xf32>
    %324 = arith.addf %322, %323 : vector<8x128xf32>
    %325 = vector.extract_strided_slice %324 {offsets = [0, 0], sizes = [8, 32], strides = [1, 1]} : vector<8x128xf32> to vector<8x32xf32>
    %cst_133 = arith.constant 5.000000e-01 : f32
    %326 = vector.broadcast %cst_133 : f32 to vector<8x32xf32>
    %327 = arith.mulf %326, %325 : vector<8x32xf32>
    %328 = math.tanh %327 : vector<8x32xf32>
    %cst_134 = arith.constant 5.000000e-01 : f32
    %329 = vector.broadcast %cst_134 : f32 to vector<8x32xf32>
    %330 = arith.mulf %329, %328 : vector<8x32xf32>
    %cst_135 = arith.constant 5.000000e-01 : f32
    %331 = vector.broadcast %cst_135 : f32 to vector<8x32xf32>
    %332 = arith.addf %330, %331 : vector<8x32xf32>
    %333 = vector.extract_strided_slice %324 {offsets = [0, 32], sizes = [8, 32], strides = [1, 1]} : vector<8x128xf32> to vector<8x32xf32>
    %cst_136 = arith.constant 5.000000e-01 : f32
    %334 = vector.broadcast %cst_136 : f32 to vector<8x32xf32>
    %335 = arith.mulf %334, %333 : vector<8x32xf32>
    %336 = math.tanh %335 : vector<8x32xf32>
    %cst_137 = arith.constant 5.000000e-01 : f32
    %337 = vector.broadcast %cst_137 : f32 to vector<8x32xf32>
    %338 = arith.mulf %337, %336 : vector<8x32xf32>
    %cst_138 = arith.constant 5.000000e-01 : f32
    %339 = vector.broadcast %cst_138 : f32 to vector<8x32xf32>
    %340 = arith.addf %338, %339 : vector<8x32xf32>
    %341 = vector.extract_strided_slice %324 {offsets = [0, 64], sizes = [8, 32], strides = [1, 1]} : vector<8x128xf32> to vector<8x32xf32>
    %342 = math.tanh %341 : vector<8x32xf32>
    %343 = vector.extract_strided_slice %324 {offsets = [0, 96], sizes = [8, 32], strides = [1, 1]} : vector<8x128xf32> to vector<8x32xf32>
    %cst_139 = arith.constant 5.000000e-01 : f32
    %344 = vector.broadcast %cst_139 : f32 to vector<8x32xf32>
    %345 = arith.mulf %344, %343 : vector<8x32xf32>
    %346 = math.tanh %345 : vector<8x32xf32>
    %cst_140 = arith.constant 5.000000e-01 : f32
    %347 = vector.broadcast %cst_140 : f32 to vector<8x32xf32>
    %348 = arith.mulf %347, %346 : vector<8x32xf32>
    %cst_141 = arith.constant 5.000000e-01 : f32
    %349 = vector.broadcast %cst_141 : f32 to vector<8x32xf32>
    %350 = arith.addf %348, %349 : vector<8x32xf32>
    %351 = arith.mulf %340, %321 : vector<8x32xf32>
    %352 = arith.mulf %332, %342 : vector<8x32xf32>
    %353 = arith.addf %351, %352 : vector<8x32xf32>
    %354 = math.tanh %353 : vector<8x32xf32>
    %355 = arith.mulf %350, %354 : vector<8x32xf32>
    %356 = vector.extract_strided_slice %317 {offsets = [8, 0], sizes = [8, 128], strides = [1, 1]} : vector<64x128xf32> to vector<8x128xf32>
    %cst_142 = arith.constant dense<0.000000e+00> : vector<8x128xf32>
    %357 = tpu.matmul %355, %313, %cst_142 {dimension_numbers = #tpu.dot_dimension_numbers<[1], [0], [0], [1], [0, 0, 1, 1], [], []>} : vector<8x32xf32>, vector<32x128xf32>, vector<8x128xf32> -> vector<8x128xf32>
    %358 = arith.addf %356, %357 : vector<8x128xf32>
    %359 = vector.extract_strided_slice %358 {offsets = [0, 0], sizes = [8, 32], strides = [1, 1]} : vector<8x128xf32> to vector<8x32xf32>
    %cst_143 = arith.constant 5.000000e-01 : f32
    %360 = vector.broadcast %cst_143 : f32 to vector<8x32xf32>
    %361 = arith.mulf %360, %359 : vector<8x32xf32>
    %362 = math.tanh %361 : vector<8x32xf32>
    %cst_144 = arith.constant 5.000000e-01 : f32
    %363 = vector.broadcast %cst_144 : f32 to vector<8x32xf32>
    %364 = arith.mulf %363, %362 : vector<8x32xf32>
    %cst_145 = arith.constant 5.000000e-01 : f32
    %365 = vector.broadcast %cst_145 : f32 to vector<8x32xf32>
    %366 = arith.addf %364, %365 : vector<8x32xf32>
    %367 = vector.extract_strided_slice %358 {offsets = [0, 32], sizes = [8, 32], strides = [1, 1]} : vector<8x128xf32> to vector<8x32xf32>
    %cst_146 = arith.constant 5.000000e-01 : f32
    %368 = vector.broadcast %cst_146 : f32 to vector<8x32xf32>
    %369 = arith.mulf %368, %367 : vector<8x32xf32>
    %370 = math.tanh %369 : vector<8x32xf32>
    %cst_147 = arith.constant 5.000000e-01 : f32
    %371 = vector.broadcast %cst_147 : f32 to vector<8x32xf32>
    %372 = arith.mulf %371, %370 : vector<8x32xf32>
    %cst_148 = arith.constant 5.000000e-01 : f32
    %373 = vector.broadcast %cst_148 : f32 to vector<8x32xf32>
    %374 = arith.addf %372, %373 : vector<8x32xf32>
    %375 = vector.extract_strided_slice %358 {offsets = [0, 64], sizes = [8, 32], strides = [1, 1]} : vector<8x128xf32> to vector<8x32xf32>
    %376 = math.tanh %375 : vector<8x32xf32>
    %377 = vector.extract_strided_slice %358 {offsets = [0, 96], sizes = [8, 32], strides = [1, 1]} : vector<8x128xf32> to vector<8x32xf32>
    %cst_149 = arith.constant 5.000000e-01 : f32
    %378 = vector.broadcast %cst_149 : f32 to vector<8x32xf32>
    %379 = arith.mulf %378, %377 : vector<8x32xf32>
    %380 = math.tanh %379 : vector<8x32xf32>
    %cst_150 = arith.constant 5.000000e-01 : f32
    %381 = vector.broadcast %cst_150 : f32 to vector<8x32xf32>
    %382 = arith.mulf %381, %380 : vector<8x32xf32>
    %cst_151 = arith.constant 5.000000e-01 : f32
    %383 = vector.broadcast %cst_151 : f32 to vector<8x32xf32>
    %384 = arith.addf %382, %383 : vector<8x32xf32>
    %385 = arith.mulf %374, %353 : vector<8x32xf32>
    %386 = arith.mulf %366, %376 : vector<8x32xf32>
    %387 = arith.addf %385, %386 : vector<8x32xf32>
    %388 = math.tanh %387 : vector<8x32xf32>
    %389 = arith.mulf %384, %388 : vector<8x32xf32>
    %390 = vector.extract_strided_slice %317 {offsets = [16, 0], sizes = [8, 128], strides = [1, 1]} : vector<64x128xf32> to vector<8x128xf32>
    %cst_152 = arith.constant dense<0.000000e+00> : vector<8x128xf32>
    %391 = tpu.matmul %389, %313, %cst_152 {dimension_numbers = #tpu.dot_dimension_numbers<[1], [0], [0], [1], [0, 0, 1, 1], [], []>} : vector<8x32xf32>, vector<32x128xf32>, vector<8x128xf32> -> vector<8x128xf32>
    %392 = arith.addf %390, %391 : vector<8x128xf32>
    %393 = vector.extract_strided_slice %392 {offsets = [0, 0], sizes = [8, 32], strides = [1, 1]} : vector<8x128xf32> to vector<8x32xf32>
    %cst_153 = arith.constant 5.000000e-01 : f32
    %394 = vector.broadcast %cst_153 : f32 to vector<8x32xf32>
    %395 = arith.mulf %394, %393 : vector<8x32xf32>
    %396 = math.tanh %395 : vector<8x32xf32>
    %cst_154 = arith.constant 5.000000e-01 : f32
    %397 = vector.broadcast %cst_154 : f32 to vector<8x32xf32>
    %398 = arith.mulf %397, %396 : vector<8x32xf32>
    %cst_155 = arith.constant 5.000000e-01 : f32
    %399 = vector.broadcast %cst_155 : f32 to vector<8x32xf32>
    %400 = arith.addf %398, %399 : vector<8x32xf32>
    %401 = vector.extract_strided_slice %392 {offsets = [0, 32], sizes = [8, 32], strides = [1, 1]} : vector<8x128xf32> to vector<8x32xf32>
    %cst_156 = arith.constant 5.000000e-01 : f32
    %402 = vector.broadcast %cst_156 : f32 to vector<8x32xf32>
    %403 = arith.mulf %402, %401 : vector<8x32xf32>
    %404 = math.tanh %403 : vector<8x32xf32>
    %cst_157 = arith.constant 5.000000e-01 : f32
    %405 = vector.broadcast %cst_157 : f32 to vector<8x32xf32>
    %406 = arith.mulf %405, %404 : vector<8x32xf32>
    %cst_158 = arith.constant 5.000000e-01 : f32
    %407 = vector.broadcast %cst_158 : f32 to vector<8x32xf32>
    %408 = arith.addf %406, %407 : vector<8x32xf32>
    %409 = vector.extract_strided_slice %392 {offsets = [0, 64], sizes = [8, 32], strides = [1, 1]} : vector<8x128xf32> to vector<8x32xf32>
    %410 = math.tanh %409 : vector<8x32xf32>
    %411 = vector.extract_strided_slice %392 {offsets = [0, 96], sizes = [8, 32], strides = [1, 1]} : vector<8x128xf32> to vector<8x32xf32>
    %cst_159 = arith.constant 5.000000e-01 : f32
    %412 = vector.broadcast %cst_159 : f32 to vector<8x32xf32>
    %413 = arith.mulf %412, %411 : vector<8x32xf32>
    %414 = math.tanh %413 : vector<8x32xf32>
    %cst_160 = arith.constant 5.000000e-01 : f32
    %415 = vector.broadcast %cst_160 : f32 to vector<8x32xf32>
    %416 = arith.mulf %415, %414 : vector<8x32xf32>
    %cst_161 = arith.constant 5.000000e-01 : f32
    %417 = vector.broadcast %cst_161 : f32 to vector<8x32xf32>
    %418 = arith.addf %416, %417 : vector<8x32xf32>
    %419 = arith.mulf %408, %387 : vector<8x32xf32>
    %420 = arith.mulf %400, %410 : vector<8x32xf32>
    %421 = arith.addf %419, %420 : vector<8x32xf32>
    %422 = math.tanh %421 : vector<8x32xf32>
    %423 = arith.mulf %418, %422 : vector<8x32xf32>
    %424 = vector.extract_strided_slice %317 {offsets = [24, 0], sizes = [8, 128], strides = [1, 1]} : vector<64x128xf32> to vector<8x128xf32>
    %cst_162 = arith.constant dense<0.000000e+00> : vector<8x128xf32>
    %425 = tpu.matmul %423, %313, %cst_162 {dimension_numbers = #tpu.dot_dimension_numbers<[1], [0], [0], [1], [0, 0, 1, 1], [], []>} : vector<8x32xf32>, vector<32x128xf32>, vector<8x128xf32> -> vector<8x128xf32>
    %426 = arith.addf %424, %425 : vector<8x128xf32>
    %427 = vector.extract_strided_slice %426 {offsets = [0, 0], sizes = [8, 32], strides = [1, 1]} : vector<8x128xf32> to vector<8x32xf32>
    %cst_163 = arith.constant 5.000000e-01 : f32
    %428 = vector.broadcast %cst_163 : f32 to vector<8x32xf32>
    %429 = arith.mulf %428, %427 : vector<8x32xf32>
    %430 = math.tanh %429 : vector<8x32xf32>
    %cst_164 = arith.constant 5.000000e-01 : f32
    %431 = vector.broadcast %cst_164 : f32 to vector<8x32xf32>
    %432 = arith.mulf %431, %430 : vector<8x32xf32>
    %cst_165 = arith.constant 5.000000e-01 : f32
    %433 = vector.broadcast %cst_165 : f32 to vector<8x32xf32>
    %434 = arith.addf %432, %433 : vector<8x32xf32>
    %435 = vector.extract_strided_slice %426 {offsets = [0, 32], sizes = [8, 32], strides = [1, 1]} : vector<8x128xf32> to vector<8x32xf32>
    %cst_166 = arith.constant 5.000000e-01 : f32
    %436 = vector.broadcast %cst_166 : f32 to vector<8x32xf32>
    %437 = arith.mulf %436, %435 : vector<8x32xf32>
    %438 = math.tanh %437 : vector<8x32xf32>
    %cst_167 = arith.constant 5.000000e-01 : f32
    %439 = vector.broadcast %cst_167 : f32 to vector<8x32xf32>
    %440 = arith.mulf %439, %438 : vector<8x32xf32>
    %cst_168 = arith.constant 5.000000e-01 : f32
    %441 = vector.broadcast %cst_168 : f32 to vector<8x32xf32>
    %442 = arith.addf %440, %441 : vector<8x32xf32>
    %443 = vector.extract_strided_slice %426 {offsets = [0, 64], sizes = [8, 32], strides = [1, 1]} : vector<8x128xf32> to vector<8x32xf32>
    %444 = math.tanh %443 : vector<8x32xf32>
    %445 = vector.extract_strided_slice %426 {offsets = [0, 96], sizes = [8, 32], strides = [1, 1]} : vector<8x128xf32> to vector<8x32xf32>
    %cst_169 = arith.constant 5.000000e-01 : f32
    %446 = vector.broadcast %cst_169 : f32 to vector<8x32xf32>
    %447 = arith.mulf %446, %445 : vector<8x32xf32>
    %448 = math.tanh %447 : vector<8x32xf32>
    %cst_170 = arith.constant 5.000000e-01 : f32
    %449 = vector.broadcast %cst_170 : f32 to vector<8x32xf32>
    %450 = arith.mulf %449, %448 : vector<8x32xf32>
    %cst_171 = arith.constant 5.000000e-01 : f32
    %451 = vector.broadcast %cst_171 : f32 to vector<8x32xf32>
    %452 = arith.addf %450, %451 : vector<8x32xf32>
    %453 = arith.mulf %442, %421 : vector<8x32xf32>
    %454 = arith.mulf %434, %444 : vector<8x32xf32>
    %455 = arith.addf %453, %454 : vector<8x32xf32>
    %456 = math.tanh %455 : vector<8x32xf32>
    %457 = arith.mulf %452, %456 : vector<8x32xf32>
    %458 = vector.extract_strided_slice %317 {offsets = [32, 0], sizes = [8, 128], strides = [1, 1]} : vector<64x128xf32> to vector<8x128xf32>
    %cst_172 = arith.constant dense<0.000000e+00> : vector<8x128xf32>
    %459 = tpu.matmul %457, %313, %cst_172 {dimension_numbers = #tpu.dot_dimension_numbers<[1], [0], [0], [1], [0, 0, 1, 1], [], []>} : vector<8x32xf32>, vector<32x128xf32>, vector<8x128xf32> -> vector<8x128xf32>
    %460 = arith.addf %458, %459 : vector<8x128xf32>
    %461 = vector.extract_strided_slice %460 {offsets = [0, 0], sizes = [8, 32], strides = [1, 1]} : vector<8x128xf32> to vector<8x32xf32>
    %cst_173 = arith.constant 5.000000e-01 : f32
    %462 = vector.broadcast %cst_173 : f32 to vector<8x32xf32>
    %463 = arith.mulf %462, %461 : vector<8x32xf32>
    %464 = math.tanh %463 : vector<8x32xf32>
    %cst_174 = arith.constant 5.000000e-01 : f32
    %465 = vector.broadcast %cst_174 : f32 to vector<8x32xf32>
    %466 = arith.mulf %465, %464 : vector<8x32xf32>
    %cst_175 = arith.constant 5.000000e-01 : f32
    %467 = vector.broadcast %cst_175 : f32 to vector<8x32xf32>
    %468 = arith.addf %466, %467 : vector<8x32xf32>
    %469 = vector.extract_strided_slice %460 {offsets = [0, 32], sizes = [8, 32], strides = [1, 1]} : vector<8x128xf32> to vector<8x32xf32>
    %cst_176 = arith.constant 5.000000e-01 : f32
    %470 = vector.broadcast %cst_176 : f32 to vector<8x32xf32>
    %471 = arith.mulf %470, %469 : vector<8x32xf32>
    %472 = math.tanh %471 : vector<8x32xf32>
    %cst_177 = arith.constant 5.000000e-01 : f32
    %473 = vector.broadcast %cst_177 : f32 to vector<8x32xf32>
    %474 = arith.mulf %473, %472 : vector<8x32xf32>
    %cst_178 = arith.constant 5.000000e-01 : f32
    %475 = vector.broadcast %cst_178 : f32 to vector<8x32xf32>
    %476 = arith.addf %474, %475 : vector<8x32xf32>
    %477 = vector.extract_strided_slice %460 {offsets = [0, 64], sizes = [8, 32], strides = [1, 1]} : vector<8x128xf32> to vector<8x32xf32>
    %478 = math.tanh %477 : vector<8x32xf32>
    %479 = vector.extract_strided_slice %460 {offsets = [0, 96], sizes = [8, 32], strides = [1, 1]} : vector<8x128xf32> to vector<8x32xf32>
    %cst_179 = arith.constant 5.000000e-01 : f32
    %480 = vector.broadcast %cst_179 : f32 to vector<8x32xf32>
    %481 = arith.mulf %480, %479 : vector<8x32xf32>
    %482 = math.tanh %481 : vector<8x32xf32>
    %cst_180 = arith.constant 5.000000e-01 : f32
    %483 = vector.broadcast %cst_180 : f32 to vector<8x32xf32>
    %484 = arith.mulf %483, %482 : vector<8x32xf32>
    %cst_181 = arith.constant 5.000000e-01 : f32
    %485 = vector.broadcast %cst_181 : f32 to vector<8x32xf32>
    %486 = arith.addf %484, %485 : vector<8x32xf32>
    %487 = arith.mulf %476, %455 : vector<8x32xf32>
    %488 = arith.mulf %468, %478 : vector<8x32xf32>
    %489 = arith.addf %487, %488 : vector<8x32xf32>
    %490 = math.tanh %489 : vector<8x32xf32>
    %491 = arith.mulf %486, %490 : vector<8x32xf32>
    %492 = vector.extract_strided_slice %317 {offsets = [40, 0], sizes = [8, 128], strides = [1, 1]} : vector<64x128xf32> to vector<8x128xf32>
    %cst_182 = arith.constant dense<0.000000e+00> : vector<8x128xf32>
    %493 = tpu.matmul %491, %313, %cst_182 {dimension_numbers = #tpu.dot_dimension_numbers<[1], [0], [0], [1], [0, 0, 1, 1], [], []>} : vector<8x32xf32>, vector<32x128xf32>, vector<8x128xf32> -> vector<8x128xf32>
    %494 = arith.addf %492, %493 : vector<8x128xf32>
    %495 = vector.extract_strided_slice %494 {offsets = [0, 0], sizes = [8, 32], strides = [1, 1]} : vector<8x128xf32> to vector<8x32xf32>
    %cst_183 = arith.constant 5.000000e-01 : f32
    %496 = vector.broadcast %cst_183 : f32 to vector<8x32xf32>
    %497 = arith.mulf %496, %495 : vector<8x32xf32>
    %498 = math.tanh %497 : vector<8x32xf32>
    %cst_184 = arith.constant 5.000000e-01 : f32
    %499 = vector.broadcast %cst_184 : f32 to vector<8x32xf32>
    %500 = arith.mulf %499, %498 : vector<8x32xf32>
    %cst_185 = arith.constant 5.000000e-01 : f32
    %501 = vector.broadcast %cst_185 : f32 to vector<8x32xf32>
    %502 = arith.addf %500, %501 : vector<8x32xf32>
    %503 = vector.extract_strided_slice %494 {offsets = [0, 32], sizes = [8, 32], strides = [1, 1]} : vector<8x128xf32> to vector<8x32xf32>
    %cst_186 = arith.constant 5.000000e-01 : f32
    %504 = vector.broadcast %cst_186 : f32 to vector<8x32xf32>
    %505 = arith.mulf %504, %503 : vector<8x32xf32>
    %506 = math.tanh %505 : vector<8x32xf32>
    %cst_187 = arith.constant 5.000000e-01 : f32
    %507 = vector.broadcast %cst_187 : f32 to vector<8x32xf32>
    %508 = arith.mulf %507, %506 : vector<8x32xf32>
    %cst_188 = arith.constant 5.000000e-01 : f32
    %509 = vector.broadcast %cst_188 : f32 to vector<8x32xf32>
    %510 = arith.addf %508, %509 : vector<8x32xf32>
    %511 = vector.extract_strided_slice %494 {offsets = [0, 64], sizes = [8, 32], strides = [1, 1]} : vector<8x128xf32> to vector<8x32xf32>
    %512 = math.tanh %511 : vector<8x32xf32>
    %513 = vector.extract_strided_slice %494 {offsets = [0, 96], sizes = [8, 32], strides = [1, 1]} : vector<8x128xf32> to vector<8x32xf32>
    %cst_189 = arith.constant 5.000000e-01 : f32
    %514 = vector.broadcast %cst_189 : f32 to vector<8x32xf32>
    %515 = arith.mulf %514, %513 : vector<8x32xf32>
    %516 = math.tanh %515 : vector<8x32xf32>
    %cst_190 = arith.constant 5.000000e-01 : f32
    %517 = vector.broadcast %cst_190 : f32 to vector<8x32xf32>
    %518 = arith.mulf %517, %516 : vector<8x32xf32>
    %cst_191 = arith.constant 5.000000e-01 : f32
    %519 = vector.broadcast %cst_191 : f32 to vector<8x32xf32>
    %520 = arith.addf %518, %519 : vector<8x32xf32>
    %521 = arith.mulf %510, %489 : vector<8x32xf32>
    %522 = arith.mulf %502, %512 : vector<8x32xf32>
    %523 = arith.addf %521, %522 : vector<8x32xf32>
    %524 = math.tanh %523 : vector<8x32xf32>
    %525 = arith.mulf %520, %524 : vector<8x32xf32>
    %526 = vector.extract_strided_slice %317 {offsets = [48, 0], sizes = [8, 128], strides = [1, 1]} : vector<64x128xf32> to vector<8x128xf32>
    %cst_192 = arith.constant dense<0.000000e+00> : vector<8x128xf32>
    %527 = tpu.matmul %525, %313, %cst_192 {dimension_numbers = #tpu.dot_dimension_numbers<[1], [0], [0], [1], [0, 0, 1, 1], [], []>} : vector<8x32xf32>, vector<32x128xf32>, vector<8x128xf32> -> vector<8x128xf32>
    %528 = arith.addf %526, %527 : vector<8x128xf32>
    %529 = vector.extract_strided_slice %528 {offsets = [0, 0], sizes = [8, 32], strides = [1, 1]} : vector<8x128xf32> to vector<8x32xf32>
    %cst_193 = arith.constant 5.000000e-01 : f32
    %530 = vector.broadcast %cst_193 : f32 to vector<8x32xf32>
    %531 = arith.mulf %530, %529 : vector<8x32xf32>
    %532 = math.tanh %531 : vector<8x32xf32>
    %cst_194 = arith.constant 5.000000e-01 : f32
    %533 = vector.broadcast %cst_194 : f32 to vector<8x32xf32>
    %534 = arith.mulf %533, %532 : vector<8x32xf32>
    %cst_195 = arith.constant 5.000000e-01 : f32
    %535 = vector.broadcast %cst_195 : f32 to vector<8x32xf32>
    %536 = arith.addf %534, %535 : vector<8x32xf32>
    %537 = vector.extract_strided_slice %528 {offsets = [0, 32], sizes = [8, 32], strides = [1, 1]} : vector<8x128xf32> to vector<8x32xf32>
    %cst_196 = arith.constant 5.000000e-01 : f32
    %538 = vector.broadcast %cst_196 : f32 to vector<8x32xf32>
    %539 = arith.mulf %538, %537 : vector<8x32xf32>
    %540 = math.tanh %539 : vector<8x32xf32>
    %cst_197 = arith.constant 5.000000e-01 : f32
    %541 = vector.broadcast %cst_197 : f32 to vector<8x32xf32>
    %542 = arith.mulf %541, %540 : vector<8x32xf32>
    %cst_198 = arith.constant 5.000000e-01 : f32
    %543 = vector.broadcast %cst_198 : f32 to vector<8x32xf32>
    %544 = arith.addf %542, %543 : vector<8x32xf32>
    %545 = vector.extract_strided_slice %528 {offsets = [0, 64], sizes = [8, 32], strides = [1, 1]} : vector<8x128xf32> to vector<8x32xf32>
    %546 = math.tanh %545 : vector<8x32xf32>
    %547 = vector.extract_strided_slice %528 {offsets = [0, 96], sizes = [8, 32], strides = [1, 1]} : vector<8x128xf32> to vector<8x32xf32>
    %cst_199 = arith.constant 5.000000e-01 : f32
    %548 = vector.broadcast %cst_199 : f32 to vector<8x32xf32>
    %549 = arith.mulf %548, %547 : vector<8x32xf32>
    %550 = math.tanh %549 : vector<8x32xf32>
    %cst_200 = arith.constant 5.000000e-01 : f32
    %551 = vector.broadcast %cst_200 : f32 to vector<8x32xf32>
    %552 = arith.mulf %551, %550 : vector<8x32xf32>
    %cst_201 = arith.constant 5.000000e-01 : f32
    %553 = vector.broadcast %cst_201 : f32 to vector<8x32xf32>
    %554 = arith.addf %552, %553 : vector<8x32xf32>
    %555 = arith.mulf %544, %523 : vector<8x32xf32>
    %556 = arith.mulf %536, %546 : vector<8x32xf32>
    %557 = arith.addf %555, %556 : vector<8x32xf32>
    %558 = math.tanh %557 : vector<8x32xf32>
    %559 = arith.mulf %554, %558 : vector<8x32xf32>
    %560 = vector.extract_strided_slice %317 {offsets = [56, 0], sizes = [8, 128], strides = [1, 1]} : vector<64x128xf32> to vector<8x128xf32>
    %cst_202 = arith.constant dense<0.000000e+00> : vector<8x128xf32>
    %561 = tpu.matmul %559, %313, %cst_202 {dimension_numbers = #tpu.dot_dimension_numbers<[1], [0], [0], [1], [0, 0, 1, 1], [], []>} : vector<8x32xf32>, vector<32x128xf32>, vector<8x128xf32> -> vector<8x128xf32>
    %562 = arith.addf %560, %561 : vector<8x128xf32>
    %563 = vector.extract_strided_slice %562 {offsets = [0, 0], sizes = [8, 32], strides = [1, 1]} : vector<8x128xf32> to vector<8x32xf32>
    %cst_203 = arith.constant 5.000000e-01 : f32
    %564 = vector.broadcast %cst_203 : f32 to vector<8x32xf32>
    %565 = arith.mulf %564, %563 : vector<8x32xf32>
    %566 = math.tanh %565 : vector<8x32xf32>
    %cst_204 = arith.constant 5.000000e-01 : f32
    %567 = vector.broadcast %cst_204 : f32 to vector<8x32xf32>
    %568 = arith.mulf %567, %566 : vector<8x32xf32>
    %cst_205 = arith.constant 5.000000e-01 : f32
    %569 = vector.broadcast %cst_205 : f32 to vector<8x32xf32>
    %570 = arith.addf %568, %569 : vector<8x32xf32>
    %571 = vector.extract_strided_slice %562 {offsets = [0, 32], sizes = [8, 32], strides = [1, 1]} : vector<8x128xf32> to vector<8x32xf32>
    %cst_206 = arith.constant 5.000000e-01 : f32
    %572 = vector.broadcast %cst_206 : f32 to vector<8x32xf32>
    %573 = arith.mulf %572, %571 : vector<8x32xf32>
    %574 = math.tanh %573 : vector<8x32xf32>
    %cst_207 = arith.constant 5.000000e-01 : f32
    %575 = vector.broadcast %cst_207 : f32 to vector<8x32xf32>
    %576 = arith.mulf %575, %574 : vector<8x32xf32>
    %cst_208 = arith.constant 5.000000e-01 : f32
    %577 = vector.broadcast %cst_208 : f32 to vector<8x32xf32>
    %578 = arith.addf %576, %577 : vector<8x32xf32>
    %579 = vector.extract_strided_slice %562 {offsets = [0, 64], sizes = [8, 32], strides = [1, 1]} : vector<8x128xf32> to vector<8x32xf32>
    %580 = math.tanh %579 : vector<8x32xf32>
    %581 = vector.extract_strided_slice %562 {offsets = [0, 96], sizes = [8, 32], strides = [1, 1]} : vector<8x128xf32> to vector<8x32xf32>
    %cst_209 = arith.constant 5.000000e-01 : f32
    %582 = vector.broadcast %cst_209 : f32 to vector<8x32xf32>
    %583 = arith.mulf %582, %581 : vector<8x32xf32>
    %584 = math.tanh %583 : vector<8x32xf32>
    %cst_210 = arith.constant 5.000000e-01 : f32
    %585 = vector.broadcast %cst_210 : f32 to vector<8x32xf32>
    %586 = arith.mulf %585, %584 : vector<8x32xf32>
    %cst_211 = arith.constant 5.000000e-01 : f32
    %587 = vector.broadcast %cst_211 : f32 to vector<8x32xf32>
    %588 = arith.addf %586, %587 : vector<8x32xf32>
    %589 = arith.mulf %578, %557 : vector<8x32xf32>
    %590 = arith.mulf %570, %580 : vector<8x32xf32>
    %591 = arith.addf %589, %590 : vector<8x32xf32>
    %592 = math.tanh %591 : vector<8x32xf32>
    %593 = arith.mulf %588, %592 : vector<8x32xf32>
    %594 = vector.extract_strided_slice %593 {offsets = [0, 0], sizes = [4, 32], strides = [1, 1]} : vector<8x32xf32> to vector<4x32xf32>
    %c1_212 = arith.constant 1 : index
    %c0_213 = arith.constant 0 : index
    %c0_214 = arith.constant 0 : index
    %595 = vector.load %arg17[%c1_212, %c0_213, %c0_214] : memref<2x4x32xf32, #tpu.memory_space<vmem>>, vector<1x4x32xf32>
    %596 = vector.shape_cast %595 : vector<1x4x32xf32> to vector<4x32xf32>
    %597 = vector.shape_cast %594 : vector<4x32xf32> to vector<1x4x32xf32>
    tpu.vector_store %arg17[%c1_212, %c0_213, %c0_214], %597 {strides = array<i32>} : memref<2x4x32xf32, #tpu.memory_space<vmem>>, vector<1x4x32xf32>,
    %598 = vector.extract_strided_slice %591 {offsets = [0, 0], sizes = [4, 32], strides = [1, 1]} : vector<8x32xf32> to vector<4x32xf32>
    %c1_215 = arith.constant 1 : index
    %c0_216 = arith.constant 0 : index
    %c0_217 = arith.constant 0 : index
    %599 = vector.load %arg18[%c1_215, %c0_216, %c0_217] : memref<2x4x32xf32, #tpu.memory_space<vmem>>, vector<1x4x32xf32>
    %600 = vector.shape_cast %599 : vector<1x4x32xf32> to vector<4x32xf32>
    %601 = vector.shape_cast %598 : vector<4x32xf32> to vector<1x4x32xf32>
    tpu.vector_store %arg18[%c1_215, %c0_216, %c0_217], %601 {strides = array<i32>} : memref<2x4x32xf32, #tpu.memory_space<vmem>>, vector<1x4x32xf32>,
    %602 = vector.extract_strided_slice %593 {offsets = [4, 0], sizes = [4, 32], strides = [1, 1]} : vector<8x32xf32> to vector<4x32xf32>
    %c1_218 = arith.constant 1 : index
    %c0_219 = arith.constant 0 : index
    %c0_220 = arith.constant 0 : index
    %603 = vector.load %arg19[%c1_218, %c0_219, %c0_220] : memref<2x4x32xf32, #tpu.memory_space<vmem>>, vector<1x4x32xf32>
    %604 = vector.shape_cast %603 : vector<1x4x32xf32> to vector<4x32xf32>
    %605 = vector.shape_cast %602 : vector<4x32xf32> to vector<1x4x32xf32>
    tpu.vector_store %arg19[%c1_218, %c0_219, %c0_220], %605 {strides = array<i32>} : memref<2x4x32xf32, #tpu.memory_space<vmem>>, vector<1x4x32xf32>,
    %606 = vector.extract_strided_slice %591 {offsets = [4, 0], sizes = [4, 32], strides = [1, 1]} : vector<8x32xf32> to vector<4x32xf32>
    %c1_221 = arith.constant 1 : index
    %c0_222 = arith.constant 0 : index
    %c0_223 = arith.constant 0 : index
    %607 = vector.load %arg20[%c1_221, %c0_222, %c0_223] : memref<2x4x32xf32, #tpu.memory_space<vmem>>, vector<1x4x32xf32>
    %608 = vector.shape_cast %607 : vector<1x4x32xf32> to vector<4x32xf32>
    %609 = vector.shape_cast %606 : vector<4x32xf32> to vector<1x4x32xf32>
    tpu.vector_store %arg20[%c1_221, %c0_222, %c0_223], %609 {strides = array<i32>} : memref<2x4x32xf32, #tpu.memory_space<vmem>>, vector<1x4x32xf32>,
    %610 = vector.extract_strided_slice %593 {offsets = [0, 0], sizes = [4, 32], strides = [1, 1]} : vector<8x32xf32> to vector<4x32xf32>
    %c4 = arith.constant 4 : index
    %c0_224 = arith.constant 0 : index
    %611 = vector.load %arg22[%c4, %c0_224] : memref<8x32xf32, #tpu.memory_space<vmem>>, vector<4x32xf32>
    tpu.vector_store %arg22[%c4, %c0_224], %610 {strides = array<i32>} : memref<8x32xf32, #tpu.memory_space<vmem>>, vector<4x32xf32>,
    %612 = vector.extract_strided_slice %593 {offsets = [4, 0], sizes = [4, 32], strides = [1, 1]} : vector<8x32xf32> to vector<4x32xf32>
    %c4_225 = arith.constant 4 : index
    %c0_226 = arith.constant 0 : index
    %613 = vector.load %arg23[%c4_225, %c0_226] : memref<8x32xf32, #tpu.memory_space<vmem>>, vector<4x32xf32>
    tpu.vector_store %arg23[%c4_225, %c0_226], %612 {strides = array<i32>} : memref<8x32xf32, #tpu.memory_space<vmem>>, vector<4x32xf32>,
    %c0_227 = arith.constant 0 : index
    %c0_228 = arith.constant 0 : index
    %614 = vector.load %arg22[%c0_227, %c0_228] : memref<8x32xf32, #tpu.memory_space<vmem>>, vector<8x32xf32>
    %c0_229 = arith.constant 0 : index
    %c0_230 = arith.constant 0 : index
    %615 = vector.load %arg9[%c0_229, %c0_230] : memref<32x512xf32, #tpu.memory_space<vmem>>, vector<32x512xf32>
    %cst_231 = arith.constant dense<0.000000e+00> : vector<8x512xf32>
    %616 = tpu.matmul %614, %615, %cst_231 {dimension_numbers = #tpu.dot_dimension_numbers<[1], [0], [0], [1], [0, 0, 1, 1], [], []>} : vector<8x32xf32>, vector<32x512xf32>, vector<8x512xf32> -> vector<8x512xf32>
    %c0_232 = arith.constant 0 : index
    %c0_233 = arith.constant 0 : index
    %617 = vector.load %arg23[%c0_232, %c0_233] : memref<8x32xf32, #tpu.memory_space<vmem>>, vector<8x32xf32>
    %c0_234 = arith.constant 0 : index
    %c0_235 = arith.constant 0 : index
    %618 = vector.load %arg10[%c0_234, %c0_235] : memref<32x512xf32, #tpu.memory_space<vmem>>, vector<32x512xf32>
    %cst_236 = arith.constant dense<0.000000e+00> : vector<8x512xf32>
    %619 = tpu.matmul %617, %618, %cst_236 {dimension_numbers = #tpu.dot_dimension_numbers<[1], [0], [0], [1], [0, 0, 1, 1], [], []>} : vector<8x32xf32>, vector<32x512xf32>, vector<8x512xf32> -> vector<8x512xf32>
    %620 = arith.addf %616, %619 : vector<8x512xf32>
    %c0_237 = arith.constant 0 : index
    %c0_238 = arith.constant 0 : index
    %621 = vector.load %arg11[%c0_237, %c0_238] : memref<1x512xf32, #tpu.memory_space<vmem>>, vector<1x512xf32>
    %622 = vector.broadcast %621 : vector<1x512xf32> to vector<8x512xf32>
    %623 = arith.addf %620, %622 : vector<8x512xf32>
    %c0_239 = arith.constant 0 : index
    %c0_240 = arith.constant 0 : index
    %624 = vector.load %arg12[%c0_239, %c0_240] : memref<512x512xf32, #tpu.memory_space<vmem>>, vector<512x512xf32>
    %cst_241 = arith.constant dense<0.000000e+00> : vector<8x512xf32>
    %625 = tpu.matmul %623, %624, %cst_241 {dimension_numbers = #tpu.dot_dimension_numbers<[1], [0], [0], [1], [0, 0, 1, 1], [], []>} : vector<8x512xf32>, vector<512x512xf32>, vector<8x512xf32> -> vector<8x512xf32>
    %c0_242 = arith.constant 0 : index
    %c0_243 = arith.constant 0 : index
    %626 = vector.load %arg13[%c0_242, %c0_243] : memref<1x512xf32, #tpu.memory_space<vmem>>, vector<1x512xf32>
    %627 = vector.broadcast %626 : vector<1x512xf32> to vector<8x512xf32>
    %628 = arith.addf %625, %627 : vector<8x512xf32>
    %c0_244 = arith.constant 0 : index
    %c0_245 = arith.constant 0 : index
    %629 = vector.load %arg14[%c0_244, %c0_245] : memref<512x10xf32, #tpu.memory_space<vmem>>, vector<512x10xf32>
    %cst_246 = arith.constant dense<0.000000e+00> : vector<8x10xf32>
    %630 = tpu.matmul %628, %629, %cst_246 {dimension_numbers = #tpu.dot_dimension_numbers<[1], [0], [0], [1], [0, 0, 1, 1], [], []>} : vector<8x512xf32>, vector<512x10xf32>, vector<8x10xf32> -> vector<8x10xf32>
    %c0_247 = arith.constant 0 : index
    %c0_248 = arith.constant 0 : index
    %631 = vector.load %arg15[%c0_247, %c0_248] : memref<1x10xf32, #tpu.memory_space<vmem>>, vector<1x10xf32>
    %632 = vector.broadcast %631 : vector<1x10xf32> to vector<8x10xf32>
    %633 = arith.addf %630, %632 : vector<8x10xf32>
    %634 = vector.extract_strided_slice %633 {offsets = [0, 0], sizes = [4, 10], strides = [1, 1]} : vector<8x10xf32> to vector<4x10xf32>
    %c0_249 = arith.constant 0 : index
    %c0_250 = arith.constant 0 : index
    %c0_251 = arith.constant 0 : index
    %635 = vector.load %arg16[%c0_249, %c0_250, %c0_251] : memref<2x4x10xf32, #tpu.memory_space<vmem>>, vector<1x4x10xf32>
    %636 = vector.shape_cast %635 : vector<1x4x10xf32> to vector<4x10xf32>
    %637 = vector.shape_cast %634 : vector<4x10xf32> to vector<1x4x10xf32>
    tpu.vector_store %arg16[%c0_249, %c0_250, %c0_251], %637 {strides = array<i32>} : memref<2x4x10xf32, #tpu.memory_space<vmem>>, vector<1x4x10xf32>,
    %638 = vector.extract_strided_slice %633 {offsets = [4, 0], sizes = [4, 10], strides = [1, 1]} : vector<8x10xf32> to vector<4x10xf32>
    %c1_252 = arith.constant 1 : index
    %c0_253 = arith.constant 0 : index
    %c0_254 = arith.constant 0 : index
    %639 = vector.load %arg16[%c1_252, %c0_253, %c0_254] : memref<2x4x10xf32, #tpu.memory_space<vmem>>, vector<1x4x10xf32>
    %640 = vector.shape_cast %639 : vector<1x4x10xf32> to vector<4x10xf32>
    %641 = vector.shape_cast %638 : vector<4x10xf32> to vector<1x4x10xf32>
    tpu.vector_store %arg16[%c1_252, %c0_253, %c0_254], %641 {strides = array<i32>} : memref<2x4x10xf32, #tpu.memory_space<vmem>>, vector<1x4x10xf32>,
    return
  }
}

</mosaic_0001>

<bundles_post_ra>
// kernel: model_lstm_forward.1
= control target key start
LH: loop header
LB: loop body
LE: loop exit
PB: predicated region body
PF: predicated region fallthrough
CT: control target
= control target key end

     0   :  { %s4798_s0 = inlined_call_operand.vmem [shape: f32[64,16], index: 0, kind: input, shape index: {}]   ;;  %s4799_s1 = inlined_call_operand.vmem [shape: f32[2,8,32], index: 1, kind: input, shape index: {}]   ;;  %s4800_s2 = inlined_call_operand.vmem [shape: f32[2,8,32], index: 2, kind: input, shape index: {}]   ;;  %s4801_s3 = inlined_call_operand.vmem [shape: f32[16,128], index: 3, kind: input, shape index: {}]   ;;  %s4802_s4 = inlined_call_operand.vmem [shape: f32[32,128], index: 4, kind: input, shape index: {}]   ;;  %s4803_s5 = inlined_call_operand.vmem [shape: f32[1,128], index: 5, kind: input, shape index: {}]   ;;  %s4804_s6 = inlined_call_operand.vmem [shape: f32[32,128], index: 6, kind: input, shape index: {}]   ;;  %s4805_s7 = inlined_call_operand.vmem [shape: f32[32,128], index: 7, kind: input, shape index: {}]   ;;  %s4806_s8 = inlined_call_operand.vmem [shape: f32[1,128], index: 8, kind: input, shape index: {}]   ;;  %s4807_s9 = inlined_call_operand.vmem [shape: f32[32,512], index: 9, kind: input, shape index: {}]   ;;  %s4808_s10 = inlined_call_operand.vmem [shape: f32[32,512], index: 10, kind: input, shape index: {}]   ;;  %s4809_s11 = inlined_call_operand.vmem [shape: f32[1,512], index: 11, kind: input, shape index: {}]   ;;  %s4810_s12 = inlined_call_operand.hbm [shape: f32[512,512], index: 12, kind: input, shape index: {}]   ;;  %s4811_s13 = inlined_call_operand.vmem [shape: f32[1,512], index: 13, kind: input, shape index: {}]   ;;  %s4812_s14 = inlined_call_operand.vmem [shape: f32[512,10], index: 14, kind: input, shape index: {}]   ;;  %s4813_s15 = inlined_call_operand.vmem [shape: f32[1,10], index: 15, kind: input, shape index: {}]   ;;  %s4814_s16 = inlined_call_operand.hbm [shape: f32[2,4,10], index: 16, kind: output, shape index: {0}]   ;;  %s4815_s17 = inlined_call_operand.hbm [shape: f32[2,4,32], index: 17, kind: output, shape index: {1}]   ;;  %s4816_s18 = inlined_call_operand.hbm [shape: f32[2,4,32], index: 18, kind: output, shape index: {2}]   ;;  %s4817_s19 = inlined_call_operand.hbm [shape: f32[2,4,32], index: 19, kind: output, shape index: {3}]   ;;  %s4818_s20 = inlined_call_operand.hbm [shape: f32[2,4,32], index: 20, kind: output, shape index: {4}]  }
   0x1   :  { %4824 = sst [smem:[#allocation19_spill]] %s4798_s0 }
   0x2   :  { %4825 = sst [smem:[#allocation20_spill]] %s4799_s1 }
   0x3   :  { %4826 = sst [smem:[#allocation21_spill]] %s4800_s2 }
   0x4   :  { %4827 = sst [smem:[#allocation22_spill]] %s4801_s3 }
   0x5   :  { %4828 = sst [smem:[#allocation23_spill]] %s4802_s4 }
   0x6   :  { %26 = vsyncpa [#allocation6], 0 }
   0x7   :  { %27 = vsyncpa [#allocation7], 0 }
   0x8   :  { %28 = vsyncpa [#allocation10], 0 }
   0x9   :  { %29 = vsyncpa [#allocation13], 0  ;;  %s3875_s1 = smov [#allocation5]  }
   0xa   :  { %s59_s22 = sshll.u32 %s3875_s1, 4  ;;  %s60_s22 = int_to_ptr.vmem [resolvable:$true] %s59_s22 }
   0xb   :  { %s3755_s23 = scalar_lea.vmem %s60_s22, 32768  ;;  %p3760_p1 = scmp.lt.s32.totalorder %s60_s22, %s60_s22 }
   0xc   :  { %p3756_p0 = scmp.ne.s32.totalorder %s60_s22, %s3755_s23  ;;  %p3761_p2 = scmp.lt.s32.totalorder %s3755_s23, %s3755_s23 }
   0xe   :  { %p3762_p3 = por %p3761_p2, %p3760_p1 }
  0x10   :  { %p3763_p4 = pnand %p3762_p3, %p3756_p0 }
  0x12   :  { %3766 = shalt.err (!%p3763_p4)
}
  0x13   :  { %s3876_s24 = smov 512   ;;  %s3877_s2 = smov 32  }
  0x14   :  { %65 = dma.hbm_to_vmem [thread:$0]  %s4810_s12, 32768, %s60_s22, [#allocation6], %s3876_s24, %s3876_s24, %s3877_s2  }
  0x15   :  { %3867 = dma.done.wait [#allocation6], 32768  }
  0x16   :  { %3868 = vsyncadd [#allocation6], 4294934528  ;;  %v3878_v0 = vmov 0.0   ;;  %vm3879_vm0 = vmmov 0   ;;  %s4829_s28 = sld [smem:[#allocation22_spill]]  ;;  %vm96_vm1 = vcmask 130048  }
  0x17   :  { %3442 = vmatprep.subr.mxu1 %v3878_v0  ;;  %3450 = vmatprep.mubr.msk.f32.mxu1 %vm3879_vm0, %v3878_v0  ;;  %s4830_s30 = sld [smem:[#allocation23_spill]]  ;;  %vm228_vm2 = vcmask 261120   ;;  %v4068_v11 = vld [vmem:[%s4803_s5] ss:$0 sm:$0xff]  ;;  %s3880_s1 = smov 64   ;;  %vm1034_vm3 = vcmask 257024  }
  0x18   :  { %s4831_s24 = sld [smem:[#allocation19_spill]]  ;;  %vm1041_vm4 = vcmask 261124  }
  0x19   :  { %s4832_s12 = sld [smem:[#allocation20_spill]] }
  0x1a   :  { %s4833_s25 = sld [smem:[#allocation21_spill]] }
  0x1c   :  { %v84_v1 = vld [vmem:[%s4829_s28 + $0x8] sm:$0xff]  ;;  %v83_v3 = vld [vmem:[%s4829_s28] sm:$0xff] }
  0x1d   :  { %v4006_v2 = vld [vmem:[%s4830_s30 + $0x18] sm:$0xff]  ;;  %3426 = vmatprep.subr.mxu0 %v84_v1  ;;  %v4015_v4 = vld [vmem:[%s4830_s30 + $0x10] sm:$0xff]  ;;  %v4028_v7 = vld [vmem:[%s4830_s30 + $0x8] sm:$0xff] }
  0x1e   :  { %3443 = vmatpush3.msra.mxu1 %v4006_v2  ;;  %v75_v5 = vld [vmem:[%s4831_s24] sm:$0xff]  ;;  %3427 = vmatpush3.msra.mxu0 %v84_v1  ;;  %v76_v6 = vld [vmem:[%s4831_s24 + $0x8] sm:$0xff]  ;;  %v77_v47 = vld [vmem:[%s4831_s24 + $0x10] sm:$0xff] }
  0x1f   :  { %3444 = vmatprep.subr.mxu1 %v3878_v0  ;;  %3428 = vmatprep.subr.mxu0 %v83_v3  ;;  %v4036_v8 = vld [vmem:[%s4830_s30] sm:$0xff]  ;;  %v78_v48 = vld [vmem:[%s4831_s24 + $0x18] sm:$0xff]  ;;  %v80_v50 = vld [vmem:[%s4831_s24 + $0x28] sm:$0xff] }
  0x20   :  { %3445 = vmatpush3.msra.mxu1 %v4015_v4  ;;  %3429 = vmatpush3.msra.mxu0 %v83_v3  ;;  %v226_v9 = vld [vmem:[%s4832_s12] sm:$0xff]  ;;  %v81_v51 = vld [vmem:[%s4831_s24 + $0x30] sm:$0xff]  ;;  %v82_v52 = vld [vmem:[%s4831_s24 + $0x38] sm:$0xff] }
  0x21   :  { %3430 = vmatprep.mubr.msk.f32.mxu0 %vm96_vm1, %v75_v5  ;;  %3446 = vmatprep.subr.mxu1 %v3878_v0  ;;  %v227_v18 = vld [vmem:[%s4833_s25] sm:$0xff] }
  0x22   :  { %3431 = vmatmul.mubr.msk.f32.vlgmr.msra.gmra.mxu0 %vm96_vm1, %v76_v6  ;;  %3447 = vmatpush3.msra.mxu1 %v4028_v7  ;;  %v79_v49 = vld [vmem:[%s4831_s24 + $0x20] sm:$0xff] }
  0x23   :  { %3464 = vmatprep.subr.mxu0 %v3878_v0  ;;  %3448 = vmatprep.subr.mxu1 %v3878_v0 }
  0x24   :  { %3465 = vmatpush3.msra.mxu0 %v4006_v2  ;;  %3449 = vmatpush3.msra.mxu1 %v4036_v8 }
  0x25   :  { %3466 = vmatprep.subr.mxu0 %v3878_v0  ;;  %3451 = vmatmul.mubr.msk.f32.vlgmr.msra.gmra.mxu1 %vm228_vm2, %v226_v9 }
  0x26   :  { %3453 = vmatprep.subr.mxu1 %v3878_v0  ;;  %3461 = vmatprep.mubr.msk.f32.mxu1 %vm3879_vm0, %v3878_v0 }
  0x27   :  { %3454 = vmatpush3.msra.mxu1 %v4006_v2  ;;  %3467 = vmatpush3.msra.mxu0 %v4015_v4 }
  0x28   :  { %3455 = vmatprep.subr.mxu1 %v3878_v0  ;;  %3468 = vmatprep.subr.mxu0 %v3878_v0 }
  0x29   :  { %3456 = vmatpush3.msra.mxu1 %v4015_v4  ;;  %3469 = vmatpush3.msra.mxu0 %v4028_v7 }
  0x2a   :  { %3457 = vmatprep.subr.mxu1 %v3878_v0  ;;  %3470 = vmatprep.subr.mxu0 %v3878_v0 }
  0x2b   :  { %3458 = vmatpush3.msra.mxu1 %v4028_v7  ;;  %3471 = vmatpush3.msra.mxu0 %v4036_v8 }
  0x2c   :  { %3459 = vmatprep.subr.mxu1 %v3878_v0  ;;  %3486 = vmatprep.subr.mxu0 %v3878_v0 }
  0x2d   :  { %3460 = vmatpush3.msra.mxu1 %v4036_v8  ;;  %3433 = vmatprep.mubr.msk.f32.mxu0 %vm96_vm1, %v77_v47 }
  0x2e   :  { %3475 = vmatprep.subr.mxu1 %v3878_v0  ;;  %3434 = vmatmul.mubr.msk.f32.gmra.mxu0 %vm96_vm1, %v78_v48 }
  0x2f   :  { %3436 = vmatprep.mubr.msk.f32.mxu0 %vm96_vm1, %v79_v49 }
  0x32   :  { %3437 = vmatmul.mubr.msk.f32.gmra.mxu0 %vm96_vm1, %v80_v50 }
  0x33   :  { %3439 = vmatprep.mubr.msk.f32.mxu0 %vm96_vm1, %v81_v51 }
  0x36   :  { %3440 = vmatmul.mubr.msk.f32.gmra.mxu0 %vm96_vm1, %v82_v52 }
  0x37   :  { %3472 = vmatprep.mubr.msk.f32.mxu0 %vm3879_vm0, %v3878_v0 }
  0xe2   :  { %v3432_v10 = vpop.f32.mrf.mxu0 }
  0xe3   :  { %v193_v33 = vadd.f32 %v3432_v10, %v4068_v11 }
  0xe4   :  { %v187_v12 = vpop.f32.mrf.mxu0 }
  0xe5   :  { %v188_v13 = vadd.f32 %v4068_v11, %v187_v12  ;;  %v298_v14 = vpop.f32.mrf.mxu1 }
  0xe7   :  { %v302_v15 = vadd.f32 %v298_v14, %v188_v13  ;;  %v3452_v16 = vpop.f32.mrf.mxu1 }
  0xe9   :  { %3651 = vtanh.f32 %v302_v15  ;;  %v303_v19 = vmul.f32 0.5, %v302_v15 }
  0xeb   :  { %3653 = vtanh.f32 %v303_v19 }
  0xee   :  { %v3435_v57 = vpop.f32.mrf.mxu0 }
  0xf0   :  { %v197_v58 = vpop.f32.mrf.mxu0 }
  0xf1   :  { %v198_v63 = vadd.f32 %v4068_v11, %v197_v58 }
  0xf2   :  { %v4134_v59 = vpop.f32.mrf.mxu0 }
  0xf4   :  { %v4136_v60 = vpop.f32.mrf.mxu0 }
  0xf6   :  { %v3652_v17 = vpop.eup %3651  ;;  %v4138_v61 = vpop.f32.mrf.mxu0 }
  0xf7   :  { %314 = vrot.lane.b32.xlu0 %v3652_v17, %s3880_s1 }
  0xf8   :  { %v3654_v20 = vpop.eup %3653  ;;  %v4140_v62 = vpop.f32.mrf.mxu0 }
  0xf9   :  { %v305_v21 = vmul.f32 0.5, %v3654_v20 }
  0xfb   :  { %309 = vrot.lane.b32.xlu0 %v227_v18, %s3877_s2  ;;  %v306_v22 = vadd.f32 0.5, %v305_v21 }
 0x169   :  { %v315_v23 = vpop.permute.xlu0 %314 }
 0x16a   :  { %v317_v24 = vmul.f32 %v315_v23, %v306_v22  ;;  %v203_v23 = vadd.f32 %v3435_v57, %v4068_v11 }
 0x16c   :  { %319 = vrot.lane.b32.xlu1 %v317_v24, %s3877_s2 }
 0x16d   :  { %v310_v25 = vpop.permute.xlu0 %309 }
 0x16e   :  { %v312_v26 = vmul.f32 %v310_v25, %v306_v22 }
 0x1de   :  { %v320_v27 = vpop.permute.xlu1 %319 }
 0x1df   :  { %v322_v28 = vadd.f32 %v320_v27, %v312_v26 }
 0x1e1   :  { %3655 = vtanh.f32 %v322_v28 }
 0x1ee   :  { %v3656_v29 = vpop.eup %3655 }
 0x1ef   :  { %325 = vrot.lane.b32.xlu1 %v3656_v29, %s3880_s1 }
 0x261   :  { %v326_v30 = vpop.permute.xlu1 %325 }
 0x262   :  { %v328_v31 = vmul.f32 %v326_v30, %v306_v22 }
 0x264   :  { %330 = vrot.lane.b32.xlu0 %v328_v31, %s3877_s2 }
 0x2d6   :  { %v331_v32 = vpop.permute.xlu0 %330 }
 0x2d7   :  { %333 = vst.msk [vmem:[#allocation2] sm:$0xff] %vm228_vm2, %v331_v32  ;;  %3462 = vmatmul.mubr.msk.f32.vlgmr.msra.gmra.mxu1 %vm228_vm2, %v331_v32 }
 0x2d8   :  { %3476 = vmatpush3.msra.mxu1 %v4006_v2  ;;  %3483 = vmatprep.mubr.msk.f32.mxu1 %vm3879_vm0, %v3878_v0 }
 0x2d9   :  { %3477 = vmatprep.subr.mxu1 %v3878_v0 }
 0x2da   :  { %3478 = vmatpush3.msra.mxu1 %v4015_v4 }
 0x2db   :  { %3479 = vmatprep.subr.mxu1 %v3878_v0 }
 0x2dc   :  { %3480 = vmatpush3.msra.mxu1 %v4028_v7 }
 0x2dd   :  { %3481 = vmatprep.subr.mxu1 %v3878_v0 }
 0x2de   :  { %3482 = vmatpush3.msra.mxu1 %v4036_v8 }
 0x2df   :  { %3497 = vmatprep.subr.mxu1 %v3878_v0 }
 0x397   :  { %v402_v34 = vpop.f32.mrf.mxu1 }
 0x398   :  { %v406_v35 = vadd.f32 %v402_v34, %v193_v33 }
 0x399   :  { %v3463_v36 = vpop.f32.mrf.mxu1 }
 0x39a   :  { %3657 = vtanh.f32 %v406_v35  ;;  %v407_v38 = vmul.f32 0.5, %v406_v35 }
 0x39c   :  { %3659 = vtanh.f32 %v407_v38 }
 0x3a7   :  { %v3658_v37 = vpop.eup %3657 }
 0x3a8   :  { %414 = vrot.lane.b32.xlu1 %v3658_v37, %s3880_s1 }
 0x3a9   :  { %v3660_v39 = vpop.eup %3659 }
 0x3aa   :  { %v409_v40 = vmul.f32 0.5, %v3660_v39 }
 0x3ac   :  { %v410_v41 = vadd.f32 0.5, %v409_v40 }
 0x3ae   :  { %v412_v44 = vmul.f32 %v410_v41, %v322_v28 }
 0x41a   :  { %v415_v42 = vpop.permute.xlu1 %414 }
 0x41b   :  { %v417_v43 = vmul.f32 %v415_v42, %v410_v41 }
 0x41d   :  { %419 = vrot.lane.b32.xlu0 %v417_v43, %s3877_s2 }
 0x48f   :  { %v420_v45 = vpop.permute.xlu0 %419 }
 0x490   :  { %v422_v46 = vadd.f32 %v420_v45, %v412_v44 }
 0x492   :  { %3661 = vtanh.f32 %v422_v46 }
 0x49f   :  { %v3662_v53 = vpop.eup %3661 }
 0x4a0   :  { %425 = vrot.lane.b32.xlu1 %v3662_v53, %s3880_s1 }
 0x512   :  { %v426_v54 = vpop.permute.xlu1 %425 }
 0x513   :  { %v428_v55 = vmul.f32 %v426_v54, %v410_v41  ;;  %v208_v41 = vadd.f32 %v4068_v11, %v4136_v60 }
 0x515   :  { %430 = vrot.lane.b32.xlu0 %v428_v55, %s3877_s2 }
 0x587   :  { %v431_v56 = vpop.permute.xlu0 %430 }
 0x588   :  { %433 = vst.msk [vmem:[#allocation2 + $0x8] sm:$0xff] %vm228_vm2, %v431_v56  ;;  %3473 = vmatmul.mubr.msk.f32.vlgmr.msra.gmra.mxu0 %vm228_vm2, %v431_v56 }
 0x589   :  { %3487 = vmatpush3.msra.mxu0 %v4006_v2  ;;  %3494 = vmatprep.mubr.msk.f32.mxu0 %vm3879_vm0, %v3878_v0 }
 0x58a   :  { %3488 = vmatprep.subr.mxu0 %v3878_v0 }
 0x58b   :  { %3489 = vmatpush3.msra.mxu0 %v4015_v4 }
 0x58c   :  { %3490 = vmatprep.subr.mxu0 %v3878_v0 }
 0x58d   :  { %3491 = vmatpush3.msra.mxu0 %v4028_v7 }
 0x58e   :  { %3492 = vmatprep.subr.mxu0 %v3878_v0 }
 0x58f   :  { %3493 = vmatpush3.msra.mxu0 %v4036_v8 }
 0x590   :  { %3508 = vmatprep.subr.mxu0 %v3878_v0 }
 0x648   :  { %v502_v1 = vpop.f32.mrf.mxu0 }
 0x649   :  { %v506_v3 = vadd.f32 %v502_v1, %v198_v63 }
 0x64a   :  { %v3474_v5 = vpop.f32.mrf.mxu0 }
 0x64b   :  { %3663 = vtanh.f32 %v506_v3  ;;  %v507_v9 = vmul.f32 0.5, %v506_v3 }
 0x64d   :  { %3665 = vtanh.f32 %v507_v9 }
 0x658   :  { %v3664_v6 = vpop.eup %3663 }
 0x659   :  { %514 = vrot.lane.b32.xlu1 %v3664_v6, %s3880_s1 }
 0x65a   :  { %v3666_v10 = vpop.eup %3665 }
 0x65b   :  { %v509_v12 = vmul.f32 0.5, %v3666_v10 }
 0x65d   :  { %v510_v13 = vadd.f32 0.5, %v509_v12 }
 0x65f   :  { %v512_v16 = vmul.f32 %v510_v13, %v422_v46 }
 0x6cb   :  { %v515_v14 = vpop.permute.xlu1 %514 }
 0x6cc   :  { %v517_v15 = vmul.f32 %v515_v14, %v510_v13 }
 0x6ce   :  { %519 = vrot.lane.b32.xlu0 %v517_v15, %s3877_s2 }
 0x740   :  { %v520_v17 = vpop.permute.xlu0 %519 }
 0x741   :  { %v522_v18 = vadd.f32 %v520_v17, %v512_v16 }
 0x743   :  { %3667 = vtanh.f32 %v522_v18 }
 0x750   :  { %v3668_v19 = vpop.eup %3667 }
 0x751   :  { %525 = vrot.lane.b32.xlu1 %v3668_v19, %s3880_s1  ;;  %v1046_v19 = vld [vmem:[#allocation2] sm:$0xff] }
 0x7c3   :  { %v526_v20 = vpop.permute.xlu1 %525 }
 0x7c4   :  { %v528_v21 = vmul.f32 %v526_v20, %v510_v13  ;;  %v1055_v20 = vld [vmem:[%s4804_s6 + $0x8] sm:$0xff] }
 0x7c6   :  { %530 = vrot.lane.b32.xlu0 %v528_v21, %s3877_s2  ;;  %v1054_v21 = vld [vmem:[%s4804_s6] sm:$0xff] }
 0x838   :  { %v531_v22 = vpop.permute.xlu0 %530 }
 0x839   :  { %533 = vst.msk [vmem:[#allocation2 + $0x10] sm:$0xff] %vm228_vm2, %v531_v22  ;;  %3484 = vmatmul.mubr.msk.f32.vlgmr.msra.gmra.mxu1 %vm228_vm2, %v531_v22  ;;  %v1047_v22 = vld [vmem:[#allocation2 + $0x8] sm:$0xff] }
 0x83a   :  { %3498 = vmatpush3.msra.mxu1 %v4006_v2  ;;  %3505 = vmatprep.mubr.msk.f32.mxu1 %vm3879_vm0, %v3878_v0 }
 0x83b   :  { %3499 = vmatprep.subr.mxu1 %v3878_v0 }
 0x83c   :  { %3500 = vmatpush3.msra.mxu1 %v4015_v4 }
 0x83d   :  { %3501 = vmatprep.subr.mxu1 %v3878_v0 }
 0x83e   :  { %3502 = vmatpush3.msra.mxu1 %v4028_v7 }
 0x83f   :  { %3503 = vmatprep.subr.mxu1 %v3878_v0 }
 0x840   :  { %3504 = vmatpush3.msra.mxu1 %v4036_v8 }
 0x841   :  { %3519 = vmatprep.subr.mxu1 %v3878_v0 }
 0x8f9   :  { %v602_v24 = vpop.f32.mrf.mxu1 }
 0x8fa   :  { %v606_v25 = vadd.f32 %v602_v24, %v203_v23  ;;  %v1048_v23 = vld [vmem:[#allocation2 + $0x10] sm:$0xff] }
 0x8fb   :  { %v3485_v26 = vpop.f32.mrf.mxu1 }
 0x8fc   :  { %3669 = vtanh.f32 %v606_v25  ;;  %v607_v28 = vmul.f32 0.5, %v606_v25 }
 0x8fe   :  { %3671 = vtanh.f32 %v607_v28 }
 0x909   :  { %v3670_v27 = vpop.eup %3669 }
 0x90a   :  { %614 = vrot.lane.b32.xlu1 %v3670_v27, %s3880_s1  ;;  %v218_v27 = vadd.f32 %v4068_v11, %v4140_v62 }
 0x90b   :  { %v3672_v29 = vpop.eup %3671 }
 0x90c   :  { %v609_v30 = vmul.f32 0.5, %v3672_v29 }
 0x90e   :  { %v610_v31 = vadd.f32 0.5, %v609_v30 }
 0x910   :  { %v612_v34 = vmul.f32 %v610_v31, %v522_v18  ;;  %v1056_v18 = vld [vmem:[%s4804_s6 + $0x10] sm:$0xff] }
 0x97c   :  { %v615_v32 = vpop.permute.xlu1 %614 }
 0x97d   :  { %v617_v33 = vmul.f32 %v615_v32, %v610_v31 }
 0x97f   :  { %619 = vrot.lane.b32.xlu0 %v617_v33, %s3877_s2 }
 0x9f1   :  { %v620_v35 = vpop.permute.xlu0 %619 }
 0x9f2   :  { %v622_v36 = vadd.f32 %v620_v35, %v612_v34 }
 0x9f4   :  { %3673 = vtanh.f32 %v622_v36 }
 0xa01   :  { %v3674_v37 = vpop.eup %3673 }
 0xa02   :  { %625 = vrot.lane.b32.xlu1 %v3674_v37, %s3880_s1 }
 0xa74   :  { %v626_v38 = vpop.permute.xlu1 %625 }
 0xa75   :  { %v628_v39 = vmul.f32 %v626_v38, %v610_v31 }
 0xa77   :  { %630 = vrot.lane.b32.xlu0 %v628_v39, %s3877_s2 }
 0xae9   :  { %v631_v40 = vpop.permute.xlu0 %630 }
 0xaea   :  { %633 = vst.msk [vmem:[#allocation2 + $0x18] sm:$0xff] %vm228_vm2, %v631_v40  ;;  %3495 = vmatmul.mubr.msk.f32.vlgmr.msra.gmra.mxu0 %vm228_vm2, %v631_v40 }
 0xaeb   :  { %3509 = vmatpush3.msra.mxu0 %v4006_v2  ;;  %3516 = vmatprep.mubr.msk.f32.mxu0 %vm3879_vm0, %v3878_v0 }
 0xaec   :  { %3510 = vmatprep.subr.mxu0 %v3878_v0 }
 0xaed   :  { %3511 = vmatpush3.msra.mxu0 %v4015_v4 }
 0xaee   :  { %3512 = vmatprep.subr.mxu0 %v3878_v0 }
 0xaef   :  { %3513 = vmatpush3.msra.mxu0 %v4028_v7 }
 0xaf0   :  { %3514 = vmatprep.subr.mxu0 %v3878_v0 }
 0xaf1   :  { %3515 = vmatpush3.msra.mxu0 %v4036_v8  ;;  %v1049_v24 = vld [vmem:[#allocation2 + $0x18] sm:$0xff] }
 0xbaa   :  { %v702_v42 = vpop.f32.mrf.mxu0 }
 0xbab   :  { %v706_v43 = vadd.f32 %v702_v42, %v208_v41  ;;  %v4231_v41 = vld [vmem:[%s4805_s7 + $0x18] sm:$0xff]  ;;  %v4237_v42 = vld [vmem:[%s4805_s7 + $0x10] sm:$0xff] }
 0xbac   :  { %v3496_v44 = vpop.f32.mrf.mxu0 }
 0xbad   :  { %3675 = vtanh.f32 %v706_v43  ;;  %v707_v46 = vmul.f32 0.5, %v706_v43  ;;  %v4244_v43 = vld [vmem:[%s4805_s7 + $0x8] sm:$0xff]  ;;  %v4251_v44 = vld [vmem:[%s4805_s7] sm:$0xff] }
 0xbaf   :  { %3677 = vtanh.f32 %v707_v46 }
 0xbba   :  { %v3676_v45 = vpop.eup %3675 }
 0xbbb   :  { %714 = vrot.lane.b32.xlu1 %v3676_v45, %s3880_s1 }
 0xbbc   :  { %v3678_v47 = vpop.eup %3677 }
 0xbbd   :  { %v709_v48 = vmul.f32 0.5, %v3678_v47  ;;  %v3240_v47 = vld [vmem:[%s4833_s25 + $0x8] sm:$0xff] }
 0xbbf   :  { %v710_v49 = vadd.f32 0.5, %v709_v48 }
 0xbc1   :  { %v712_v52 = vmul.f32 %v710_v49, %v622_v36 }
 0xc2d   :  { %v715_v50 = vpop.permute.xlu1 %714 }
 0xc2e   :  { %v717_v51 = vmul.f32 %v715_v50, %v710_v49 }
 0xc30   :  { %719 = vrot.lane.b32.xlu0 %v717_v51, %s3877_s2  ;;  %v223_v51 = vadd.f32 %v4138_v61, %v4068_v11 }
 0xca2   :  { %v720_v53 = vpop.permute.xlu0 %719 }
 0xca3   :  { %v722_v54 = vadd.f32 %v720_v53, %v712_v52 }
 0xca5   :  { %3679 = vtanh.f32 %v722_v54 }
 0xcb2   :  { %v3680_v55 = vpop.eup %3679 }
 0xcb3   :  { %725 = vrot.lane.b32.xlu1 %v3680_v55, %s3880_s1 }
 0xd25   :  { %v726_v56 = vpop.permute.xlu1 %725 }
 0xd26   :  { %v728_v57 = vmul.f32 %v726_v56, %v710_v49  ;;  %v3239_v49 = vld [vmem:[%s4832_s12 + $0x8] sm:$0xff] }
 0xd28   :  { %730 = vrot.lane.b32.xlu0 %v728_v57, %s3877_s2  ;;  %v4293_v57 = vld [vmem:[%s4806_s8] ss:$0 sm:$0xff] }
 0xd9a   :  { %v731_v58 = vpop.permute.xlu0 %730 }
 0xd9b   :  { %733 = vst.msk [vmem:[#allocation2 + $0x20] sm:$0xff] %vm228_vm2, %v731_v58  ;;  %3506 = vmatmul.mubr.msk.f32.vlgmr.msra.gmra.mxu1 %vm228_vm2, %v731_v58 }
 0xd9c   :  { %3520 = vmatpush3.msra.mxu1 %v4006_v2  ;;  %3527 = vmatprep.mubr.msk.f32.mxu1 %vm3879_vm0, %v3878_v0  ;;  %v213_v2 = vadd.f32 %v4134_v59, %v4068_v11  ;;  %v1057_v59 = vld [vmem:[%s4804_s6 + $0x18] sm:$0xff]  ;;  %s3881_s6 = smov 96  }
 0xd9d   :  { %3521 = vmatprep.subr.mxu1 %v3878_v0  ;;  %3530 = vmatprep.subr.mxu0 %v1057_v59 }
 0xd9e   :  { %3522 = vmatpush3.msra.mxu1 %v4015_v4 }
 0xd9f   :  { %3523 = vmatprep.subr.mxu1 %v3878_v0 }
 0xda0   :  { %3524 = vmatpush3.msra.mxu1 %v4028_v7 }
 0xda1   :  { %3525 = vmatprep.subr.mxu1 %v3878_v0 }
 0xda2   :  { %3526 = vmatpush3.msra.mxu1 %v4036_v8  ;;  %v1050_v25 = vld [vmem:[#allocation2 + $0x20] sm:$0xff] }
 0xda3   :  { %3550 = vmatprep.subr.mxu1 %v3878_v0 }
 0xe5b   :  { %v802_v60 = vpop.f32.mrf.mxu1 }
 0xe5c   :  { %v806_v63 = vadd.f32 %v802_v60, %v213_v2 }
 0xe5d   :  { %v3507_v1 = vpop.f32.mrf.mxu1 }
 0xe5e   :  { %3681 = vtanh.f32 %v806_v63  ;;  %v807_v4 = vmul.f32 0.5, %v806_v63 }
 0xe60   :  { %3683 = vtanh.f32 %v807_v4 }
 0xe6b   :  { %v3682_v3 = vpop.eup %3681 }
 0xe6c   :  { %814 = vrot.lane.b32.xlu1 %v3682_v3, %s3880_s1 }
 0xe6d   :  { %v3684_v5 = vpop.eup %3683 }
 0xe6e   :  { %v809_v7 = vmul.f32 0.5, %v3684_v5 }
 0xe70   :  { %v810_v6 = vadd.f32 0.5, %v809_v7 }
 0xe72   :  { %v812_v8 = vmul.f32 %v810_v6, %v722_v54 }
 0xede   :  { %v815_v9 = vpop.permute.xlu1 %814 }
 0xedf   :  { %v817_v10 = vmul.f32 %v815_v9, %v810_v6 }
 0xee1   :  { %819 = vrot.lane.b32.xlu0 %v817_v10, %s3877_s2 }
 0xf53   :  { %v820_v12 = vpop.permute.xlu0 %819 }
 0xf54   :  { %v822_v13 = vadd.f32 %v820_v12, %v812_v8 }
 0xf56   :  { %3685 = vtanh.f32 %v822_v13 }
 0xf63   :  { %v3686_v14 = vpop.eup %3685 }
 0xf64   :  { %825 = vrot.lane.b32.xlu1 %v3686_v14, %s3880_s1 }
 0xfd6   :  { %v826_v15 = vpop.permute.xlu1 %825 }
 0xfd7   :  { %v828_v16 = vmul.f32 %v826_v15, %v810_v6 }
 0xfd9   :  { %830 = vrot.lane.b32.xlu0 %v828_v16, %s3877_s2 }
0x104b   :  { %v831_v17 = vpop.permute.xlu0 %830 }
0x104c   :  { %833 = vst.msk [vmem:[#allocation2 + $0x28] sm:$0xff] %vm228_vm2, %v831_v17  ;;  %3517 = vmatmul.mubr.msk.f32.vlgmr.msra.gmra.mxu0 %vm228_vm2, %v831_v17 }
0x104d   :  { %3531 = vmatpush3.msra.mxu0 %v1057_v59  ;;  %3538 = vmatprep.mubr.msk.f32.mxu0 %vm228_vm2, %v1046_v19 }
0x104e   :  { %3532 = vmatprep.subr.mxu0 %v1056_v18 }
0x104f   :  { %3533 = vmatpush3.msra.mxu0 %v1056_v18 }
0x1050   :  { %3534 = vmatprep.subr.mxu0 %v1055_v20 }
0x1051   :  { %3535 = vmatpush3.msra.mxu0 %v1055_v20 }
0x1052   :  { %3536 = vmatprep.subr.mxu0 %v1054_v21 }
0x1053   :  { %3537 = vmatpush3.msra.mxu0 %v1054_v21  ;;  %v1051_v26 = vld [vmem:[#allocation2 + $0x28] sm:$0xff] }
0x1054   :  { %3539 = vmatmul.mubr.msk.f32.vlgmr.msra.gmra.mxu0 %vm228_vm2, %v1047_v22  ;;  %3572 = vmatprep.subr.mxu0 %v3878_v0 }
0x1055   :  { %3541 = vmatprep.mubr.msk.f32.mxu0 %vm228_vm2, %v1048_v23  ;;  %3573 = vmatpush3.msra.mxu0 %v4231_v41 }
0x1056   :  { %3574 = vmatprep.subr.mxu0 %v3878_v0 }
0x1057   :  { %3575 = vmatpush3.msra.mxu0 %v4237_v42 }
0x1058   :  { %3542 = vmatmul.mubr.msk.f32.gmra.mxu0 %vm228_vm2, %v1049_v24  ;;  %3576 = vmatprep.subr.mxu0 %v3878_v0 }
0x1059   :  { %3544 = vmatprep.mubr.msk.f32.mxu0 %vm228_vm2, %v1050_v25  ;;  %3577 = vmatpush3.msra.mxu0 %v4244_v43 }
0x105a   :  { %3578 = vmatprep.subr.mxu0 %v3878_v0 }
0x105b   :  { %3579 = vmatpush3.msra.mxu0 %v4251_v44 }
0x105c   :  { %3545 = vmatmul.mubr.msk.f32.gmra.mxu0 %vm228_vm2, %v1051_v26  ;;  %3594 = vmatprep.subr.mxu0 %v3878_v0 }
0x110c   :  { %v902_v28 = vpop.f32.mrf.mxu0 }
0x110d   :  { %v906_v29 = vadd.f32 %v902_v28, %v218_v27 }
0x110e   :  { %v3518_v30 = vpop.f32.mrf.mxu0 }
0x110f   :  { %3687 = vtanh.f32 %v906_v29  ;;  %v907_v32 = vmul.f32 0.5, %v906_v29 }
0x1111   :  { %3689 = vtanh.f32 %v907_v32 }
0x1114   :  { %v3540_v52 = vpop.f32.mrf.mxu0 }
0x1115   :  { %v1165_v28 = vadd.f32 %v3540_v52, %v4293_v57 }
0x1116   :  { %v1159_v56 = vpop.f32.mrf.mxu0 }
0x1117   :  { %v1160_v58 = vadd.f32 %v4293_v57, %v1159_v56 }
0x111c   :  { %v3688_v31 = vpop.eup %3687 }
0x111d   :  { %914 = vrot.lane.b32.xlu1 %v3688_v31, %s3880_s1 }
0x111e   :  { %v3690_v33 = vpop.eup %3689 }
0x111f   :  { %v909_v34 = vmul.f32 0.5, %v3690_v33 }
0x1121   :  { %v910_v35 = vadd.f32 0.5, %v909_v34 }
0x1123   :  { %v912_v38 = vmul.f32 %v910_v35, %v822_v13 }
0x118f   :  { %v915_v36 = vpop.permute.xlu1 %914 }
0x1190   :  { %v917_v37 = vmul.f32 %v915_v36, %v910_v35 }
0x1192   :  { %919 = vrot.lane.b32.xlu0 %v917_v37, %s3877_s2 }
0x1204   :  { %v920_v39 = vpop.permute.xlu0 %919 }
0x1205   :  { %v4224_v40 = vadd.f32 %v920_v39, %v912_v38 }
0x1207   :  { %3691 = vtanh.f32 %v4224_v40 }
0x1214   :  { %v3692_v62 = vpop.eup %3691 }
0x1215   :  { %925 = vrot.lane.b32.xlu1 %v3692_v62, %s3880_s1 }
0x1287   :  { %v926_v45 = vpop.permute.xlu1 %925 }
0x1288   :  { %v928_v46 = vmul.f32 %v926_v45, %v910_v35 }
0x128a   :  { %930 = vrot.lane.b32.xlu0 %v928_v46, %s3877_s2 }
0x128e   :  { %1282 = vrot.lane.b32.xlu0 %v3240_v47, %s3877_s2 }
0x12fc   :  { %v931_v48 = vpop.permute.xlu0 %930 }
0x12fd   :  { %933 = vst.msk [vmem:[#allocation2 + $0x30] sm:$0xff] %vm228_vm2, %v931_v48  ;;  %3528 = vmatmul.mubr.msk.f32.vlgmr.msra.gmra.mxu1 %vm228_vm2, %v931_v48 }
0x12fe   :  { %3551 = vmatpush3.msra.mxu1 %v4231_v41  ;;  %3558 = vmatprep.mubr.msk.f32.mxu1 %vm3879_vm0, %v3878_v0 }
0x12ff   :  { %3552 = vmatprep.subr.mxu1 %v3878_v0 }
0x1300   :  { %3553 = vmatpush3.msra.mxu1 %v4237_v42  ;;  %v1283_v6 = vpop.permute.xlu0 %1282 }
0x1301   :  { %3554 = vmatprep.subr.mxu1 %v3878_v0 }
0x1302   :  { %3555 = vmatpush3.msra.mxu1 %v4244_v43 }
0x1303   :  { %3556 = vmatprep.subr.mxu1 %v3878_v0 }
0x1304   :  { %3557 = vmatpush3.msra.mxu1 %v4251_v44  ;;  %v1052_v50 = vld [vmem:[#allocation2 + $0x30] sm:$0xff] }
0x1305   :  { %3559 = vmatmul.mubr.msk.f32.vlgmr.msra.gmra.mxu1 %vm228_vm2, %v3239_v49  ;;  %3547 = vmatprep.mubr.msk.f32.mxu0 %vm228_vm2, %v1052_v50 }
0x1306   :  { %3561 = vmatprep.subr.mxu1 %v3878_v0  ;;  %3569 = vmatprep.mubr.msk.f32.mxu1 %vm3879_vm0, %v3878_v0 }
0x1307   :  { %3562 = vmatpush3.msra.mxu1 %v4231_v41 }
0x1308   :  { %3563 = vmatprep.subr.mxu1 %v3878_v0 }
0x1309   :  { %3564 = vmatpush3.msra.mxu1 %v4237_v42 }
0x130a   :  { %3565 = vmatprep.subr.mxu1 %v3878_v0 }
0x130b   :  { %3566 = vmatpush3.msra.mxu1 %v4244_v43 }
0x130c   :  { %3567 = vmatprep.subr.mxu1 %v3878_v0 }
0x130d   :  { %3568 = vmatpush3.msra.mxu1 %v4251_v44 }
0x130e   :  { %3583 = vmatprep.subr.mxu1 %v3878_v0 }
0x13bd   :  { %v1002_v53 = vpop.f32.mrf.mxu1 }
0x13be   :  { %v1006_v54 = vadd.f32 %v1002_v53, %v223_v51  ;;  %v3543_v51 = vpop.f32.mrf.mxu0 }
0x13bf   :  { %v3529_v55 = vpop.f32.mrf.mxu1 }
0x13c0   :  { %v1007_v59 = vmul.f32 0.5, %v1006_v54  ;;  %v1169_v52 = vpop.f32.mrf.mxu0 }
0x13c2   :  { %v4347_v53 = vpop.f32.mrf.mxu0 }
0x13c5   :  { %v1271_v2 = vpop.f32.mrf.mxu1 }
0x13c6   :  { %v1275_v60 = vadd.f32 %v1271_v2, %v1160_v58  ;;  %v1170_v58 = vadd.f32 %v4293_v57, %v1169_v52 }
0x13c7   :  { %v3560_v63 = vpop.f32.mrf.mxu1 }
0x13c8   :  { %3693 = vtanh.f32 %v1275_v60  ;;  %v1276_v11 = vmul.f32 0.5, %v1275_v60 }
0x13ca   :  { %3695 = vtanh.f32 %v1276_v11 }
0x13d5   :  { %v3694_v1 = vpop.eup %3693 }
0x13d6   :  { %1287 = vrot.lane.b32.xlu1 %v3694_v1, %s3880_s1 }
0x13d7   :  { %v3696_v61 = vpop.eup %3695 }
0x13d8   :  { %v1278_v3 = vmul.f32 0.5, %v3696_v61 }
0x13da   :  { %v1279_v4 = vadd.f32 0.5, %v1278_v3 }
0x13dc   :  { %v1285_v9 = vmul.f32 %v1283_v6, %v1279_v4 }
0x1448   :  { %v1288_v5 = vpop.permute.xlu1 %1287 }
0x1449   :  { %v1290_v7 = vmul.f32 %v1288_v5, %v1279_v4 }
0x144b   :  { %1292 = vrot.lane.b32.xlu1 %v1290_v7, %s3877_s2 }
0x14bd   :  { %v1293_v10 = vpop.permute.xlu1 %1292 }
0x14be   :  { %v4298_v8 = vadd.f32 %v1293_v10, %v1285_v9 }
0x14c0   :  { %3697 = vtanh.f32 %v4298_v8 }
0x14c1   :  { %3699 = vtanh.f32 %v1006_v54  ;;  %v4349_v54 = vpop.f32.mrf.mxu0 }
0x14c2   :  { %3701 = vtanh.f32 %v1007_v59 }
0x14cd   :  { %v3698_v12 = vpop.eup %3697 }
0x14ce   :  { %1298 = vrot.lane.b32.xlu0 %v3698_v12, %s3880_s1  ;;  %v3700_v13 = vpop.eup %3699 }
0x14cf   :  { %v3702_v14 = vpop.eup %3701 }
0x14d0   :  { %v1009_v15 = vmul.f32 0.5, %v3702_v14  ;;  %v1175_v14 = vadd.f32 %v3543_v51, %v4293_v57 }
0x14d2   :  { %1014 = vrot.lane.b32.xlu0 %v3700_v13, %s3880_s1  ;;  %v1010_v18 = vadd.f32 0.5, %v1009_v15 }
0x14d4   :  { %v1012_v22 = vmul.f32 %v1010_v18, %v4224_v40 }
0x1540   :  { %v1299_v16 = vpop.permute.xlu0 %1298 }
0x1541   :  { %v1301_v17 = vmul.f32 %v1299_v16, %v1279_v4 }
0x1543   :  { %1303 = vrot.lane.b32.xlu1 %v1301_v17, %s3877_s2 }
0x1544   :  { %v1015_v19 = vpop.permute.xlu0 %1014 }
0x1545   :  { %v1017_v20 = vmul.f32 %v1015_v19, %v1010_v18 }
0x1547   :  { %1019 = vrot.lane.b32.xlu0 %v1017_v20, %s3877_s2 }
0x15b5   :  { %v1304_v21 = vpop.permute.xlu1 %1303 }
0x15b6   :  { %3570 = vmatmul.mubr.msk.f32.vlgmr.msra.gmra.mxu1 %vm228_vm2, %v1304_v21 }
0x15b7   :  { %3584 = vmatpush3.msra.mxu1 %v4231_v41  ;;  %3591 = vmatprep.mubr.msk.f32.mxu1 %vm3879_vm0, %v3878_v0 }
0x15b8   :  { %3585 = vmatprep.subr.mxu1 %v3878_v0 }
0x15b9   :  { %v1020_v23 = vpop.permute.xlu0 %1019  ;;  %3586 = vmatpush3.msra.mxu1 %v4237_v42 }
0x15ba   :  { %v4312_v24 = vadd.f32 %v1020_v23, %v1012_v22  ;;  %3587 = vmatprep.subr.mxu1 %v3878_v0 }
0x15bb   :  { %3588 = vmatpush3.msra.mxu1 %v4244_v43 }
0x15bc   :  { %3703 = vtanh.f32 %v4312_v24  ;;  %3589 = vmatprep.subr.mxu1 %v3878_v0 }
0x15bd   :  { %3590 = vmatpush3.msra.mxu1 %v4251_v44 }
0x15be   :  { %3605 = vmatprep.subr.mxu1 %v3878_v0 }
0x15c9   :  { %v3704_v25 = vpop.eup %3703 }
0x15ca   :  { %1025 = vrot.lane.b32.xlu0 %v3704_v25, %s3880_s1 }
0x163c   :  { %v1026_v26 = vpop.permute.xlu0 %1025 }
0x163d   :  { %v1028_v27 = vmul.f32 %v1026_v26, %v1010_v18 }
0x163f   :  { %1030 = vrot.lane.b32.xlu0 %v1028_v27, %s3877_s2 }
0x1676   :  { %v1373_v29 = vpop.f32.mrf.mxu1 }
0x1677   :  { %v1377_v30 = vadd.f32 %v1373_v29, %v1165_v28 }
0x1678   :  { %v3571_v31 = vpop.f32.mrf.mxu1 }
0x1679   :  { %3705 = vtanh.f32 %v1377_v30  ;;  %v1378_v35 = vmul.f32 0.5, %v1377_v30 }
0x167b   :  { %3707 = vtanh.f32 %v1378_v35 }
0x1686   :  { %v3706_v32 = vpop.eup %3705 }
0x1687   :  { %1385 = vrot.lane.b32.xlu1 %v3706_v32, %s3880_s1 }
0x1688   :  { %v3708_v36 = vpop.eup %3707 }
0x1689   :  { %v1380_v37 = vmul.f32 0.5, %v3708_v36 }
0x168b   :  { %v1381_v38 = vadd.f32 0.5, %v1380_v37 }
0x168d   :  { %v1383_v62 = vmul.f32 %v1381_v38, %v4298_v8 }
0x16b1   :  { %v1031_v33 = vpop.permute.xlu0 %1030 }
0x16b2   :  { %1033 = vst.msk [vmem:[#allocation2 + $0x38] sm:$0xff] %vm228_vm2, %v1031_v33 }
0x16b3   :  { %1044 = vst.msk [vmem:[#allocation3] sm:$0xf] %vm1034_vm3, %v1031_v33  ;;  %1035 = vst.msk [vmem:[#allocation9] sm:$0xf] %vm1034_vm3, %v1031_v33 }
0x16b4   :  { %1045 = vst.msk [vmem:[#allocation4 - $0x4] sm:$0xf0] %vm1041_vm4, %v1031_v33  ;;  %1042 = vst.msk [vmem:[#allocation12 - $0x4] sm:$0xf0] %vm1041_vm4, %v1031_v33  ;;  %v1180_v33 = vadd.f32 %v4293_v57, %v4349_v54 }
0x16b9   :  { %v1053_v34 = vld [vmem:[#allocation2 + $0x38] sm:$0xff] }
0x16ba   :  { %3548 = vmatmul.mubr.msk.f32.gmra.mxu0 %vm228_vm2, %v1053_v34 }
0x16bb   :  { %3580 = vmatprep.mubr.msk.f32.mxu0 %vm3879_vm0, %v3878_v0 }
0x16f9   :  { %v1386_v39 = vpop.permute.xlu1 %1385 }
0x16fa   :  { %v1388_v40 = vmul.f32 %v1386_v39, %v1381_v38 }
0x16fc   :  { %1390 = vrot.lane.b32.xlu1 %v1388_v40, %s3877_s2 }
0x176e   :  { %v1391_v45 = vpop.permute.xlu1 %1390 }
0x176f   :  { %v1393_v46 = vadd.f32 %v1391_v45, %v1383_v62 }
0x1771   :  { %3709 = vtanh.f32 %v1393_v46 }
0x177a   :  { %v4351_v55 = vpop.f32.mrf.mxu0 }
0x177c   :  { %v4353_v56 = vpop.f32.mrf.mxu0 }
0x177e   :  { %v3710_v47 = vpop.eup %3709 }
0x177f   :  { %1396 = vrot.lane.b32.xlu1 %v3710_v47, %s3880_s1 }
0x17f1   :  { %v1397_v48 = vpop.permute.xlu1 %1396 }
0x17f2   :  { %v1399_v49 = vmul.f32 %v1397_v48, %v1381_v38 }
0x17f4   :  { %1401 = vrot.lane.b32.xlu1 %v1399_v49, %s3877_s2 }
0x1866   :  { %v1402_v50 = vpop.permute.xlu1 %1401 }
0x1867   :  { %3581 = vmatmul.mubr.msk.f32.vlgmr.msra.gmra.mxu0 %vm228_vm2, %v1402_v50 }
0x1868   :  { %3595 = vmatpush3.msra.mxu0 %v4231_v41  ;;  %3602 = vmatprep.mubr.msk.f32.mxu0 %vm3879_vm0, %v3878_v0 }
0x1869   :  { %3596 = vmatprep.subr.mxu0 %v3878_v0 }
0x186a   :  { %3597 = vmatpush3.msra.mxu0 %v4237_v42 }
0x186b   :  { %3598 = vmatprep.subr.mxu0 %v3878_v0 }
0x186c   :  { %3599 = vmatpush3.msra.mxu0 %v4244_v43 }
0x186d   :  { %3600 = vmatprep.subr.mxu0 %v3878_v0 }
0x186e   :  { %3601 = vmatpush3.msra.mxu0 %v4251_v44 }
0x186f   :  { %3616 = vmatprep.subr.mxu0 %v3878_v0 }
0x1927   :  { %v1471_v2 = vpop.f32.mrf.mxu0 }
0x1928   :  { %v1475_v60 = vadd.f32 %v1471_v2, %v1170_v58  ;;  %v1185_v58 = vadd.f32 %v4347_v53, %v4293_v57 }
0x1929   :  { %v3582_v63 = vpop.f32.mrf.mxu0 }
0x192a   :  { %3711 = vtanh.f32 %v1475_v60  ;;  %v1476_v11 = vmul.f32 0.5, %v1475_v60 }
0x192c   :  { %3713 = vtanh.f32 %v1476_v11 }
0x1937   :  { %v3712_v1 = vpop.eup %3711 }
0x1938   :  { %1483 = vrot.lane.b32.xlu0 %v3712_v1, %s3880_s1 }
0x1939   :  { %v3714_v61 = vpop.eup %3713 }
0x193a   :  { %v1478_v3 = vmul.f32 0.5, %v3714_v61 }
0x193c   :  { %v1479_v4 = vadd.f32 0.5, %v1478_v3 }
0x193e   :  { %v1481_v6 = vmul.f32 %v1479_v4, %v1393_v46 }
0x19aa   :  { %v1484_v5 = vpop.permute.xlu0 %1483 }
0x19ab   :  { %v1486_v7 = vmul.f32 %v1484_v5, %v1479_v4 }
0x19ad   :  { %1488 = vrot.lane.b32.xlu1 %v1486_v7, %s3877_s2 }
0x1a1f   :  { %v1489_v9 = vpop.permute.xlu1 %1488 }
0x1a20   :  { %v1491_v10 = vadd.f32 %v1489_v9, %v1481_v6 }
0x1a22   :  { %3715 = vtanh.f32 %v1491_v10 }
0x1a2f   :  { %v3716_v8 = vpop.eup %3715 }
0x1a30   :  { %1494 = vrot.lane.b32.xlu0 %v3716_v8, %s3880_s1 }
0x1aa2   :  { %v1495_v12 = vpop.permute.xlu0 %1494 }
0x1aa3   :  { %v1497_v13 = vmul.f32 %v1495_v12, %v1479_v4 }
0x1aa5   :  { %1499 = vrot.lane.b32.xlu1 %v1497_v13, %s3877_s2 }
0x1b17   :  { %v1500_v59 = vpop.permute.xlu1 %1499 }
0x1b18   :  { %3592 = vmatmul.mubr.msk.f32.vlgmr.msra.gmra.mxu1 %vm228_vm2, %v1500_v59 }
0x1b19   :  { %3606 = vmatpush3.msra.mxu1 %v4231_v41  ;;  %3613 = vmatprep.mubr.msk.f32.mxu1 %vm3879_vm0, %v3878_v0 }
0x1b1a   :  { %3607 = vmatprep.subr.mxu1 %v3878_v0 }
0x1b1b   :  { %3608 = vmatpush3.msra.mxu1 %v4237_v42 }
0x1b1c   :  { %3609 = vmatprep.subr.mxu1 %v3878_v0 }
0x1b1d   :  { %3610 = vmatpush3.msra.mxu1 %v4244_v43 }
0x1b1e   :  { %3611 = vmatprep.subr.mxu1 %v3878_v0 }
0x1b1f   :  { %3612 = vmatpush3.msra.mxu1 %v4251_v44 }
0x1b20   :  { %3627 = vmatprep.subr.mxu1 %v3878_v0 }
0x1bd8   :  { %v1569_v15 = vpop.f32.mrf.mxu1 }
0x1bd9   :  { %v1573_v16 = vadd.f32 %v1569_v15, %v1175_v14 }
0x1bda   :  { %v3593_v17 = vpop.f32.mrf.mxu1 }
0x1bdb   :  { %3717 = vtanh.f32 %v1573_v16  ;;  %v1574_v19 = vmul.f32 0.5, %v1573_v16 }
0x1bdd   :  { %3719 = vtanh.f32 %v1574_v19 }
0x1be8   :  { %v3718_v18 = vpop.eup %3717 }
0x1be9   :  { %1581 = vrot.lane.b32.xlu0 %v3718_v18, %s3880_s1 }
0x1bea   :  { %v3720_v20 = vpop.eup %3719 }
0x1beb   :  { %v1576_v21 = vmul.f32 0.5, %v3720_v20 }
0x1bed   :  { %v1577_v22 = vadd.f32 0.5, %v1576_v21 }
0x1bef   :  { %v1579_v26 = vmul.f32 %v1577_v22, %v1491_v10  ;;  %v1190_v10 = vadd.f32 %v4293_v57, %v4353_v56 }
0x1c5b   :  { %v1582_v23 = vpop.permute.xlu0 %1581 }
0x1c5c   :  { %v1584_v25 = vmul.f32 %v1582_v23, %v1577_v22 }
0x1c5e   :  { %1586 = vrot.lane.b32.xlu1 %v1584_v25, %s3877_s2 }
0x1cd0   :  { %v1587_v27 = vpop.permute.xlu1 %1586 }
0x1cd1   :  { %v1589_v28 = vadd.f32 %v1587_v27, %v1579_v26  ;;  %v1195_v27 = vadd.f32 %v4351_v55, %v4293_v57  ;;  %v2037_v57 = vld [vmem:[%s4808_s10 + $0x68] sm:$0xff]  ;;  %v2039_v55 = vld [vmem:[%s4808_s10 + $0x78] sm:$0xff] }
0x1cd3   :  { %3721 = vtanh.f32 %v1589_v28 }
0x1ce0   :  { %v3722_v29 = vpop.eup %3721 }
0x1ce1   :  { %1592 = vrot.lane.b32.xlu0 %v3722_v29, %s3880_s1 }
0x1d53   :  { %v1593_v30 = vpop.permute.xlu0 %1592 }
0x1d54   :  { %v1595_v31 = vmul.f32 %v1593_v30, %v1577_v22 }
0x1d56   :  { %1597 = vrot.lane.b32.xlu1 %v1595_v31, %s3877_s2 }
0x1dc8   :  { %v1598_v32 = vpop.permute.xlu1 %1597 }
0x1dc9   :  { %3603 = vmatmul.mubr.msk.f32.vlgmr.msra.gmra.mxu0 %vm228_vm2, %v1598_v32 }
0x1dca   :  { %3617 = vmatpush3.msra.mxu0 %v4231_v41  ;;  %3624 = vmatprep.mubr.msk.f32.mxu0 %vm3879_vm0, %v3878_v0 }
0x1dcb   :  { %3618 = vmatprep.subr.mxu0 %v3878_v0 }
0x1dcc   :  { %3619 = vmatpush3.msra.mxu0 %v4237_v42 }
0x1dcd   :  { %3620 = vmatprep.subr.mxu0 %v3878_v0 }
0x1dce   :  { %3621 = vmatpush3.msra.mxu0 %v4244_v43 }
0x1dcf   :  { %3622 = vmatprep.subr.mxu0 %v3878_v0 }
0x1dd0   :  { %3623 = vmatpush3.msra.mxu0 %v4251_v44 }
0x1dd1   :  { %2067 = vmatprep.subr.mxu0 %v2037_v57  ;;  %v2393_v57 = vld [vmem:[#allocation5 + $0x128] sm:$0xff] }
0x1e89   :  { %v1667_v34 = vpop.f32.mrf.mxu0 }
0x1e8a   :  { %v1671_v35 = vadd.f32 %v1667_v34, %v1180_v33 }
0x1e8b   :  { %v3604_v36 = vpop.f32.mrf.mxu0 }
0x1e8c   :  { %3723 = vtanh.f32 %v1671_v35  ;;  %v1672_v38 = vmul.f32 0.5, %v1671_v35 }
0x1e8e   :  { %3725 = vtanh.f32 %v1672_v38 }
0x1e99   :  { %v3724_v37 = vpop.eup %3723 }
0x1e9a   :  { %1679 = vrot.lane.b32.xlu0 %v3724_v37, %s3880_s1 }
0x1e9b   :  { %v3726_v39 = vpop.eup %3725 }
0x1e9c   :  { %v1674_v40 = vmul.f32 0.5, %v3726_v39 }
0x1e9e   :  { %v1675_v62 = vadd.f32 0.5, %v1674_v40 }
0x1ea0   :  { %v1677_v47 = vmul.f32 %v1675_v62, %v1589_v28 }
0x1f0c   :  { %v1680_v45 = vpop.permute.xlu0 %1679 }
0x1f0d   :  { %v1682_v46 = vmul.f32 %v1680_v45, %v1675_v62  ;;  %v2036_v45 = vld [vmem:[%s4808_s10 + $0x60] sm:$0xff] }
0x1f0f   :  { %1684 = vrot.lane.b32.xlu1 %v1682_v46, %s3877_s2  ;;  %v2038_v46 = vld [vmem:[%s4808_s10 + $0x70] sm:$0xff] }
0x1f81   :  { %v1685_v48 = vpop.permute.xlu1 %1684 }
0x1f82   :  { %v1687_v49 = vadd.f32 %v1685_v48, %v1677_v47  ;;  %v2033_v47 = vld [vmem:[%s4808_s10 + $0x48] sm:$0xff]  ;;  %v2035_v48 = vld [vmem:[%s4808_s10 + $0x58] sm:$0xff] }
0x1f84   :  { %3727 = vtanh.f32 %v1687_v49 }
0x1f91   :  { %v3728_v50 = vpop.eup %3727 }
0x1f92   :  { %1690 = vrot.lane.b32.xlu0 %v3728_v50, %s3880_s1  ;;  %v2029_v50 = vld [vmem:[%s4808_s10 + $0x28] sm:$0xff] }
0x2004   :  { %v1691_v51 = vpop.permute.xlu0 %1690 }
0x2005   :  { %v1693_v52 = vmul.f32 %v1691_v51, %v1675_v62  ;;  %v2031_v51 = vld [vmem:[%s4808_s10 + $0x38] sm:$0xff] }
0x2007   :  { %1695 = vrot.lane.b32.xlu1 %v1693_v52, %s3877_s2  ;;  %v2028_v52 = vld [vmem:[%s4808_s10 + $0x20] sm:$0xff] }
0x2079   :  { %v1696_v54 = vpop.permute.xlu1 %1695 }
0x207a   :  { %3614 = vmatmul.mubr.msk.f32.vlgmr.msra.gmra.mxu1 %vm228_vm2, %v1696_v54  ;;  %v2030_v54 = vld [vmem:[%s4808_s10 + $0x30] sm:$0xff] }
0x207b   :  { %3628 = vmatpush3.msra.mxu1 %v4231_v41  ;;  %3635 = vmatprep.mubr.msk.f32.mxu1 %vm3879_vm0, %v3878_v0 }
0x207c   :  { %3629 = vmatprep.subr.mxu1 %v3878_v0 }
0x207d   :  { %3630 = vmatpush3.msra.mxu1 %v4237_v42 }
0x207e   :  { %3631 = vmatprep.subr.mxu1 %v3878_v0 }
0x207f   :  { %3632 = vmatpush3.msra.mxu1 %v4244_v43 }
0x2080   :  { %3633 = vmatprep.subr.mxu1 %v3878_v0 }
0x2081   :  { %3634 = vmatpush3.msra.mxu1 %v4251_v44 }
0x2082   :  { %2138 = vmatprep.subr.mxu1 %v2039_v55  ;;  %v2521_v55 = vld [vmem:[#allocation5 + $0x528] sm:$0xff] }
0x213a   :  { %v1765_v2 = vpop.f32.mrf.mxu1 }
0x213b   :  { %v1769_v41 = vadd.f32 %v1765_v2, %v1185_v58  ;;  %v2025_v58 = vld [vmem:[%s4808_s10 + $0x8] sm:$0xff]  ;;  %v2027_v2 = vld [vmem:[%s4808_s10 + $0x18] sm:$0xff] }
0x213c   :  { %v3615_v60 = vpop.f32.mrf.mxu1 }
0x213d   :  { %3729 = vtanh.f32 %v1769_v41  ;;  %v1770_v1 = vmul.f32 0.5, %v1769_v41  ;;  %v2024_v41 = vld [vmem:[%s4808_s10] sm:$0xff]  ;;  %v2026_v60 = vld [vmem:[%s4808_s10 + $0x10] sm:$0xff] }
0x213f   :  { %3731 = vtanh.f32 %v1770_v1  ;;  %v2022_v1 = vld [vmem:[%s4807_s9 + $0x78] sm:$0xff] }
0x214a   :  { %v3730_v63 = vpop.eup %3729 }
0x214b   :  { %1777 = vrot.lane.b32.xlu0 %v3730_v63, %s3880_s1  ;;  %v2020_v63 = vld [vmem:[%s4807_s9 + $0x68] sm:$0xff] }
0x214c   :  { %v3732_v42 = vpop.eup %3731 }
0x214d   :  { %v1772_v11 = vmul.f32 0.5, %v3732_v42 }
0x214f   :  { %v1773_v61 = vadd.f32 0.5, %v1772_v11 }
0x2151   :  { %v1775_v44 = vmul.f32 %v1773_v61, %v1687_v49  ;;  %v2034_v49 = vld [vmem:[%s4808_s10 + $0x50] sm:$0xff] }
0x21bd   :  { %v1778_v43 = vpop.permute.xlu0 %1777 }
0x21be   :  { %v1780_v3 = vmul.f32 %v1778_v43, %v1773_v61 }
0x21c0   :  { %1782 = vrot.lane.b32.xlu1 %v1780_v3, %s3877_s2 }
0x2232   :  { %v1783_v4 = vpop.permute.xlu1 %1782 }
0x2233   :  { %v1785_v5 = vadd.f32 %v1783_v4, %v1775_v44  ;;  %v2019_v44 = vld [vmem:[%s4807_s9 + $0x60] sm:$0xff]  ;;  %v2021_v4 = vld [vmem:[%s4807_s9 + $0x70] sm:$0xff] }
0x2235   :  { %3733 = vtanh.f32 %v1785_v5 }
0x2242   :  { %v3734_v53 = vpop.eup %3733 }
0x2243   :  { %1788 = vrot.lane.b32.xlu0 %v3734_v53, %s3880_s1  ;;  %v2016_v53 = vld [vmem:[%s4807_s9 + $0x48] sm:$0xff] }
0x22b5   :  { %v1789_v7 = vpop.permute.xlu0 %1788 }
0x22b6   :  { %v1791_v6 = vmul.f32 %v1789_v7, %v1773_v61  ;;  %v2018_v7 = vld [vmem:[%s4807_s9 + $0x58] sm:$0xff] }
0x22b8   :  { %1793 = vrot.lane.b32.xlu1 %v1791_v6, %s3877_s2  ;;  %v2015_v6 = vld [vmem:[%s4807_s9 + $0x40] sm:$0xff] }
0x232a   :  { %v1794_v9 = vpop.permute.xlu1 %1793 }
0x232b   :  { %3625 = vmatmul.mubr.msk.f32.vlgmr.msra.gmra.mxu0 %vm228_vm2, %v1794_v9  ;;  %v2017_v9 = vld [vmem:[%s4807_s9 + $0x50] sm:$0xff] }
0x232c   :  { %2107 = vmatprep.mubr.f32.mxu0 %v3878_v0  ;;  %2068 = vmatpush1.msra.mxu0 %v2036_v45  ;;  %v2520_v45 = vld [vmem:[#allocation5 + $0x520] sm:$0xff] }
0x232d   :  { %2069 = vmatprep.subr.mxu0 %v2033_v47  ;;  %v2517_v47 = vld [vmem:[#allocation5 + $0x508] sm:$0xff] }
0x23eb   :  { %v1863_v8 = vpop.f32.mrf.mxu0 }
0x23ec   :  { %v1867_v12 = vadd.f32 %v1863_v8, %v1190_v10  ;;  %v2012_v10 = vld [vmem:[%s4807_s9 + $0x28] sm:$0xff]  ;;  %v2014_v8 = vld [vmem:[%s4807_s9 + $0x38] sm:$0xff] }
0x23ed   :  { %v3626_v13 = vpop.f32.mrf.mxu0 }
0x23ee   :  { %3735 = vtanh.f32 %v1867_v12  ;;  %v1868_v14 = vmul.f32 0.5, %v1867_v12  ;;  %v2011_v12 = vld [vmem:[%s4807_s9 + $0x20] sm:$0xff]  ;;  %v2013_v13 = vld [vmem:[%s4807_s9 + $0x30] sm:$0xff] }
0x23f0   :  { %3737 = vtanh.f32 %v1868_v14  ;;  %v2010_v14 = vld [vmem:[%s4807_s9 + $0x18] sm:$0xff] }
0x23fb   :  { %v3736_v59 = vpop.eup %3735 }
0x23fc   :  { %1875 = vrot.lane.b32.xlu0 %v3736_v59, %s3880_s1  ;;  %v2008_v59 = vld [vmem:[%s4807_s9 + $0x8] sm:$0xff] }
0x23fd   :  { %v3738_v15 = vpop.eup %3737 }
0x23fe   :  { %v1870_v16 = vmul.f32 0.5, %v3738_v15  ;;  %v2007_v15 = vld [vmem:[%s4807_s9] sm:$0xff] }
0x2400   :  { %v1871_v17 = vadd.f32 0.5, %v1870_v16  ;;  %v2009_v16 = vld [vmem:[%s4807_s9 + $0x10] sm:$0xff]  ;;  %s3883_s9 = smov [#allocation12]  }
0x2401   :  { %s3175_s22 = sshll.u32 %s3883_s9, 4  ;;  %s3176_s22 = int_to_ptr.vmem [resolvable:$true] %s3175_s22 }
0x2402   :  { %v1873_v20 = vmul.f32 %v1871_v17, %v1785_v5 }
0x246e   :  { %v1876_v18 = vpop.permute.xlu0 %1875 }
0x246f   :  { %v1878_v19 = vmul.f32 %v1876_v18, %v1871_v17  ;;  %v2545_v18 = vld [vmem:[#allocation5 + $0x5e8] sm:$0xff] }
0x2471   :  { %1880 = vrot.lane.b32.xlu1 %v1878_v19, %s3877_s2 }
0x24e3   :  { %v1881_v21 = vpop.permute.xlu1 %1880 }
0x24e4   :  { %v1883_v22 = vadd.f32 %v1881_v21, %v1873_v20  ;;  %v2416_v20 = vld [vmem:[#allocation5 + $0x1e0] sm:$0xff] }
0x24e5   :  { %v2544_v21 = vld [vmem:[#allocation5 + $0x5e0] sm:$0xff] }
0x24e6   :  { %3739 = vtanh.f32 %v1883_v22 }
0x24f3   :  { %v3740_v56 = vpop.eup %3739 }
0x24f4   :  { %1886 = vrot.lane.b32.xlu0 %v3740_v56, %s3880_s1  ;;  %v2541_v56 = vld [vmem:[#allocation5 + $0x5c8] sm:$0xff] }
0x2566   :  { %v1887_v23 = vpop.permute.xlu0 %1886 }
0x2567   :  { %v1889_v25 = vmul.f32 %v1887_v23, %v1871_v17  ;;  %v2417_v17 = vld [vmem:[#allocation5 + $0x1e8] sm:$0xff]  ;;  %v2412_v23 = vld [vmem:[#allocation5 + $0x1c0] sm:$0xff] }
0x2569   :  { %1891 = vrot.lane.b32.xlu1 %v1889_v25, %s3877_s2  ;;  %v2540_v25 = vld [vmem:[#allocation5 + $0x5c0] sm:$0xff] }
0x25db   :  { %v1892_v26 = vpop.permute.xlu1 %1891 }
0x25dc   :  { %3636 = vmatmul.mubr.msk.f32.vlgmr.msra.gmra.mxu1 %vm228_vm2, %v1892_v26  ;;  %v2409_v26 = vld [vmem:[#allocation5 + $0x1a8] sm:$0xff] }
0x25dd   :  { %2178 = vmatprep.mubr.f32.mxu1 %v3878_v0  ;;  %2139 = vmatpush1.msra.mxu1 %v2038_v46  ;;  %v2389_v46 = vld [vmem:[#allocation5 + $0x108] sm:$0xff] }
0x25de   :  { %2140 = vmatprep.subr.mxu1 %v2035_v48  ;;  %v2388_v48 = vld [vmem:[#allocation5 + $0x100] sm:$0xff] }
0x25df   :  { %2141 = vmatpush1.msra.mxu1 %v2034_v49  ;;  %v2385_v49 = vld [vmem:[#allocation5 + $0xe8] sm:$0xff] }
0x25e0   :  { %2142 = vmatprep.subr.mxu1 %v2031_v51  ;;  %v2384_v51 = vld [vmem:[#allocation5 + $0xe0] sm:$0xff] }
0x25e1   :  { %2143 = vmatpush1.msra.mxu1 %v2030_v54  ;;  %v2381_v54 = vld [vmem:[#allocation5 + $0xc8] sm:$0xff] }
0x25e2   :  { %2144 = vmatprep.subr.mxu1 %v2027_v2  ;;  %v2380_v2 = vld [vmem:[#allocation5 + $0xc0] sm:$0xff] }
0x25e3   :  { %2145 = vmatpush1.msra.mxu1 %v2026_v60  ;;  %v2377_v60 = vld [vmem:[#allocation5 + $0xa8] sm:$0xff] }
0x25e4   :  { %2283 = vmatprep.subr.mxu1 %v2022_v1  ;;  %v2376_v1 = vld [vmem:[#allocation5 + $0xa0] sm:$0xff] }
0x269c   :  { %v1961_v28 = vpop.f32.mrf.mxu1 }
0x269d   :  { %v1965_v29 = vadd.f32 %v1961_v28, %v1195_v27  ;;  %v2537_v27 = vld [vmem:[#allocation5 + $0x5a8] sm:$0xff]  ;;  %v2536_v28 = vld [vmem:[#allocation5 + $0x5a0] sm:$0xff] }
0x269e   :  { %v3637_v30 = vpop.f32.mrf.mxu1 }
0x269f   :  { %3741 = vtanh.f32 %v1965_v29  ;;  %v1966_v32 = vmul.f32 0.5, %v1965_v29  ;;  %v2405_v29 = vld [vmem:[#allocation5 + $0x188] sm:$0xff] }
0x26a0   :  { %v2533_v30 = vld [vmem:[#allocation5 + $0x588] sm:$0xff] }
0x26a1   :  { %3743 = vtanh.f32 %v1966_v32  ;;  %v2532_v32 = vld [vmem:[#allocation5 + $0x580] sm:$0xff] }
0x26ac   :  { %v3742_v31 = vpop.eup %3741 }
0x26ad   :  { %1973 = vrot.lane.b32.xlu0 %v3742_v31, %s3880_s1  ;;  %v2404_v31 = vld [vmem:[#allocation5 + $0x180] sm:$0xff] }
0x26ae   :  { %v3744_v33 = vpop.eup %3743 }
0x26af   :  { %v1968_v34 = vmul.f32 0.5, %v3744_v33  ;;  %v2401_v33 = vld [vmem:[#allocation5 + $0x168] sm:$0xff] }
0x26b1   :  { %v1969_v35 = vadd.f32 0.5, %v1968_v34  ;;  %v2529_v34 = vld [vmem:[#allocation5 + $0x568] sm:$0xff] }
0x26b3   :  { %v1971_v38 = vmul.f32 %v1969_v35, %v1883_v22  ;;  %v2413_v22 = vld [vmem:[#allocation5 + $0x1c8] sm:$0xff] }
0x271f   :  { %v1974_v36 = vpop.permute.xlu0 %1973 }
0x2720   :  { %v1976_v37 = vmul.f32 %v1974_v36, %v1969_v35  ;;  %v2528_v36 = vld [vmem:[#allocation5 + $0x560] sm:$0xff] }
0x2722   :  { %1978 = vrot.lane.b32.xlu1 %v1976_v37, %s3877_s2  ;;  %v2397_v37 = vld [vmem:[#allocation5 + $0x148] sm:$0xff] }
0x2794   :  { %v1979_v39 = vpop.permute.xlu1 %1978 }
0x2795   :  { %v1981_v40 = vadd.f32 %v1979_v39, %v1971_v38  ;;  %v2525_v38 = vld [vmem:[#allocation5 + $0x548] sm:$0xff]  ;;  %v2396_v39 = vld [vmem:[#allocation5 + $0x140] sm:$0xff] }
0x2797   :  { %3745 = vtanh.f32 %v1981_v40 }
0x27a4   :  { %v3746_v62 = vpop.eup %3745 }
0x27a5   :  { %1984 = vrot.lane.b32.xlu0 %v3746_v62, %s3880_s1  ;;  %v2392_v62 = vld [vmem:[#allocation5 + $0x120] sm:$0xff] }
0x27a9   :  { %1037 = vrot.lane.b32.xlu0 %v4312_v24, %s3881_s6  ;;  %v2032_v24 = vld [vmem:[%s4808_s10 + $0x40] sm:$0xff] }
0x27aa   :  { %2070 = vmatpush1.msra.mxu0 %v2032_v24  ;;  %v2516_v24 = vld [vmem:[#allocation5 + $0x500] sm:$0xff] }
0x27ab   :  { %2071 = vmatprep.subr.mxu0 %v2029_v50  ;;  %v2513_v50 = vld [vmem:[#allocation5 + $0x4e8] sm:$0xff] }
0x27ac   :  { %2072 = vmatpush1.msra.mxu0 %v2028_v52  ;;  %v2512_v52 = vld [vmem:[#allocation5 + $0x4e0] sm:$0xff] }
0x27ad   :  { %2073 = vmatprep.subr.mxu0 %v2025_v58  ;;  %v2509_v58 = vld [vmem:[#allocation5 + $0x4c8] sm:$0xff] }
0x27ae   :  { %2074 = vmatpush1.msra.mxu0 %v2024_v41  ;;  %v2508_v41 = vld [vmem:[#allocation5 + $0x4c0] sm:$0xff] }
0x27af   :  { %2212 = vmatprep.subr.mxu0 %v2020_v63  ;;  %v2505_v63 = vld [vmem:[#allocation5 + $0x4a8] sm:$0xff] }
0x2817   :  { %v1985_v42 = vpop.permute.xlu0 %1984 }
0x2818   :  { %v1987_v11 = vmul.f32 %v1985_v42, %v1969_v35  ;;  %v2400_v35 = vld [vmem:[#allocation5 + $0x160] sm:$0xff] }
0x2819   :  { %v2504_v42 = vld [vmem:[#allocation5 + $0x4a0] sm:$0xff] }
0x281a   :  { %1989 = vrot.lane.b32.xlu1 %v1987_v11, %s3877_s2  ;;  %v2373_v11 = vld [vmem:[#allocation5 + $0x88] sm:$0xff] }
0x281b   :  { %v1038_v61 = vpop.permute.xlu0 %1037 }
0x281c   :  { %1040 = vst.msk [vmem:[#allocation11] sm:$0xf] %vm1034_vm3, %v1038_v61 }
0x281d   :  { %1043 = vst.msk [vmem:[#allocation14 - $0x4] sm:$0xf0] %vm1041_vm4, %v1038_v61  ;;  %v2501_v61 = vld [vmem:[#allocation5 + $0x488] sm:$0xff] }
0x281e   :  { %1995 = vrot.lane.b32.xlu1 %v1981_v40, %s3881_s6  ;;  %v2524_v40 = vld [vmem:[#allocation5 + $0x540] sm:$0xff] }
0x288c   :  { %v1990_v43 = vpop.permute.xlu1 %1989 }
0x288d   :  { %1993 = vst.msk [vmem:[#allocation9 + $0x4] sm:$0xf] %vm1034_vm3, %v1990_v43  ;;  %2004 = vst.msk [vmem:[#allocation3 + $0x4] sm:$0xf] %vm1034_vm3, %v1990_v43 }
0x288e   :  { %2001 = vst.msk [vmem:[#allocation12] sm:$0xf0] %vm1041_vm4, %v1990_v43  ;;  %2005 = vst.msk [vmem:[#allocation4] sm:$0xf0] %vm1041_vm4, %v1990_v43  ;;  %v2372_v43 = vld [vmem:[#allocation5 + $0x80] sm:$0xff] }
0x2890   :  { %v1996_v3 = vpop.permute.xlu1 %1995 }
0x2891   :  { %1999 = vst.msk [vmem:[#allocation11 + $0x4] sm:$0xf] %vm1034_vm3, %v1996_v3 }
0x2892   :  { %2003 = vst.msk [vmem:[#allocation14] sm:$0xf0] %vm1041_vm4, %v1996_v3  ;;  %v2500_v3 = vld [vmem:[#allocation5 + $0x480] sm:$0xff] }
0x2894   :  { %v2006_v19 = vld [vmem:[#allocation3] sm:$0xff] }
0x2895   :  { %v2023_v5 = vld [vmem:[#allocation4] sm:$0xff] }
0x2896   :  { %3249 = vmatmul.mubr.msk.f32.vlgmr.msra.gmra.mxu0 %vm228_vm2, %v2023_v5  ;;  %3250 = vmatmul.mubr.msk.f32.vlgmr.msra.gmra.mxu1 %vm228_vm2, %v2023_v5  ;;  %v2368_v5 = vld [vmem:[#allocation5 + $0x60] sm:$0xff] }
0x2897   :  { %2213 = vmatpush1.msra.mxu0 %v2019_v44  ;;  %2284 = vmatpush1.msra.mxu1 %v2021_v4  ;;  %v2369_v44 = vld [vmem:[#allocation5 + $0x68] sm:$0xff] }
0x2898   :  { %2214 = vmatprep.subr.mxu0 %v2016_v53  ;;  %2285 = vmatprep.subr.mxu1 %v2018_v7  ;;  %v2497_v4 = vld [vmem:[#allocation5 + $0x468] sm:$0xff]  ;;  %v2496_v53 = vld [vmem:[#allocation5 + $0x460] sm:$0xff] }
0x2899   :  { %2215 = vmatpush1.msra.mxu0 %v2015_v6  ;;  %2286 = vmatpush1.msra.mxu1 %v2017_v9  ;;  %v2365_v7 = vld [vmem:[#allocation5 + $0x48] sm:$0xff]  ;;  %v2364_v9 = vld [vmem:[#allocation5 + $0x40] sm:$0xff] }
0x289a   :  { %2216 = vmatprep.subr.mxu0 %v2012_v10  ;;  %2287 = vmatprep.subr.mxu1 %v2014_v8  ;;  %v2493_v6 = vld [vmem:[#allocation5 + $0x448] sm:$0xff]  ;;  %v2492_v10 = vld [vmem:[#allocation5 + $0x440] sm:$0xff] }
0x289b   :  { %2217 = vmatpush1.msra.mxu0 %v2011_v12  ;;  %2288 = vmatpush1.msra.mxu1 %v2013_v13  ;;  %v2361_v8 = vld [vmem:[#allocation5 + $0x28] sm:$0xff]  ;;  %v2360_v13 = vld [vmem:[#allocation5 + $0x20] sm:$0xff] }
0x289c   :  { %2218 = vmatprep.subr.mxu0 %v2008_v59  ;;  %2289 = vmatprep.subr.mxu1 %v2010_v14  ;;  %v2489_v12 = vld [vmem:[#allocation5 + $0x428] sm:$0xff]  ;;  %v2488_v59 = vld [vmem:[#allocation5 + $0x420] sm:$0xff] }
0x289d   :  { %2219 = vmatpush1.msra.mxu0 %v2007_v15  ;;  %2252 = vmatprep.mubr.f32.mxu0 %v3878_v0  ;;  %v2357_v14 = vld [vmem:[#allocation5 + $0x8] sm:$0xff] }
0x289e   :  { %2290 = vmatpush1.msra.mxu1 %v2009_v16  ;;  %2323 = vmatprep.mubr.f32.mxu1 %v3878_v0  ;;  %v2408_v0 = vld [vmem:[#allocation5 + $0x1a0] sm:$0xff]  ;;  %v2485_v15 = vld [vmem:[#allocation5 + $0x408] sm:$0xff] }
0x289f   :  { %3251 = vmatmul.mubr.msk.f32.vlgmr.msra.gmra.mxu0 %vm228_vm2, %v2006_v19  ;;  %3252 = vmatmul.mubr.msk.f32.vlgmr.msra.gmra.mxu1 %vm228_vm2, %v2006_v19  ;;  %v2356_v16 = vld [vmem:[#allocation5] sm:$0xff]  ;;  %v2609_v19 = vld [vmem:[#allocation5 + $0x7e8] sm:$0xff] }
0x28a0   :  { %2634 = vmatprep.subr.mxu0 %v2417_v17  ;;  %2705 = vmatprep.subr.mxu1 %v2545_v18  ;;  %v2484_v17 = vld [vmem:[#allocation5 + $0x400] sm:$0xff]  ;;  %v2481_v18 = vld [vmem:[#allocation5 + $0x3e8] sm:$0xff] }
0x28a1   :  { %2635 = vmatpush1.msra.mxu0 %v2416_v20  ;;  %2706 = vmatpush1.msra.mxu1 %v2544_v21  ;;  %v2480_v20 = vld [vmem:[#allocation5 + $0x3e0] sm:$0xff] }
0x28a2   :  { %2636 = vmatprep.subr.mxu0 %v2413_v22  ;;  %2707 = vmatprep.subr.mxu1 %v2541_v56  ;;  %v2608_v21 = vld [vmem:[#allocation5 + $0x7e0] sm:$0xff]  ;;  %v2477_v22 = vld [vmem:[#allocation5 + $0x3c8] sm:$0xff] }
0x28a3   :  { %2637 = vmatpush1.msra.mxu0 %v2412_v23  ;;  %2708 = vmatpush1.msra.mxu1 %v2540_v25  ;;  %v2605_v56 = vld [vmem:[#allocation5 + $0x7c8] sm:$0xff]  ;;  %v2476_v23 = vld [vmem:[#allocation5 + $0x3c0] sm:$0xff] }
0x28a4   :  { %2638 = vmatprep.subr.mxu0 %v2409_v26  ;;  %2709 = vmatprep.subr.mxu1 %v2537_v27  ;;  %v2604_v25 = vld [vmem:[#allocation5 + $0x7c0] sm:$0xff]  ;;  %v2473_v26 = vld [vmem:[#allocation5 + $0x3a8] sm:$0xff] }
0x28a5   :  { %2639 = vmatpush1.msra.mxu0 %v2408_v0  ;;  %2710 = vmatpush1.msra.mxu1 %v2536_v28  ;;  %v2601_v27 = vld [vmem:[#allocation5 + $0x7a8] sm:$0xff]  ;;  %v2472_v0 = vld [vmem:[#allocation5 + $0x3a0] sm:$0xff] }
0x28a6   :  { %2640 = vmatprep.subr.mxu0 %v2405_v29  ;;  %2711 = vmatprep.subr.mxu1 %v2533_v30  ;;  %v2600_v28 = vld [vmem:[#allocation5 + $0x7a0] sm:$0xff]  ;;  %v2469_v29 = vld [vmem:[#allocation5 + $0x388] sm:$0xff] }
0x28a7   :  { %2641 = vmatpush1.msra.mxu0 %v2404_v31  ;;  %2712 = vmatpush1.msra.mxu1 %v2532_v32  ;;  %v2597_v30 = vld [vmem:[#allocation5 + $0x788] sm:$0xff]  ;;  %v2468_v31 = vld [vmem:[#allocation5 + $0x380] sm:$0xff] }
0x28a8   :  { %2642 = vmatprep.subr.mxu0 %v2401_v33  ;;  %2713 = vmatprep.subr.mxu1 %v2529_v34  ;;  %v2596_v32 = vld [vmem:[#allocation5 + $0x780] sm:$0xff]  ;;  %v2465_v33 = vld [vmem:[#allocation5 + $0x368] sm:$0xff] }
0x28a9   :  { %2643 = vmatpush1.msra.mxu0 %v2400_v35  ;;  %2714 = vmatpush1.msra.mxu1 %v2528_v36  ;;  %v2593_v34 = vld [vmem:[#allocation5 + $0x768] sm:$0xff]  ;;  %v2464_v35 = vld [vmem:[#allocation5 + $0x360] sm:$0xff] }
0x28aa   :  { %2644 = vmatprep.subr.mxu0 %v2397_v37  ;;  %2715 = vmatprep.subr.mxu1 %v2525_v38  ;;  %v2592_v36 = vld [vmem:[#allocation5 + $0x760] sm:$0xff]  ;;  %v2461_v37 = vld [vmem:[#allocation5 + $0x348] sm:$0xff] }
0x28ab   :  { %2645 = vmatpush1.msra.mxu0 %v2396_v39  ;;  %2716 = vmatpush1.msra.mxu1 %v2524_v40  ;;  %v2589_v38 = vld [vmem:[#allocation5 + $0x748] sm:$0xff]  ;;  %v2460_v39 = vld [vmem:[#allocation5 + $0x340] sm:$0xff] }
0x28ac   :  { %2646 = vmatprep.subr.mxu0 %v2393_v57  ;;  %2717 = vmatprep.subr.mxu1 %v2521_v55  ;;  %v2588_v40 = vld [vmem:[#allocation5 + $0x740] sm:$0xff]  ;;  %v2457_v57 = vld [vmem:[#allocation5 + $0x328] sm:$0xff] }
0x28ad   :  { %2647 = vmatpush1.msra.mxu0 %v2392_v62  ;;  %2718 = vmatpush1.msra.mxu1 %v2520_v45  ;;  %v2585_v55 = vld [vmem:[#allocation5 + $0x728] sm:$0xff]  ;;  %v2456_v62 = vld [vmem:[#allocation5 + $0x320] sm:$0xff] }
0x28ae   :  { %2648 = vmatprep.subr.mxu0 %v2389_v46  ;;  %2719 = vmatprep.subr.mxu1 %v2517_v47  ;;  %v2584_v45 = vld [vmem:[#allocation5 + $0x720] sm:$0xff]  ;;  %v2453_v46 = vld [vmem:[#allocation5 + $0x308] sm:$0xff] }
0x28af   :  { %2649 = vmatpush1.msra.mxu0 %v2388_v48  ;;  %2720 = vmatpush1.msra.mxu1 %v2516_v24  ;;  %v2581_v47 = vld [vmem:[#allocation5 + $0x708] sm:$0xff]  ;;  %v2452_v48 = vld [vmem:[#allocation5 + $0x300] sm:$0xff] }
0x28b0   :  { %2650 = vmatprep.subr.mxu0 %v2385_v49  ;;  %2721 = vmatprep.subr.mxu1 %v2513_v50  ;;  %v2580_v24 = vld [vmem:[#allocation5 + $0x700] sm:$0xff]  ;;  %v2449_v49 = vld [vmem:[#allocation5 + $0x2e8] sm:$0xff] }
0x28b1   :  { %2651 = vmatpush1.msra.mxu0 %v2384_v51  ;;  %2722 = vmatpush1.msra.mxu1 %v2512_v52  ;;  %v2577_v50 = vld [vmem:[#allocation5 + $0x6e8] sm:$0xff]  ;;  %v2448_v51 = vld [vmem:[#allocation5 + $0x2e0] sm:$0xff] }
0x28b2   :  { %2652 = vmatprep.subr.mxu0 %v2381_v54  ;;  %2723 = vmatprep.subr.mxu1 %v2509_v58  ;;  %v2576_v52 = vld [vmem:[#allocation5 + $0x6e0] sm:$0xff]  ;;  %v2445_v54 = vld [vmem:[#allocation5 + $0x2c8] sm:$0xff] }
0x28b3   :  { %2653 = vmatpush1.msra.mxu0 %v2380_v2  ;;  %2724 = vmatpush1.msra.mxu1 %v2508_v41  ;;  %v2573_v58 = vld [vmem:[#allocation5 + $0x6c8] sm:$0xff]  ;;  %v2444_v2 = vld [vmem:[#allocation5 + $0x2c0] sm:$0xff] }
0x28b4   :  { %2654 = vmatprep.subr.mxu0 %v2377_v60  ;;  %2725 = vmatprep.subr.mxu1 %v2505_v63  ;;  %v2572_v41 = vld [vmem:[#allocation5 + $0x6c0] sm:$0xff]  ;;  %v2441_v60 = vld [vmem:[#allocation5 + $0x2a8] sm:$0xff] }
0x28b5   :  { %2655 = vmatpush1.msra.mxu0 %v2376_v1  ;;  %2726 = vmatpush1.msra.mxu1 %v2504_v42  ;;  %v2569_v63 = vld [vmem:[#allocation5 + $0x6a8] sm:$0xff]  ;;  %v2440_v1 = vld [vmem:[#allocation5 + $0x2a0] sm:$0xff] }
0x28b6   :  { %2656 = vmatprep.subr.mxu0 %v2373_v11  ;;  %2727 = vmatprep.subr.mxu1 %v2501_v61  ;;  %v2568_v42 = vld [vmem:[#allocation5 + $0x6a0] sm:$0xff]  ;;  %v2437_v11 = vld [vmem:[#allocation5 + $0x288] sm:$0xff] }
0x28b7   :  { %2657 = vmatpush1.msra.mxu0 %v2372_v43  ;;  %2728 = vmatpush1.msra.mxu1 %v2500_v3  ;;  %v2565_v61 = vld [vmem:[#allocation5 + $0x688] sm:$0xff]  ;;  %v2436_v43 = vld [vmem:[#allocation5 + $0x280] sm:$0xff] }
0x28b8   :  { %2658 = vmatprep.subr.mxu0 %v2369_v44  ;;  %2729 = vmatprep.subr.mxu1 %v2497_v4  ;;  %v2564_v3 = vld [vmem:[#allocation5 + $0x680] sm:$0xff]  ;;  %v2433_v44 = vld [vmem:[#allocation5 + $0x268] sm:$0xff] }
0x28b9   :  { %2659 = vmatpush1.msra.mxu0 %v2368_v5  ;;  %2730 = vmatpush1.msra.mxu1 %v2496_v53  ;;  %v2561_v4 = vld [vmem:[#allocation5 + $0x668] sm:$0xff]  ;;  %v2432_v5 = vld [vmem:[#allocation5 + $0x260] sm:$0xff] }
0x28ba   :  { %2660 = vmatprep.subr.mxu0 %v2365_v7  ;;  %2731 = vmatprep.subr.mxu1 %v2493_v6  ;;  %v2560_v53 = vld [vmem:[#allocation5 + $0x660] sm:$0xff]  ;;  %v2429_v7 = vld [vmem:[#allocation5 + $0x248] sm:$0xff] }
0x28bb   :  { %2661 = vmatpush1.msra.mxu0 %v2364_v9  ;;  %2732 = vmatpush1.msra.mxu1 %v2492_v10  ;;  %v2557_v6 = vld [vmem:[#allocation5 + $0x648] sm:$0xff]  ;;  %v2428_v9 = vld [vmem:[#allocation5 + $0x240] sm:$0xff] }
0x28bc   :  { %2662 = vmatprep.subr.mxu0 %v2361_v8  ;;  %2733 = vmatprep.subr.mxu1 %v2489_v12  ;;  %v2556_v10 = vld [vmem:[#allocation5 + $0x640] sm:$0xff]  ;;  %v2425_v8 = vld [vmem:[#allocation5 + $0x228] sm:$0xff] }
0x28bd   :  { %2663 = vmatpush1.msra.mxu0 %v2360_v13  ;;  %2734 = vmatpush1.msra.mxu1 %v2488_v59  ;;  %v2553_v12 = vld [vmem:[#allocation5 + $0x628] sm:$0xff]  ;;  %v2424_v13 = vld [vmem:[#allocation5 + $0x220] sm:$0xff] }
0x28be   :  { %2664 = vmatprep.subr.mxu0 %v2357_v14  ;;  %2735 = vmatprep.subr.mxu1 %v2485_v15  ;;  %v2552_v59 = vld [vmem:[#allocation5 + $0x620] sm:$0xff]  ;;  %v2421_v14 = vld [vmem:[#allocation5 + $0x208] sm:$0xff] }
0x28bf   :  { %2665 = vmatpush1.msra.mxu0 %v2356_v16  ;;  %2736 = vmatpush1.msra.mxu1 %v2484_v17  ;;  %v2549_v15 = vld [vmem:[#allocation5 + $0x608] sm:$0xff]  ;;  %v2420_v16 = vld [vmem:[#allocation5 + $0x200] sm:$0xff] }
0x28c0   :  { %2666 = vmatprep.subr.mxu0 %v2481_v18  ;;  %2737 = vmatprep.subr.mxu1 %v2609_v19  ;;  %v2548_v17 = vld [vmem:[#allocation5 + $0x600] sm:$0xff]  ;;  %v2419_v18 = vld [vmem:[#allocation5 + $0x1f8] sm:$0xff] }
0x28c1   :  { %2667 = vmatpush2.msra.mxu0 %v2480_v20  ;;  %2738 = vmatpush2.msra.mxu1 %v2608_v21  ;;  %v2547_v19 = vld [vmem:[#allocation5 + $0x5f8] sm:$0xff]  ;;  %v2332_v20 = vlaneseq }
0x28c2   :  { %2668 = vmatprep.subr.mxu0 %v2477_v22  ;;  %2739 = vmatprep.subr.mxu1 %v2605_v56 }
0x28c3   :  { %2669 = vmatpush2.msra.mxu0 %v2476_v23  ;;  %2740 = vmatpush2.msra.mxu1 %v2604_v25  ;;  %v4537_v56 = vshrl.u32 %v2332_v20, 7  ;;  %v2510_v20 = vld [vmem:[#allocation5 + $0x4d0] sm:$0xff] }
0x28c4   :  { %2670 = vmatprep.subr.mxu0 %v2473_v26  ;;  %2741 = vmatprep.subr.mxu1 %v2601_v27 }
0x28c5   :  { %2671 = vmatpush2.msra.mxu0 %v2472_v0  ;;  %2742 = vmatpush2.msra.mxu1 %v2600_v28  ;;  %v2338_v23 = vsub.s32 1, %v4537_v56  ;;  %v2346_v25 = vsub.s32 3, %v4537_v56  ;;  %v2334_v0 = vsub.s32 0, %v4537_v56  ;;  %v2342_v28 = vsub.s32 2, %v4537_v56 }
0x28c6   :  { %2672 = vmatprep.subr.mxu0 %v2469_v29  ;;  %2743 = vmatprep.subr.mxu1 %v2597_v30  ;;  %v2330_v29 = vld [vmem:[%s4809_s11] sm:$0xf] }
0x28c7   :  { %2673 = vmatpush2.msra.mxu0 %v2468_v31  ;;  %2744 = vmatpush2.msra.mxu1 %v2596_v32  ;;  %v2339_v32 = vrot.slane %v2330_v29, %v2338_v23 }
0x28c8   :  { %2674 = vmatprep.subr.mxu0 %v2465_v33  ;;  %2745 = vmatprep.subr.mxu1 %v2593_v34  ;;  %v2347_v33 = vrot.slane %v2330_v29, %v2346_v25 }
0x28c9   :  { %2675 = vmatpush2.msra.mxu0 %v2464_v35  ;;  %2746 = vmatpush2.msra.mxu1 %v2592_v36  ;;  %v2335_v35 = vrot.slane %v2330_v29, %v2334_v0 }
0x28ca   :  { %2676 = vmatprep.subr.mxu0 %v2461_v37  ;;  %2747 = vmatprep.subr.mxu1 %v2589_v38  ;;  %v2343_v37 = vrot.slane %v2330_v29, %v2342_v28  ;;  %v2375_v29 = vld [vmem:[#allocation5 + $0x98] sm:$0xff] }
0x28cb   :  { %2677 = vmatpush2.msra.mxu0 %v2460_v39  ;;  %2748 = vmatpush2.msra.mxu1 %v2588_v40 }
0x28cc   :  { %2678 = vmatprep.subr.mxu0 %v2457_v57  ;;  %2749 = vmatprep.subr.mxu1 %v2585_v55 }
0x28cd   :  { %2679 = vmatpush2.msra.mxu0 %v2456_v62  ;;  %2750 = vmatpush2.msra.mxu1 %v2584_v45 }
0x28ce   :  { %2680 = vmatprep.subr.mxu0 %v2453_v46  ;;  %2751 = vmatprep.subr.mxu1 %v2581_v47  ;;  %v2418_v47 = vld [vmem:[#allocation5 + $0x1f0] sm:$0xff] }
0x28cf   :  { %2681 = vmatpush2.msra.mxu0 %v2452_v48  ;;  %2752 = vmatpush2.msra.mxu1 %v2580_v24  ;;  %v2546_v48 = vld [vmem:[#allocation5 + $0x5f0] sm:$0xff]  ;;  %v2415_v24 = vld [vmem:[#allocation5 + $0x1d8] sm:$0xff] }
0x28d0   :  { %2682 = vmatprep.subr.mxu0 %v2449_v49  ;;  %2753 = vmatprep.subr.mxu1 %v2577_v50  ;;  %v2543_v49 = vld [vmem:[#allocation5 + $0x5d8] sm:$0xff]  ;;  %v2414_v50 = vld [vmem:[#allocation5 + $0x1d0] sm:$0xff] }
0x28d1   :  { %2683 = vmatpush2.msra.mxu0 %v2448_v51  ;;  %2754 = vmatpush2.msra.mxu1 %v2576_v52  ;;  %v2542_v51 = vld [vmem:[#allocation5 + $0x5d0] sm:$0xff]  ;;  %v2411_v52 = vld [vmem:[#allocation5 + $0x1b8] sm:$0xff] }
0x28d2   :  { %2684 = vmatprep.subr.mxu0 %v2445_v54  ;;  %2755 = vmatprep.subr.mxu1 %v2573_v58  ;;  %v2539_v54 = vld [vmem:[#allocation5 + $0x5b8] sm:$0xff]  ;;  %v2410_v58 = vld [vmem:[#allocation5 + $0x1b0] sm:$0xff] }
0x28d3   :  { %2685 = vmatpush2.msra.mxu0 %v2444_v2  ;;  %2756 = vmatpush2.msra.mxu1 %v2572_v41  ;;  %v2538_v2 = vld [vmem:[#allocation5 + $0x5b0] sm:$0xff]  ;;  %v2407_v41 = vld [vmem:[#allocation5 + $0x198] sm:$0xff] }
0x28d4   :  { %2686 = vmatprep.subr.mxu0 %v2441_v60  ;;  %2757 = vmatprep.subr.mxu1 %v2569_v63  ;;  %v2535_v60 = vld [vmem:[#allocation5 + $0x598] sm:$0xff]  ;;  %v2406_v63 = vld [vmem:[#allocation5 + $0x190] sm:$0xff] }
0x28d5   :  { %2687 = vmatpush2.msra.mxu0 %v2440_v1  ;;  %2758 = vmatpush2.msra.mxu1 %v2568_v42  ;;  %v2534_v1 = vld [vmem:[#allocation5 + $0x590] sm:$0xff]  ;;  %v2403_v42 = vld [vmem:[#allocation5 + $0x178] sm:$0xff] }
0x28d6   :  { %2688 = vmatprep.subr.mxu0 %v2437_v11  ;;  %2759 = vmatprep.subr.mxu1 %v2565_v61  ;;  %v2531_v11 = vld [vmem:[#allocation5 + $0x578] sm:$0xff]  ;;  %v2402_v61 = vld [vmem:[#allocation5 + $0x170] sm:$0xff] }
0x28d7   :  { %2689 = vmatpush2.msra.mxu0 %v2436_v43  ;;  %2760 = vmatpush2.msra.mxu1 %v2564_v3  ;;  %v2530_v43 = vld [vmem:[#allocation5 + $0x570] sm:$0xff]  ;;  %v2399_v3 = vld [vmem:[#allocation5 + $0x158] sm:$0xff] }
0x28d8   :  { %2690 = vmatprep.subr.mxu0 %v2433_v44  ;;  %2761 = vmatprep.subr.mxu1 %v2561_v4  ;;  %v2527_v44 = vld [vmem:[#allocation5 + $0x558] sm:$0xff]  ;;  %v2398_v4 = vld [vmem:[#allocation5 + $0x150] sm:$0xff] }
0x28d9   :  { %2691 = vmatpush2.msra.mxu0 %v2432_v5  ;;  %2762 = vmatpush2.msra.mxu1 %v2560_v53  ;;  %v2526_v5 = vld [vmem:[#allocation5 + $0x550] sm:$0xff]  ;;  %v2395_v53 = vld [vmem:[#allocation5 + $0x138] sm:$0xff] }
0x28da   :  { %2692 = vmatprep.subr.mxu0 %v2429_v7  ;;  %2763 = vmatprep.subr.mxu1 %v2557_v6  ;;  %v2523_v7 = vld [vmem:[#allocation5 + $0x538] sm:$0xff]  ;;  %v2394_v6 = vld [vmem:[#allocation5 + $0x130] sm:$0xff] }
0x28db   :  { %2693 = vmatpush2.msra.mxu0 %v2428_v9  ;;  %2764 = vmatpush2.msra.mxu1 %v2556_v10  ;;  %v2522_v9 = vld [vmem:[#allocation5 + $0x530] sm:$0xff]  ;;  %v2391_v10 = vld [vmem:[#allocation5 + $0x118] sm:$0xff] }
0x28dc   :  { %2694 = vmatprep.subr.mxu0 %v2425_v8  ;;  %2765 = vmatprep.subr.mxu1 %v2553_v12  ;;  %v2519_v8 = vld [vmem:[#allocation5 + $0x518] sm:$0xff]  ;;  %v2390_v12 = vld [vmem:[#allocation5 + $0x110] sm:$0xff] }
0x28dd   :  { %2695 = vmatpush2.msra.mxu0 %v2424_v13  ;;  %2766 = vmatpush2.msra.mxu1 %v2552_v59  ;;  %v2518_v13 = vld [vmem:[#allocation5 + $0x510] sm:$0xff]  ;;  %v2387_v59 = vld [vmem:[#allocation5 + $0xf8] sm:$0xff] }
0x28de   :  { %2696 = vmatprep.subr.mxu0 %v2421_v14  ;;  %2767 = vmatprep.subr.mxu1 %v2549_v15  ;;  %v2515_v14 = vld [vmem:[#allocation5 + $0x4f8] sm:$0xff]  ;;  %v2386_v15 = vld [vmem:[#allocation5 + $0xf0] sm:$0xff] }
0x28df   :  { %2697 = vmatpush2.msra.mxu0 %v2420_v16  ;;  %2768 = vmatpush2.msra.mxu1 %v2548_v17  ;;  %v2514_v16 = vld [vmem:[#allocation5 + $0x4f0] sm:$0xff]  ;;  %v2383_v17 = vld [vmem:[#allocation5 + $0xd8] sm:$0xff] }
0x28e0   :  { %2776 = vmatprep.subr.mxu0 %v2419_v18  ;;  %2847 = vmatprep.subr.mxu1 %v2547_v19  ;;  %v2511_v18 = vld [vmem:[#allocation5 + $0x4d8] sm:$0xff]  ;;  %v2382_v19 = vld [vmem:[#allocation5 + $0xd0] sm:$0xff] }
0x2956   :  { %v2109_v21 = vpop.f32.mrf.mxu0  ;;  %v2180_v22 = vpop.f32.mrf.mxu1 }
0x2958   :  { %v2111_v26 = vpop.f32.mrf.mxu0  ;;  %v2182_v27 = vpop.f32.mrf.mxu1 }
0x295f   :  { %v2254_v30 = vpop.f32.mrf.mxu0  ;;  %v2325_v31 = vpop.f32.mrf.mxu1 }
0x2960   :  { %v2255_v34 = vadd.f32 %v2254_v30, %v2109_v21  ;;  %v2326_v36 = vadd.f32 %v2325_v31, %v2180_v22  ;;  %v2379_v21 = vld [vmem:[#allocation5 + $0xb8] sm:$0xff]  ;;  %v2374_v31 = vld [vmem:[#allocation5 + $0x90] sm:$0xff] }
0x2961   :  { %v2256_v38 = vpop.f32.mrf.mxu0  ;;  %v2327_v39 = vpop.f32.mrf.mxu1  ;;  %v2507_v22 = vld [vmem:[#allocation5 + $0x4b8] sm:$0xff] }
0x2962   :  { %v2257_v40 = vadd.f32 %v2256_v38, %v2111_v26  ;;  %v2328_v57 = vadd.f32 %v2327_v39, %v2182_v27  ;;  %v4554_v45 = vadd.f32 %v2335_v35, %v2255_v34  ;;  %v4556_v46 = vadd.f32 %v2343_v37, %v2326_v36  ;;  %v2378_v26 = vld [vmem:[#allocation5 + $0xb0] sm:$0xff]  ;;  %v2503_v30 = vld [vmem:[#allocation5 + $0x498] sm:$0xff] }
0x2963   :  { %v2506_v27 = vld [vmem:[#allocation5 + $0x4b0] sm:$0xff]  ;;  %v2499_v34 = vld [vmem:[#allocation5 + $0x478] sm:$0xff] }
0x2964   :  { %v2353_v55 = vadd.f32 %v2339_v32, %v2257_v40  ;;  %v2355_v62 = vadd.f32 %v2347_v33, %v2328_v57  ;;  %v2502_v32 = vld [vmem:[#allocation5 + $0x490] sm:$0xff]  ;;  %v2371_v33 = vld [vmem:[#allocation5 + $0x78] sm:$0xff] }
0x2965   :  { %v2370_v35 = vld [vmem:[#allocation5 + $0x70] sm:$0xff]  ;;  %v2367_v37 = vld [vmem:[#allocation5 + $0x58] sm:$0xff] }
0x2966   :  { %2698 = vmatprep.mubr.f32.mxu0 %v2353_v55  ;;  %2769 = vmatprep.mubr.f32.mxu1 %v2355_v62  ;;  %v2498_v36 = vld [vmem:[#allocation5 + $0x470] sm:$0xff]  ;;  %v2495_v38 = vld [vmem:[#allocation5 + $0x458] sm:$0xff] }
0x2967   :  { %2699 = vmatmul.mubr.f32.vlgmr.msra.gmra.mxu0 %v4554_v45  ;;  %2770 = vmatmul.mubr.f32.vlgmr.msra.gmra.mxu1 %v4556_v46  ;;  %v2366_v39 = vld [vmem:[#allocation5 + $0x50] sm:$0xff]  ;;  %v2363_v57 = vld [vmem:[#allocation5 + $0x38] sm:$0xff] }
0x2968   :  { %2777 = vmatpush1.msra.mxu0 %v2418_v47  ;;  %2848 = vmatpush1.msra.mxu1 %v2546_v48  ;;  %v2494_v40 = vld [vmem:[#allocation5 + $0x450] sm:$0xff]  ;;  %v2359_v48 = vld [vmem:[#allocation5 + $0x18] sm:$0xff] }
0x2969   :  { %2778 = vmatprep.subr.mxu0 %v2415_v24  ;;  %2840 = vmatprep.mubr.f32.mxu0 %v2353_v55  ;;  %v2491_v55 = vld [vmem:[#allocation5 + $0x438] sm:$0xff]  ;;  %v2490_v47 = vld [vmem:[#allocation5 + $0x430] sm:$0xff] }
0x296a   :  { %2849 = vmatprep.subr.mxu1 %v2543_v49  ;;  %2911 = vmatprep.mubr.f32.mxu1 %v2355_v62  ;;  %v2362_v62 = vld [vmem:[#allocation5 + $0x30] sm:$0xff]  ;;  %v2487_v24 = vld [vmem:[#allocation5 + $0x418] sm:$0xff] }
0x296b   :  { %2779 = vmatpush1.msra.mxu0 %v2414_v50  ;;  %2850 = vmatpush1.msra.mxu1 %v2542_v51  ;;  %v2358_v49 = vld [vmem:[#allocation5 + $0x10] sm:$0xff]  ;;  %v2483_v51 = vld [vmem:[#allocation5 + $0x3f8] sm:$0xff] }
0x296c   :  { %2780 = vmatprep.subr.mxu0 %v2411_v52  ;;  %2851 = vmatprep.subr.mxu1 %v2539_v54  ;;  %v2486_v50 = vld [vmem:[#allocation5 + $0x410] sm:$0xff]  ;;  %v2611_v52 = vld [vmem:[#allocation5 + $0x7f8] sm:$0xff] }
0x296d   :  { %2781 = vmatpush1.msra.mxu0 %v2410_v58  ;;  %2852 = vmatpush1.msra.mxu1 %v2538_v2  ;;  %v2482_v54 = vld [vmem:[#allocation5 + $0x3f0] sm:$0xff]  ;;  %v2479_v2 = vld [vmem:[#allocation5 + $0x3d8] sm:$0xff] }
0x296e   :  { %2782 = vmatprep.subr.mxu0 %v2407_v41  ;;  %2853 = vmatprep.subr.mxu1 %v2535_v60  ;;  %v2610_v58 = vld [vmem:[#allocation5 + $0x7f0] sm:$0xff]  ;;  %v2607_v41 = vld [vmem:[#allocation5 + $0x7d8] sm:$0xff] }
0x296f   :  { %2783 = vmatpush1.msra.mxu0 %v2406_v63  ;;  %2854 = vmatpush1.msra.mxu1 %v2534_v1  ;;  %v2478_v60 = vld [vmem:[#allocation5 + $0x3d0] sm:$0xff]  ;;  %v2475_v1 = vld [vmem:[#allocation5 + $0x3b8] sm:$0xff] }
0x2970   :  { %2784 = vmatprep.subr.mxu0 %v2403_v42  ;;  %2855 = vmatprep.subr.mxu1 %v2531_v11  ;;  %v2606_v63 = vld [vmem:[#allocation5 + $0x7d0] sm:$0xff]  ;;  %v2603_v42 = vld [vmem:[#allocation5 + $0x7b8] sm:$0xff] }
0x2971   :  { %2785 = vmatpush1.msra.mxu0 %v2402_v61  ;;  %2856 = vmatpush1.msra.mxu1 %v2530_v43  ;;  %v2474_v11 = vld [vmem:[#allocation5 + $0x3b0] sm:$0xff]  ;;  %v2471_v43 = vld [vmem:[#allocation5 + $0x398] sm:$0xff] }
0x2972   :  { %2786 = vmatprep.subr.mxu0 %v2399_v3  ;;  %2857 = vmatprep.subr.mxu1 %v2527_v44  ;;  %v2602_v61 = vld [vmem:[#allocation5 + $0x7b0] sm:$0xff]  ;;  %v2599_v3 = vld [vmem:[#allocation5 + $0x798] sm:$0xff] }
0x2973   :  { %2787 = vmatpush1.msra.mxu0 %v2398_v4  ;;  %2858 = vmatpush1.msra.mxu1 %v2526_v5  ;;  %v2470_v44 = vld [vmem:[#allocation5 + $0x390] sm:$0xff]  ;;  %v2467_v5 = vld [vmem:[#allocation5 + $0x378] sm:$0xff] }
0x2974   :  { %2788 = vmatprep.subr.mxu0 %v2395_v53  ;;  %2859 = vmatprep.subr.mxu1 %v2523_v7  ;;  %v2598_v4 = vld [vmem:[#allocation5 + $0x790] sm:$0xff]  ;;  %v2595_v53 = vld [vmem:[#allocation5 + $0x778] sm:$0xff] }
0x2975   :  { %2789 = vmatpush1.msra.mxu0 %v2394_v6  ;;  %2860 = vmatpush1.msra.mxu1 %v2522_v9  ;;  %v2466_v7 = vld [vmem:[#allocation5 + $0x370] sm:$0xff]  ;;  %v2463_v9 = vld [vmem:[#allocation5 + $0x358] sm:$0xff] }
0x2976   :  { %2790 = vmatprep.subr.mxu0 %v2391_v10  ;;  %2861 = vmatprep.subr.mxu1 %v2519_v8  ;;  %v2594_v6 = vld [vmem:[#allocation5 + $0x770] sm:$0xff]  ;;  %v2591_v10 = vld [vmem:[#allocation5 + $0x758] sm:$0xff] }
0x2977   :  { %2791 = vmatpush1.msra.mxu0 %v2390_v12  ;;  %2862 = vmatpush1.msra.mxu1 %v2518_v13  ;;  %v2462_v8 = vld [vmem:[#allocation5 + $0x350] sm:$0xff]  ;;  %v2459_v13 = vld [vmem:[#allocation5 + $0x338] sm:$0xff] }
0x2978   :  { %2792 = vmatprep.subr.mxu0 %v2387_v59  ;;  %2863 = vmatprep.subr.mxu1 %v2515_v14  ;;  %v2590_v12 = vld [vmem:[#allocation5 + $0x750] sm:$0xff]  ;;  %v2587_v59 = vld [vmem:[#allocation5 + $0x738] sm:$0xff] }
0x2979   :  { %2793 = vmatpush1.msra.mxu0 %v2386_v15  ;;  %2864 = vmatpush1.msra.mxu1 %v2514_v16  ;;  %v2458_v14 = vld [vmem:[#allocation5 + $0x330] sm:$0xff]  ;;  %v2455_v16 = vld [vmem:[#allocation5 + $0x318] sm:$0xff] }
0x297a   :  { %2794 = vmatprep.subr.mxu0 %v2383_v17  ;;  %2865 = vmatprep.subr.mxu1 %v2511_v18  ;;  %v2586_v15 = vld [vmem:[#allocation5 + $0x730] sm:$0xff]  ;;  %v2583_v17 = vld [vmem:[#allocation5 + $0x718] sm:$0xff] }
0x297b   :  { %2795 = vmatpush1.msra.mxu0 %v2382_v19  ;;  %2866 = vmatpush1.msra.mxu1 %v2510_v20  ;;  %v2454_v18 = vld [vmem:[#allocation5 + $0x310] sm:$0xff]  ;;  %v2451_v20 = vld [vmem:[#allocation5 + $0x2f8] sm:$0xff] }
0x297c   :  { %2796 = vmatprep.subr.mxu0 %v2379_v21  ;;  %2867 = vmatprep.subr.mxu1 %v2507_v22  ;;  %v2582_v19 = vld [vmem:[#allocation5 + $0x710] sm:$0xff]  ;;  %v2579_v21 = vld [vmem:[#allocation5 + $0x6f8] sm:$0xff] }
0x297d   :  { %2797 = vmatpush1.msra.mxu0 %v2378_v26  ;;  %2868 = vmatpush1.msra.mxu1 %v2506_v27  ;;  %v2450_v22 = vld [vmem:[#allocation5 + $0x2f0] sm:$0xff]  ;;  %v2447_v27 = vld [vmem:[#allocation5 + $0x2d8] sm:$0xff] }
0x297e   :  { %2798 = vmatprep.subr.mxu0 %v2375_v29  ;;  %2869 = vmatprep.subr.mxu1 %v2503_v30  ;;  %v2578_v26 = vld [vmem:[#allocation5 + $0x6f0] sm:$0xff]  ;;  %v2575_v29 = vld [vmem:[#allocation5 + $0x6d8] sm:$0xff] }
0x297f   :  { %2799 = vmatpush1.msra.mxu0 %v2374_v31  ;;  %2870 = vmatpush1.msra.mxu1 %v2502_v32  ;;  %v2446_v30 = vld [vmem:[#allocation5 + $0x2d0] sm:$0xff]  ;;  %v2443_v32 = vld [vmem:[#allocation5 + $0x2b8] sm:$0xff] }
0x2980   :  { %2800 = vmatprep.subr.mxu0 %v2371_v33  ;;  %2871 = vmatprep.subr.mxu1 %v2499_v34  ;;  %v2574_v31 = vld [vmem:[#allocation5 + $0x6d0] sm:$0xff]  ;;  %v2571_v33 = vld [vmem:[#allocation5 + $0x6b8] sm:$0xff] }
0x2981   :  { %2801 = vmatpush1.msra.mxu0 %v2370_v35  ;;  %2872 = vmatpush1.msra.mxu1 %v2498_v36  ;;  %v2442_v34 = vld [vmem:[#allocation5 + $0x2b0] sm:$0xff]  ;;  %v2439_v36 = vld [vmem:[#allocation5 + $0x298] sm:$0xff] }
0x2982   :  { %2802 = vmatprep.subr.mxu0 %v2367_v37  ;;  %2873 = vmatprep.subr.mxu1 %v2495_v38  ;;  %v2570_v35 = vld [vmem:[#allocation5 + $0x6b0] sm:$0xff]  ;;  %v2567_v37 = vld [vmem:[#allocation5 + $0x698] sm:$0xff] }
0x2983   :  { %2803 = vmatpush1.msra.mxu0 %v2366_v39  ;;  %2874 = vmatpush1.msra.mxu1 %v2494_v40  ;;  %v2438_v38 = vld [vmem:[#allocation5 + $0x290] sm:$0xff]  ;;  %v2435_v40 = vld [vmem:[#allocation5 + $0x278] sm:$0xff] }
0x2984   :  { %2804 = vmatprep.subr.mxu0 %v2363_v57  ;;  %2875 = vmatprep.subr.mxu1 %v2491_v55  ;;  %v2566_v39 = vld [vmem:[#allocation5 + $0x690] sm:$0xff]  ;;  %v2563_v57 = vld [vmem:[#allocation5 + $0x678] sm:$0xff] }
0x2985   :  { %2805 = vmatpush1.msra.mxu0 %v2362_v62  ;;  %2876 = vmatpush1.msra.mxu1 %v2490_v47  ;;  %v2434_v55 = vld [vmem:[#allocation5 + $0x270] sm:$0xff]  ;;  %v2431_v47 = vld [vmem:[#allocation5 + $0x258] sm:$0xff] }
0x2986   :  { %2806 = vmatprep.subr.mxu0 %v2359_v48  ;;  %2877 = vmatprep.subr.mxu1 %v2487_v24  ;;  %v2562_v62 = vld [vmem:[#allocation5 + $0x670] sm:$0xff]  ;;  %v2559_v48 = vld [vmem:[#allocation5 + $0x658] sm:$0xff] }
0x2987   :  { %2807 = vmatpush1.msra.mxu0 %v2358_v49  ;;  %2878 = vmatpush1.msra.mxu1 %v2486_v50  ;;  %v2430_v24 = vld [vmem:[#allocation5 + $0x250] sm:$0xff]  ;;  %v2427_v50 = vld [vmem:[#allocation5 + $0x238] sm:$0xff] }
0x2988   :  { %2808 = vmatprep.subr.mxu0 %v2483_v51  ;;  %2879 = vmatprep.subr.mxu1 %v2611_v52  ;;  %v2558_v49 = vld [vmem:[#allocation5 + $0x650] sm:$0xff]  ;;  %v2555_v51 = vld [vmem:[#allocation5 + $0x638] sm:$0xff] }
0x2989   :  { %2809 = vmatpush2.msra.mxu0 %v2482_v54  ;;  %2880 = vmatpush2.msra.mxu1 %v2610_v58  ;;  %v2426_v52 = vld [vmem:[#allocation5 + $0x230] sm:$0xff]  ;;  %v2423_v58 = vld [vmem:[#allocation5 + $0x218] sm:$0xff] }
0x298a   :  { %2810 = vmatprep.subr.mxu0 %v2479_v2  ;;  %2881 = vmatprep.subr.mxu1 %v2607_v41  ;;  %v2554_v54 = vld [vmem:[#allocation5 + $0x630] sm:$0xff]  ;;  %v2551_v2 = vld [vmem:[#allocation5 + $0x618] sm:$0xff] }
0x298b   :  { %2811 = vmatpush2.msra.mxu0 %v2478_v60  ;;  %2882 = vmatpush2.msra.mxu1 %v2606_v63  ;;  %v2422_v41 = vld [vmem:[#allocation5 + $0x210] sm:$0xff]  ;;  %v2949_v63 = vld [vmem:[%s4812_s14 + $0xf8] sm:$0xff] }
0x298c   :  { %2812 = vmatprep.subr.mxu0 %v2475_v1  ;;  %2883 = vmatprep.subr.mxu1 %v2603_v42  ;;  %v2550_v60 = vld [vmem:[#allocation5 + $0x610] sm:$0xff]  ;;  %v2933_v1 = vld [vmem:[%s4812_s14 + $0x78] sm:$0xff]  ;;  %v2948_v42 = vld [vmem:[%s4812_s14 + $0xf0] sm:$0xff] }
0x298d   :  { %2813 = vmatpush2.msra.mxu0 %v2474_v11  ;;  %2884 = vmatpush2.msra.mxu1 %v2602_v61  ;;  %v2932_v11 = vld [vmem:[%s4812_s14 + $0x70] sm:$0xff]  ;;  %v2947_v61 = vld [vmem:[%s4812_s14 + $0xe8] sm:$0xff] }
0x298e   :  { %2814 = vmatprep.subr.mxu0 %v2471_v43  ;;  %2885 = vmatprep.subr.mxu1 %v2599_v3  ;;  %v2930_v43 = vld [vmem:[%s4812_s14 + $0x60] sm:$0xff]  ;;  %v2945_v3 = vld [vmem:[%s4812_s14 + $0xd8] sm:$0xff] }
0x298f   :  { %2815 = vmatpush2.msra.mxu0 %v2470_v44  ;;  %2886 = vmatpush2.msra.mxu1 %v2598_v4  ;;  %v2929_v44 = vld [vmem:[%s4812_s14 + $0x58] sm:$0xff] }
0x2990   :  { %2816 = vmatprep.subr.mxu0 %v2467_v5  ;;  %2887 = vmatprep.subr.mxu1 %v2595_v53  ;;  %v2981_v4 = vld [vmem:[%s4812_s14 + $0x1f8] sm:$0xff]  ;;  %v2980_v53 = vld [vmem:[%s4812_s14 + $0x1f0] sm:$0xff] }
0x2991   :  { %2817 = vmatpush2.msra.mxu0 %v2466_v7  ;;  %2888 = vmatpush2.msra.mxu1 %v2594_v6  ;;  %v2965_v5 = vld [vmem:[%s4812_s14 + $0x178] sm:$0xff]  ;;  %v2944_v7 = vld [vmem:[%s4812_s14 + $0xd0] sm:$0xff] }
0x2992   :  { %2818 = vmatprep.subr.mxu0 %v2463_v9  ;;  %2889 = vmatprep.subr.mxu1 %v2591_v10  ;;  %v2964_v6 = vld [vmem:[%s4812_s14 + $0x170] sm:$0xff]  ;;  %v2979_v10 = vld [vmem:[%s4812_s14 + $0x1e8] sm:$0xff] }
0x2993   :  { %2819 = vmatpush2.msra.mxu0 %v2462_v8  ;;  %2890 = vmatpush2.msra.mxu1 %v2590_v12  ;;  %v2928_v9 = vld [vmem:[%s4812_s14 + $0x50] sm:$0xff]  ;;  %v2943_v8 = vld [vmem:[%s4812_s14 + $0xc8] sm:$0xff] }
0x2994   :  { %2820 = vmatprep.subr.mxu0 %v2459_v13  ;;  %2891 = vmatprep.subr.mxu1 %v2587_v59  ;;  %v2963_v12 = vld [vmem:[%s4812_s14 + $0x168] sm:$0xff]  ;;  %v2978_v59 = vld [vmem:[%s4812_s14 + $0x1e0] sm:$0xff] }
0x2995   :  { %2821 = vmatpush2.msra.mxu0 %v2458_v14  ;;  %2892 = vmatpush2.msra.mxu1 %v2586_v15  ;;  %v2927_v13 = vld [vmem:[%s4812_s14 + $0x48] sm:$0xff]  ;;  %v2942_v14 = vld [vmem:[%s4812_s14 + $0xc0] sm:$0xff] }
0x2996   :  { %2822 = vmatprep.subr.mxu0 %v2455_v16  ;;  %2893 = vmatprep.subr.mxu1 %v2583_v17  ;;  %v2962_v15 = vld [vmem:[%s4812_s14 + $0x160] sm:$0xff]  ;;  %v2977_v17 = vld [vmem:[%s4812_s14 + $0x1d8] sm:$0xff] }
0x2997   :  { %2823 = vmatpush2.msra.mxu0 %v2454_v18  ;;  %2894 = vmatpush2.msra.mxu1 %v2582_v19  ;;  %v2926_v16 = vld [vmem:[%s4812_s14 + $0x40] sm:$0xff]  ;;  %v2941_v18 = vld [vmem:[%s4812_s14 + $0xb8] sm:$0xff] }
0x2998   :  { %2824 = vmatprep.subr.mxu0 %v2451_v20  ;;  %2895 = vmatprep.subr.mxu1 %v2579_v21  ;;  %v2961_v19 = vld [vmem:[%s4812_s14 + $0x158] sm:$0xff]  ;;  %v2976_v21 = vld [vmem:[%s4812_s14 + $0x1d0] sm:$0xff] }
0x2999   :  { %2825 = vmatpush2.msra.mxu0 %v2450_v22  ;;  %2896 = vmatpush2.msra.mxu1 %v2578_v26  ;;  %v2925_v20 = vld [vmem:[%s4812_s14 + $0x38] sm:$0xff]  ;;  %v2940_v22 = vld [vmem:[%s4812_s14 + $0xb0] sm:$0xff] }
0x299a   :  { %2826 = vmatprep.subr.mxu0 %v2447_v27  ;;  %2897 = vmatprep.subr.mxu1 %v2575_v29  ;;  %v2960_v26 = vld [vmem:[%s4812_s14 + $0x150] sm:$0xff]  ;;  %v2975_v29 = vld [vmem:[%s4812_s14 + $0x1c8] sm:$0xff] }
0x299b   :  { %2827 = vmatpush2.msra.mxu0 %v2446_v30  ;;  %2898 = vmatpush2.msra.mxu1 %v2574_v31  ;;  %v2924_v27 = vld [vmem:[%s4812_s14 + $0x30] sm:$0xff]  ;;  %v2939_v30 = vld [vmem:[%s4812_s14 + $0xa8] sm:$0xff] }
0x299c   :  { %2828 = vmatprep.subr.mxu0 %v2443_v32  ;;  %2899 = vmatprep.subr.mxu1 %v2571_v33  ;;  %v2959_v31 = vld [vmem:[%s4812_s14 + $0x148] sm:$0xff]  ;;  %v2974_v33 = vld [vmem:[%s4812_s14 + $0x1c0] sm:$0xff] }
0x299d   :  { %2829 = vmatpush2.msra.mxu0 %v2442_v34  ;;  %2900 = vmatpush2.msra.mxu1 %v2570_v35  ;;  %v2923_v32 = vld [vmem:[%s4812_s14 + $0x28] sm:$0xff]  ;;  %v2938_v34 = vld [vmem:[%s4812_s14 + $0xa0] sm:$0xff] }
0x299e   :  { %2830 = vmatprep.subr.mxu0 %v2439_v36  ;;  %2901 = vmatprep.subr.mxu1 %v2567_v37  ;;  %v2958_v35 = vld [vmem:[%s4812_s14 + $0x140] sm:$0xff]  ;;  %v2973_v37 = vld [vmem:[%s4812_s14 + $0x1b8] sm:$0xff] }
0x299f   :  { %2831 = vmatpush2.msra.mxu0 %v2438_v38  ;;  %2902 = vmatpush2.msra.mxu1 %v2566_v39  ;;  %v2922_v36 = vld [vmem:[%s4812_s14 + $0x20] sm:$0xff]  ;;  %v2937_v38 = vld [vmem:[%s4812_s14 + $0x98] sm:$0xff] }
0x29a0   :  { %2832 = vmatprep.subr.mxu0 %v2435_v40  ;;  %2903 = vmatprep.subr.mxu1 %v2563_v57  ;;  %v2957_v39 = vld [vmem:[%s4812_s14 + $0x138] sm:$0xff]  ;;  %v2972_v57 = vld [vmem:[%s4812_s14 + $0x1b0] sm:$0xff] }
0x29a1   :  { %2833 = vmatpush2.msra.mxu0 %v2434_v55  ;;  %2904 = vmatpush2.msra.mxu1 %v2562_v62  ;;  %v2921_v40 = vld [vmem:[%s4812_s14 + $0x18] sm:$0xff]  ;;  %v2936_v55 = vld [vmem:[%s4812_s14 + $0x90] sm:$0xff] }
0x29a2   :  { %2834 = vmatprep.subr.mxu0 %v2431_v47  ;;  %2905 = vmatprep.subr.mxu1 %v2559_v48  ;;  %v2956_v62 = vld [vmem:[%s4812_s14 + $0x130] sm:$0xff]  ;;  %v2971_v48 = vld [vmem:[%s4812_s14 + $0x1a8] sm:$0xff] }
0x29a3   :  { %2835 = vmatpush2.msra.mxu0 %v2430_v24  ;;  %2906 = vmatpush2.msra.mxu1 %v2558_v49  ;;  %v2920_v47 = vld [vmem:[%s4812_s14 + $0x10] sm:$0xff]  ;;  %v2935_v24 = vld [vmem:[%s4812_s14 + $0x88] sm:$0xff] }
0x29a4   :  { %2836 = vmatprep.subr.mxu0 %v2427_v50  ;;  %2907 = vmatprep.subr.mxu1 %v2555_v51  ;;  %v2955_v49 = vld [vmem:[%s4812_s14 + $0x128] sm:$0xff]  ;;  %v2970_v51 = vld [vmem:[%s4812_s14 + $0x1a0] sm:$0xff] }
0x29a5   :  { %2837 = vmatpush2.msra.mxu0 %v2426_v52  ;;  %2908 = vmatpush2.msra.mxu1 %v2554_v54  ;;  %v2919_v50 = vld [vmem:[%s4812_s14 + $0x8] sm:$0xff]  ;;  %v2934_v52 = vld [vmem:[%s4812_s14 + $0x80] sm:$0xff] }
0x29a6   :  { %2838 = vmatprep.subr.mxu0 %v2423_v58  ;;  %2909 = vmatprep.subr.mxu1 %v2551_v2  ;;  %v2954_v54 = vld [vmem:[%s4812_s14 + $0x120] sm:$0xff]  ;;  %v2969_v2 = vld [vmem:[%s4812_s14 + $0x198] sm:$0xff] }
0x29a7   :  { %2839 = vmatpush2.msra.mxu0 %v2422_v41  ;;  %2910 = vmatpush2.msra.mxu1 %v2550_v60  ;;  %v2918_v58 = vld [vmem:[%s4812_s14] sm:$0xff]  ;;  %v2953_v41 = vld [vmem:[%s4812_s14 + $0x118] sm:$0xff]  ;;  %v2968_v60 = vld [vmem:[%s4812_s14 + $0x190] sm:$0xff] }
0x29a8   :  { %2841 = vmatmul.mubr.f32.vlgmr.msra.gmra.mxu0 %v4554_v45  ;;  %2912 = vmatmul.mubr.f32.vlgmr.msra.gmra.mxu1 %v4556_v46  ;;  %v2931_v45 = vld [vmem:[%s4812_s14 + $0x68] sm:$0xff]  ;;  %v2946_v46 = vld [vmem:[%s4812_s14 + $0xe0] sm:$0xff] }
0x29a9   :  { %3356 = vmatprep.subr.mxu0 %v2949_v63  ;;  %3391 = vmatprep.subr.mxu1 %v2981_v4  ;;  %v2952_v63 = vld [vmem:[%s4812_s14 + $0x110] sm:$0xff] }
0x29aa   :  { %3357 = vmatpush3.msra.mxu0 %v2933_v1  ;;  %3392 = vmatpush3.msra.mxu1 %v2965_v5  ;;  %v2967_v1 = vld [vmem:[%s4812_s14 + $0x188] sm:$0xff] }
0x29ab   :  { %3358 = vmatprep.subr.mxu0 %v2948_v42  ;;  %3393 = vmatprep.subr.mxu1 %v2980_v53  ;;  %v2951_v42 = vld [vmem:[%s4812_s14 + $0x108] sm:$0xff] }
0x29ac   :  { %3359 = vmatpush3.msra.mxu0 %v2932_v11  ;;  %3394 = vmatpush3.msra.mxu1 %v2964_v6  ;;  %v2966_v11 = vld [vmem:[%s4812_s14 + $0x180] sm:$0xff] }
0x29ad   :  { %3360 = vmatprep.subr.mxu0 %v2947_v61  ;;  %3395 = vmatprep.subr.mxu1 %v2979_v10  ;;  %v2950_v61 = vld [vmem:[%s4812_s14 + $0x100] sm:$0xff] }
0x29ae   :  { %3361 = vmatpush3.msra.mxu0 %v2931_v45  ;;  %3396 = vmatpush3.msra.mxu1 %v2963_v12  ;;  %v2612_v45 = vld [vmem:[%s4811_s13] sm:$0xf]  ;;  %s3882_s13 = smov [#allocation9]  }
0x29af   :  { %3362 = vmatprep.subr.mxu0 %v2946_v46  ;;  %3397 = vmatprep.subr.mxu1 %v2978_v59  ;;  %v2617_v46 = vrot.slane %v2612_v45, %v2334_v0  ;;  %v2625_v10 = vrot.slane %v2612_v45, %v2342_v28  ;;  %s3151_s14 = sshll.u32 %s3882_s13, 4  ;;  %s3152_s14 = int_to_ptr.vmem [resolvable:$true] %s3151_s14 }
0x29b0   :  { %3363 = vmatpush3.msra.mxu0 %v2930_v43  ;;  %3398 = vmatpush3.msra.mxu1 %v2962_v15  ;;  %v2621_v43 = vrot.slane %v2612_v45, %v2338_v23  ;;  %s3767_s11 = scalar_lea.vmem %s3152_s14, 128  ;;  %p3772_p6 = scmp.lt.s32.totalorder %s3152_s14, %s3152_s14 }
0x29b1   :  { %3364 = vmatprep.subr.mxu0 %v2945_v3  ;;  %3399 = vmatprep.subr.mxu1 %v2977_v17  ;;  %p3768_p5 = scmp.ne.s32.totalorder %s3152_s14, %s3767_s11  ;;  %p3773_p7 = scmp.lt.s32.totalorder %s3767_s11, %s3767_s11 }
0x29b2   :  { %3365 = vmatpush3.msra.mxu0 %v2929_v44  ;;  %3400 = vmatpush3.msra.mxu1 %v2961_v19 }
0x29b3   :  { %3366 = vmatprep.subr.mxu0 %v2944_v7  ;;  %3401 = vmatprep.subr.mxu1 %v2976_v21  ;;  %p3774_p8 = por %p3773_p7, %p3772_p6 }
0x29b4   :  { %3367 = vmatpush3.msra.mxu0 %v2928_v9  ;;  %3402 = vmatpush3.msra.mxu1 %v2960_v26 }
0x29b5   :  { %3368 = vmatprep.subr.mxu0 %v2943_v8  ;;  %3403 = vmatprep.subr.mxu1 %v2975_v29  ;;  %v2629_v8 = vrot.slane %v2612_v45, %v2346_v25  ;;  %p3775_p9 = pnand %p3774_p8, %p3768_p5 }
0x29b6   :  { %3369 = vmatpush3.msra.mxu0 %v2927_v13  ;;  %3404 = vmatpush3.msra.mxu1 %v2959_v31 }
0x29b7   :  { %3370 = vmatprep.subr.mxu0 %v2942_v14  ;;  %3405 = vmatprep.subr.mxu1 %v2974_v33 }
0x29b8   :  { %3371 = vmatpush3.msra.mxu0 %v2926_v16  ;;  %3406 = vmatpush3.msra.mxu1 %v2958_v35 }
0x29b9   :  { %3372 = vmatprep.subr.mxu0 %v2941_v18  ;;  %3407 = vmatprep.subr.mxu1 %v2973_v37 }
0x29ba   :  { %3373 = vmatpush3.msra.mxu0 %v2925_v20  ;;  %3408 = vmatpush3.msra.mxu1 %v2957_v39 }
0x29bb   :  { %3374 = vmatprep.subr.mxu0 %v2940_v22  ;;  %3409 = vmatprep.subr.mxu1 %v2972_v57 }
0x29bc   :  { %3375 = vmatpush3.msra.mxu0 %v2924_v27  ;;  %3410 = vmatpush3.msra.mxu1 %v2956_v62 }
0x29bd   :  { %3376 = vmatprep.subr.mxu0 %v2939_v30  ;;  %3411 = vmatprep.subr.mxu1 %v2971_v48 }
0x29be   :  { %3377 = vmatpush3.msra.mxu0 %v2923_v32  ;;  %3412 = vmatpush3.msra.mxu1 %v2955_v49 }
0x29bf   :  { %3378 = vmatprep.subr.mxu0 %v2938_v34  ;;  %3413 = vmatprep.subr.mxu1 %v2970_v51 }
0x29c0   :  { %3379 = vmatpush3.msra.mxu0 %v2922_v36  ;;  %3414 = vmatpush3.msra.mxu1 %v2954_v54 }
0x29c1   :  { %3380 = vmatprep.subr.mxu0 %v2937_v38  ;;  %3415 = vmatprep.subr.mxu1 %v2969_v2 }
0x29c2   :  { %3381 = vmatpush3.msra.mxu0 %v2921_v40  ;;  %3416 = vmatpush3.msra.mxu1 %v2953_v41 }
0x29c3   :  { %3382 = vmatprep.subr.mxu0 %v2936_v55  ;;  %3417 = vmatprep.subr.mxu1 %v2968_v60 }
0x29c4   :  { %3383 = vmatpush3.msra.mxu0 %v2920_v47  ;;  %3418 = vmatpush3.msra.mxu1 %v2952_v63 }
0x29c5   :  { %3384 = vmatprep.subr.mxu0 %v2935_v24  ;;  %3419 = vmatprep.subr.mxu1 %v2967_v1 }
0x29c6   :  { %3385 = vmatpush3.msra.mxu0 %v2919_v50  ;;  %3420 = vmatpush3.msra.mxu1 %v2951_v42 }
0x29c7   :  { %3386 = vmatprep.subr.mxu0 %v2934_v52  ;;  %3421 = vmatprep.subr.mxu1 %v2966_v11 }
0x29c8   :  { %3387 = vmatpush3.msra.mxu0 %v2918_v58  ;;  %3422 = vmatpush3.msra.mxu1 %v2950_v61 }
0x2a27   :  { %v2700_v3 = vpop.f32.mrf.mxu0  ;;  %v2771_v44 = vpop.f32.mrf.mxu1 }
0x2a28   :  { %v2701_v4 = vadd.f32 %v2700_v3, %v2617_v46 }
0x2a29   :  { %v2702_v5 = vpop.f32.mrf.mxu0  ;;  %v2773_v7 = vpop.f32.mrf.mxu1 }
0x2a2a   :  { %v2703_v53 = vadd.f32 %v2702_v5, %v2621_v43  ;;  %v2772_v9 = vadd.f32 %v2771_v44, %v2701_v4 }
0x2a2c   :  { %v2774_v6 = vadd.f32 %v2773_v7, %v2703_v53 }
0x2a2e   :  { %3053 = vmatprep.mubr.f32.mxu0 %v2774_v6 }
0x2a2f   :  { %3054 = vmatmul.mubr.f32.vlgmr.msra.gmra.mxu0 %v2772_v9 }
0x2a68   :  { %v2842_v0 = vpop.f32.mrf.mxu0  ;;  %v2913_v12 = vpop.f32.mrf.mxu1 }
0x2a69   :  { %v2843_v13 = vadd.f32 %v2842_v0, %v2625_v10 }
0x2a6a   :  { %v2844_v23 = vpop.f32.mrf.mxu0  ;;  %v2915_v14 = vpop.f32.mrf.mxu1 }
0x2a6b   :  { %v2845_v59 = vadd.f32 %v2844_v23, %v2629_v8  ;;  %v2914_v16 = vadd.f32 %v2913_v12, %v2843_v13 }
0x2a6d   :  { %v2916_v15 = vadd.f32 %v2915_v14, %v2845_v59 }
0x2a6f   :  { %3123 = vmatprep.mubr.f32.mxu1 %v2916_v15 }
0x2a70   :  { %3124 = vmatmul.mubr.f32.vlgmr.msra.gmra.mxu1 %v2914_v16 }
0x2a71   :  { %3778 = shalt.err (!%p3775_p9)
}
0x2a72   :  { %s3884_s23 = smov 4   ;;  %s3787_s3 = scalar_lea.vmem %s3176_s22, 128 }
0x2a73   :  { %3157 = dma.vmem_to_hbm [thread:$0]  %s3152_s14, 128, %s4815_s17, [#allocation10], %s3880_s1, %s3880_s1, %s3884_s23  }
0x2a74   :  { %p3788_p10 = scmp.ne.s32.totalorder %s3176_s22, %s3787_s3  ;;  %p3792_p11 = scmp.lt.s32.totalorder %s3176_s22, %s3176_s22 }
0x2a75   :  { %p3793_p12 = scmp.lt.s32.totalorder %s3787_s3, %s3787_s3 }
0x2a77   :  { %p3794_p13 = por %p3793_p12, %p3792_p11 }
0x2a79   :  { %p3795_p0 = pnand %p3794_p13, %p3788_p10 }
0x2a7b   :  { %3798 = shalt.err (!%p3795_p0)
}
0x2a7c   :  { %3181 = dma.vmem_to_hbm [thread:$0]  %s3176_s22, 128, %s4817_s19, [#allocation13], %s3880_s1, %s3880_s1, %s3884_s23  }
0x2a7d   :  { %s3885_s25 = smov [#allocation11]  }
0x2a7e   :  { %s3163_s12 = sshll.u32 %s3885_s25, 4  ;;  %s3164_s12 = int_to_ptr.vmem [resolvable:$true] %s3163_s12 }
0x2a7f   :  { %s3807_s27 = scalar_lea.vmem %s3164_s12, 128  ;;  %p3812_p2 = scmp.lt.s32.totalorder %s3164_s12, %s3164_s12 }
0x2a80   :  { %p3808_p1 = scmp.ne.s32.totalorder %s3164_s12, %s3807_s27  ;;  %p3813_p3 = scmp.lt.s32.totalorder %s3807_s27, %s3807_s27 }
0x2a82   :  { %p3814_p4 = por %p3813_p3, %p3812_p2 }
0x2a84   :  { %p3815_p5 = pnand %p3814_p4, %p3808_p1 }
0x2a86   :  { %3818 = shalt.err (!%p3815_p5)
}
0x2a87   :  { %3169 = dma.vmem_to_hbm [thread:$0]  %s3164_s12, 128, %s4816_s18, [#allocation10], %s3880_s1, %s3880_s1, %s3884_s23  }
0x2a88   :  { %s3886_s28 = smov [#allocation14]  }
0x2a89   :  { %s3187_s10 = sshll.u32 %s3886_s28, 4  ;;  %s3188_s10 = int_to_ptr.vmem [resolvable:$true] %s3187_s10 }
0x2a8a   :  { %s3827_s19 = scalar_lea.vmem %s3188_s10, 128  ;;  %p3832_p7 = scmp.lt.s32.totalorder %s3188_s10, %s3188_s10 }
0x2a8b   :  { %p3828_p6 = scmp.ne.s32.totalorder %s3188_s10, %s3827_s19  ;;  %p3833_p8 = scmp.lt.s32.totalorder %s3827_s19, %s3827_s19 }
0x2a8d   :  { %p3834_p9 = por %p3833_p8, %p3832_p7 }
0x2a8f   :  { %p3835_p10 = pnand %p3834_p9, %p3828_p6 }
0x2a91   :  { %3838 = shalt.err (!%p3835_p10)
}
0x2a92   :  { %3193 = dma.vmem_to_hbm [thread:$0]  %s3188_s10, 128, %s4818_s20, [#allocation13], %s3880_s1, %s3880_s1, %s3884_s23   ;;  %vm3129_vm5 = vcmask 76800   ;;  %vm3132_vm6 = vcmask 80900  }
0x2a93   :  { %v3253_v17 = vld [vmem:[%s4813_s15] ss:$0 sm:$0xff]  ;;  %s3887_s29 = smov [#allocation8]  }
0x2a94   :  { %s3139_s0 = sshll.u32 %s3887_s29, 4  ;;  %s3140_s0 = int_to_ptr.vmem [resolvable:$true] %s3139_s0 }
0x2a95   :  { %s3847_s20 = scalar_lea.vmem %s3140_s0, 128  ;;  %p3852_p12 = scmp.lt.s32.totalorder %s3140_s0, %s3140_s0 }
0x2a96   :  { %p3848_p11 = scmp.ne.s32.totalorder %s3140_s0, %s3847_s20  ;;  %p3853_p13 = scmp.lt.s32.totalorder %s3847_s20, %s3847_s20 }
0x2a98   :  { %p3854_p0 = por %p3853_p13, %p3852_p12 }
0x2a9a   :  { %p3855_p1 = pnand %p3854_p0, %p3848_p11 }
0x2aef   :  { %v3388_v56 = vpop.f32.mrf.mxu0 }
0x2af1   :  { %v3389_v25 = vpop.f32.mrf.mxu0 }
0x2af2   :  { %v3390_v28 = vadd.f32 %v3389_v25, %v3388_v56 }
0x2af4   :  { %v3056_v20 = vadd.f32 %v3390_v28, %v3253_v17 }
0x2b30   :  { %v3423_v18 = vpop.f32.mrf.mxu1 }
0x2b32   :  { %v3424_v19 = vpop.f32.mrf.mxu1 }
0x2b33   :  { %v3425_v21 = vadd.f32 %v3424_v19, %v3423_v18 }
0x2b35   :  { %v3126_v22 = vadd.f32 %v3425_v21, %v3056_v20 }
0x2b37   :  { %3130 = vst.msk [vmem:[#allocation8] sm:$0xf] %vm3129_vm5, %v3126_v22 }
0x2b38   :  { %3133 = vst.msk [vmem:[#allocation8] sm:$0xf0] %vm3132_vm6, %v3126_v22 }
0x2b39   :  { %3858 = shalt.err (!%p3855_p1)
}
0x2b3a   :  { %3145 = dma.vmem_to_hbm [thread:$0]  %s3140_s0, 128, %s4814_s16, [#allocation7], %s3880_s1, %s3880_s1, %s3884_s23  }
0x2b3b   :  { %3869 = dma.done.wait [#allocation7], 128  }
0x2b3c   :  { %3870 = vsyncadd [#allocation7], 4294967168 }
0x2b3d   :  { %3871 = dma.done.wait [#allocation10], 256  }
0x2b3e   :  { %3872 = vsyncadd [#allocation10], 4294967040 }
0x2b3f   :  { %3873 = dma.done.wait [#allocation13], 256  }
0x2b40   :  { %3874 = vsyncadd [#allocation13], 4294967040 }
0x2b41   :  { %3209 = vsyncpa [#allocation6], 1 }
0x2b42   :  { %3210 = vsyncpa [#allocation7], 1 }
0x2b43   :  { %3211 = vsyncpa [#allocation10], 1 }
0x2b44   :  { %3212 = vsyncpa [#allocation13], 1 }

</bundles_post_ra>
